<compile_context>
chip_gen: v7x
topology: tpu7x:2x2x1
jax: 0.10.0
libtpu: 0.0.40
codegen_flags: <defaults>
</compile_context>

<pallas_src>
import jax
import jax.numpy as jnp
from jax import lax
from jax.experimental import pallas as pl
from jax.experimental.pallas import tpu as pltpu


def _round_up(x, m):
    return (x + m - 1) // m * m


def _cdiv(a, b):
    return (a + b - 1) // b


def _num_tensorcores():
    """Megacore parts (2 TensorCores behind one device) get NB >= 2."""
    try:
        kind = jax.devices()[0].device_kind.lower()
    except Exception:
        return 1
    return 2 if ("v4" in kind or "v5p" in kind or "v7" in kind) else 1


# ---------------------------------------------------------------------------
# Pallas kernel: embedded input block -> LSTM recurrence, batch-major output.
#   grid = (NB, NT):
#     NB batch blocks -> "parallel"  (independent sequences; megacore sharding)
#     NT time  blocks -> "arbitrary" (sequential recurrence), TT steps each.
# ---------------------------------------------------------------------------
def lstm_recurrence_kernel(blkmax_ref,                       # SMEM (NB,) i32
                           x_ref, wih_ref, whh_ref, bias_ref, lens_ref,
                           out_ref, hT_ref, cT_ref,
                           h_sc, c_sc):
    nb = pl.program_id(0)
    tb = pl.program_id(1)
    TT = x_ref.shape[0]                  # timesteps per grid step
    Hp = h_sc.shape[-1]                  # padded hidden size (multiple of 128)

    @pl.when(tb == 0)
    def _init():
        h_sc[...] = jnp.zeros_like(h_sc)
        c_sc[...] = jnp.zeros_like(c_sc)

    # Lengths are descending-sorted, so a whole batch block can go dead early:
    # skip all MXU/EUP work for (nb, tb) blocks entirely past their max length.
    live = blkmax_ref[nb] > tb * TT

    @pl.when(live)
    def _body():
        lens = lens_ref[...]             # (BB, 1) i32
        bias = bias_ref[...]             # (1, 4*Hp) f32
        wih = wih_ref[...]               # (Ep, 4*Hp) matmul dtype (e.g. bf16)
        whh = whh_ref[...]               # (Hp, 4*Hp)
        # TODO(synk): at BB>=128 chunk the gate math per 128-lane column slab
        # (and/or fori_loop with partial unroll) to bound the f32 live set.
        for tt in range(TT):             # static unroll -> static slices only
            t = tb * TT + tt
            x_t = x_ref[tt]              # (BB, Ep)
            h_lo = h_sc[...].astype(whh.dtype)
            # Gate pre-activations: both matmuls on the MXU, f32 accumulation.
            gates = (jnp.dot(x_t, wih, preferred_element_type=jnp.float32)
                     + jnp.dot(h_lo, whh, preferred_element_type=jnp.float32)
                     + bias)                                   # (BB, 4*Hp) f32
            # sigmoid via tanh: one EUP push per gate (no divide / 2nd exp).
            i_g = 0.5 * jnp.tanh(0.5 * gates[:, 0 * Hp:1 * Hp]) + 0.5
            f_g = 0.5 * jnp.tanh(0.5 * gates[:, 1 * Hp:2 * Hp]) + 0.5
            g_g = jnp.tanh(gates[:, 2 * Hp:3 * Hp])
            o_g = 0.5 * jnp.tanh(0.5 * gates[:, 3 * Hp:4 * Hp]) + 0.5

            c_new = f_g * c_sc[...] + i_g * g_g
            h_new = o_g * jnp.tanh(c_new)

            valid = t < lens                                   # (BB, 1) bool
            h_sc[...] = jnp.where(valid, h_new, h_sc[...])     # freeze past len
            c_sc[...] = jnp.where(valid, c_new, c_sc[...])
            # Batch-major, lane-dense, 128-aligned static-slice store.
            out_ref[:, tt * Hp:(tt + 1) * Hp] = jnp.where(valid, h_new, 0.0)

    @pl.when(jnp.logical_not(live))
    def _dead():
        out_ref[...] = jnp.zeros_like(out_ref)   # pad_packed zero padding

    @pl.when(tb == pl.num_programs(1) - 1)
    def _finalize():
        hT_ref[...] = h_sc[...]
        cT_ref[...] = c_sc[...]


def run_lstm_pallas(emb_t, lens_pad, blk_max, wih_p, whh_p, bias_p, *, TT, BB):
    """emb_t: (Tp, Bp, Ep) time-major embedded inputs (matmul dtype);
    lens_pad: (Bp,) i32 descending-sorted; blk_max: (NB,) i32 per-block max len;
    wih_p: (Ep, 4*Hp); whh_p: (Hp, 4*Hp); bias_p: (1, 4*Hp) f32.
    Returns (out (Bp, Tp*Hp) f32 batch-major, h_T (Bp, Hp), c_T (Bp, Hp))."""
    Tp, Bp, Ep = emb_t.shape
    Hp = whh_p.shape[0]
    G = 4 * Hp
    NT = Tp // TT
    NB = Bp // BB
    w_bytes = jnp.dtype(wih_p.dtype).itemsize

    # VMEM budget: already includes the x2 double-buffering, do NOT multiply
    # again; cap is generation-aware (v7x: 64 MiB physical, v5e/v6e: 128 MiB).
    vmem_need = (2 * TT * BB * Ep * w_bytes        # x blocks
                 + 2 * BB * TT * Hp * 4            # out blocks
                 + 2 * (Ep + Hp) * G * w_bytes     # W_ih^T + W_hh^T
                 + 2 * G * 4                       # bias
                 + 2 * BB * 128 * 4                # lens block (lane-padded)
                 + 4 * BB * Hp * 4                 # hT / cT output buffers
                 + 2 * BB * Hp * 4)                # h / c scratch
    try:
        phys = pltpu.get_tpu_info().vmem_capacity_bytes
    except Exception:
        phys = 64 * 1024 * 1024                    # assume smallest (v7x / TC)
    cap = (phys * 3) // 4                          # headroom for compiler scratch
    vmem_limit = int(min(cap, max(32 * 1024 * 1024, vmem_need + (4 << 20))))

    out_shape = (
        jax.ShapeDtypeStruct((Bp, Tp * Hp), jnp.float32),   # batch-major h's
        jax.ShapeDtypeStruct((Bp, Hp), jnp.float32),        # h_T
        jax.ShapeDtypeStruct((Bp, Hp), jnp.float32),        # c_T
    )
    grid_spec = pltpu.PrefetchScalarGridSpec(
        num_scalar_prefetch=1,                      # blk_max -> SMEM
        grid=(NB, NT),
        in_specs=[
            pl.BlockSpec((TT, BB, Ep), lambda nb, tb, bm: (tb, nb, 0)),  # x
            # TODO(synk): these two weight blocks have a constant index_map;
            # single-buffer them (pl.Buffered(1) / tb==0 DMA) to save VMEM at
            # large Hp, and on v5e drive them weight-stationary via
            # pltpu.matmul_push_rhs.
            pl.BlockSpec((Ep, G), lambda nb, tb, bm: (0, 0)),            # W_ih^T
            pl.BlockSpec((Hp, G), lambda nb, tb, bm: (0, 0)),            # W_hh^T
            pl.BlockSpec((1, G), lambda nb, tb, bm: (0, 0)),             # bias
            pl.BlockSpec((BB, 1), lambda nb, tb, bm: (nb, 0)),           # lens
        ],
        out_specs=[
            pl.BlockSpec((BB, TT * Hp), lambda nb, tb, bm: (nb, tb)),    # out
            pl.BlockSpec((BB, Hp), lambda nb, tb, bm: (nb, 0)),          # h_T
            pl.BlockSpec((BB, Hp), lambda nb, tb, bm: (nb, 0)),          # c_T
        ],
        scratch_shapes=[pltpu.VMEM((BB, Hp), jnp.float32),               # h carry
                        pltpu.VMEM((BB, Hp), jnp.float32)],              # c carry
    )
    return pl.pallas_call(
        lstm_recurrence_kernel,
        out_shape=out_shape,
        grid_spec=grid_spec,
        compiler_params=pltpu.CompilerParams(
            dimension_semantics=("parallel", "arbitrary"),
            vmem_limit_bytes=vmem_limit),
    )(blk_max, emb_t, wih_p, whh_p, bias_p,
      lens_pad.reshape(Bp, 1).astype(jnp.int32))


# ---------------------------------------------------------------------------
# Module wrapper (mirrors the PyTorch DynamicLstm.forward)
# ---------------------------------------------------------------------------
class DynamicLstmPallas:
    def __init__(self, vocab_size, embed_size, lstm_hidden, key):
        k1, k2, k3, k4, k5 = jax.random.split(key, 5)
        self.H = lstm_hidden
        self.E = embed_size
        self.Hp = _round_up(lstm_hidden, 128)     # lane-aligned hidden size
        self.Ep = _round_up(embed_size, 128)      # lane-aligned embed size
        # nn.Embedding default init: N(0, 1)
        self.embed = jax.random.normal(k1, (vocab_size, embed_size), jnp.float32)
        # nn.LSTM default init: U(-1/sqrt(H), 1/sqrt(H)), gate order i,f,g,o
        bound = 1.0 / (lstm_hidden ** 0.5)
        self.w_ih = jax.random.uniform(k2, (4 * lstm_hidden, embed_size),
                                       jnp.float32, -bound, bound)
        self.w_hh = jax.random.uniform(k3, (4 * lstm_hidden, lstm_hidden),
                                       jnp.float32, -bound, bound)
        self.b_ih = jax.random.uniform(k4, (4 * lstm_hidden,), jnp.float32,
                                       -bound, bound)
        self.b_hh = jax.random.uniform(k5, (4 * lstm_hidden,), jnp.float32,
                                       -bound, bound)

    def _padded_params(self, dt):
        """Per-gate zero-padding H -> Hp (lane-aligned gate slices) and E -> Ep.
        All padded rows/columns are exactly zero, so they never leak into the
        real H columns (padded gate cols give i=f=o=0.5, g=0 => h,c stay 0)."""
        H, E, Hp, Ep = self.H, self.E, self.Hp, self.Ep
        wih_p = jnp.pad(self.w_ih.T.reshape(E, 4, H),
                        ((0, Ep - E), (0, 0), (0, Hp - H))
                        ).reshape(Ep, 4 * Hp).astype(dt)
        whh_p = jnp.pad(self.w_hh.T.reshape(H, 4, H),
                        ((0, Hp - H), (0, 0), (0, Hp - H))
                        ).reshape(Hp, 4 * Hp).astype(dt)
        bias_p = jnp.pad((self.b_ih + self.b_hh).reshape(4, H),
                         ((0, 0), (0, Hp - H))).reshape(1, 4 * Hp).astype(jnp.float32)
        embed_p = jnp.pad(self.embed, ((0, 0), (0, Ep - E))).astype(dt)
        return embed_p, wih_p, whh_p, bias_p

    def _pick_tiles(self, B, T, TT, BB):
        if BB is None:
            b8 = _round_up(B, 8)
            BB = min(b8, 128)                       # fill the MXU LHS rows
            # Megacore / v7x: keep NB >= 2 when the batch is big enough so the
            # "parallel" grid axis spans both TensorCores.
            if _num_tensorcores() >= 2 and b8 >= 32 and b8 // BB < 2:
                BB = _round_up(b8 // 2, 8)
        if TT is None:
            # ~16 steps/block, but avoid padding T excessively for short seqs.
            TT = _cdiv(T, _cdiv(T, 16))
        Bp = _round_up(B, BB)
        Tp = _round_up(T, TT)
        return TT, BB, Tp, Bp

    def __call__(self, padded_ids, lengths, matmul_dtype=jnp.bfloat16,
                 TT=None, BB=None):
        B, T = padded_ids.shape
        H, Hp = self.H, self.Hp
        TT, BB, Tp, Bp = self._pick_tiles(B, T, TT, BB)

        # len_txt.sort(descending=True) / un_ids (as in the PyTorch module)
        sort_idx = jnp.argsort(-lengths)
        un_ids = jnp.argsort(sort_idx)
        lens_sorted = lengths[sort_idx].astype(jnp.int32)
        ids_sorted = padded_ids[sort_idx]

        # pad batch/time; padded rows get length 0 (fully masked in the kernel)
        ids_pad = jnp.zeros((Bp, Tp), padded_ids.dtype).at[:B, :T].set(ids_sorted)
        lens_pad = jnp.zeros((Bp,), jnp.int32).at[:B].set(lens_sorted)
        # per-batch-block max length (descending-sorted) -> dead-block skipping
        blk_max = lens_pad.reshape(Bp // BB, BB).max(axis=1).astype(jnp.int32)

        embed_p, wih_p, whh_p, bias_p = self._padded_params(matmul_dtype)
        # Embedding gather directly in time-major, lane-padded, matmul-dtype
        # layout; this small slab is all the kernel streams from HBM (the big
        # f32 gate slab of rev 2 is gone — projection happens in-kernel).
        # TODO(synk): fuse the gather into the kernel (scalar-prefetched ids +
        # per-row DMA) to also skip embedding rows past each sequence length.
        emb_t = jnp.take(embed_p, ids_pad.T, axis=0)        # (Tp, Bp, Ep)

        out2d, hT, cT = run_lstm_pallas(emb_t, lens_pad, blk_max,
                                        wih_p, whh_p, bias_p, TT=TT, BB=BB)

        # Kernel already emits batch-major output; only the mandatory un-sort
        # gather (fused with the crop of the alignment padding) remains.
        out_sorted = out2d.reshape(Bp, Tp, Hp)[:B, :T, :H]
        pad_back_out = out_sorted[un_ids]
        ht = hT[:B, :H][None]     # (1, B, H) in sorted order, like nn.LSTM
        ct = cT[:B, :H][None]
        return pad_back_out, (ht, ct)

    # pure-JAX reference (lax.scan) with identical masking semantics.
    # matmul_dtype lets us reproduce the kernel's bf16-operand numerics.
    def reference(self, padded_ids, lengths, matmul_dtype=jnp.float32):
        dt = matmul_dtype
        sort_idx = jnp.argsort(-lengths)
        un_ids = jnp.argsort(sort_idx)
        lens_sorted = lengths[sort_idx]
        ids_sorted = padded_ids[sort_idx]
        emb = jnp.take(self.embed, ids_sorted, axis=0)
        wih_t = self.w_ih.T.astype(dt)
        whh_t = self.w_hh.T.astype(dt)
        bias = (self.b_ih + self.b_hh).reshape(1, -1)
        B, T, _ = emb.shape
        H = self.H

        def step(carry, inp):
            h, c = carry
            xt, t = inp
            gates = (jnp.dot(xt.astype(dt), wih_t, preferred_element_type=jnp.float32)
                     + jnp.dot(h.astype(dt), whh_t, preferred_element_type=jnp.float32)
                     + bias)
            i = jax.nn.sigmoid(gates[:, :H])
            f = jax.nn.sigmoid(gates[:, H:2 * H])
            g = jnp.tanh(gates[:, 2 * H:3 * H])
            o = jax.nn.sigmoid(gates[:, 3 * H:])
            c_new = f * c + i * g
            h_new = o * jnp.tanh(c_new)
            valid = (t < lens_sorted)[:, None]
            h = jnp.where(valid, h_new, h)
            c = jnp.where(valid, c_new, c)
            return (h, c), jnp.where(valid, h_new, 0.0)

        (hT, cT), outs = jax.lax.scan(
            step,
            (jnp.zeros((B, H), jnp.float32), jnp.zeros((B, H), jnp.float32)),
            (jnp.transpose(emb, (1, 0, 2)), jnp.arange(T)))
        out_bth = jnp.transpose(outs, (1, 0, 2))
        return out_bth[un_ids], (hT[None], cT[None])


if __name__ == "__main__":
    import numpy as np

    vocab_size, embed_size, lstm_hidden = 50, 16, 32
    key = jax.random.PRNGKey(0)
    k_model, k_ids = jax.random.split(key)

    model = DynamicLstmPallas(vocab_size, embed_size, lstm_hidden, k_model)

    # ragged ids_list with lengths [5, 13, 3], padded to T_max = 13 with 0s
    lengths = jnp.array([5, 13, 3], dtype=jnp.int32)
    B, T = 3, 13
    raw_ids = jax.random.randint(k_ids, (B, T), 1, vocab_size, dtype=jnp.int32)
    mask = jnp.arange(T)[None, :] < lengths[:, None]
    padded_ids = jnp.where(mask, raw_ids, 0)          # pad_sequence pads with 0

    # Pallas kernel forward (bf16 MXU operands, f32 accumulation/elementwise)
    pad_back_out, (ht, ct) = model(padded_ids, lengths)
    jax.block_until_ready((pad_back_out, ht, ct))

    # 1) tight structural check vs a scan reference using identical (bf16
    #    operand / f32 accumulate) matmul numerics
    ref_bf, (ref_ht_bf, ref_ct_bf) = model.reference(
        padded_ids, lengths, matmul_dtype=jnp.bfloat16)
    np.testing.assert_allclose(np.asarray(pad_back_out), np.asarray(ref_bf),
                               rtol=2e-3, atol=2e-3)
    np.testing.assert_allclose(np.asarray(ht), np.asarray(ref_ht_bf),
                               rtol=2e-3, atol=2e-3)
    np.testing.assert_allclose(np.asarray(ct), np.asarray(ref_ct_bf),
                               rtol=2e-3, atol=2e-3)

    # 2) sanity check vs the pure-f32 reference (bf16 matmul tolerance)
    ref_out, (ref_ht, ref_ct) = model.reference(padded_ids, lengths)
    np.testing.assert_allclose(np.asarray(pad_back_out), np.asarray(ref_out),
                               rtol=5e-2, atol=5e-2)
    np.testing.assert_allclose(np.asarray(ht), np.asarray(ref_ht),
                               rtol=5e-2, atol=5e-2)
    np.testing.assert_allclose(np.asarray(ct), np.asarray(ref_ct),
                               rtol=5e-2, atol=5e-2)

    print("KERNEL_OK")
</pallas_src>

<mosaic_0001>
module attributes {stable_mosaic.version = 11 : i64} {
  func.func @lstm_recurrence_kernel(%arg0: i32, %arg1: i32, %arg2: memref<1xi32, #tpu.memory_space<smem>>, %arg3: memref<13x8x128xbf16, #tpu.memory_space<vmem>>, %arg4: memref<128x512xbf16, #tpu.memory_space<vmem>>, %arg5: memref<128x512xbf16, #tpu.memory_space<vmem>>, %arg6: memref<1x512xf32, #tpu.memory_space<vmem>>, %arg7: memref<8x1xi32, #tpu.memory_space<vmem>>, %arg8: memref<8x1664xf32, #tpu.memory_space<vmem>>, %arg9: memref<8x128xf32, #tpu.memory_space<vmem>>, %arg10: memref<8x128xf32, #tpu.memory_space<vmem>>, %arg11: memref<8x128xf32, #tpu.memory_space<vmem>>, %arg12: memref<8x128xf32, #tpu.memory_space<vmem>>) attributes {dimension_semantics = [#tpu.dimension_semantics<parallel>, #tpu.dimension_semantics<arbitrary>], iteration_bounds = array<i64: 1, 1>, scalar_prefetch = 1 : i64, scratch_operands = 2 : i64, tpu.core_type = #tpu.core_type<tc>, window_params = [{transform_indices = @transform_0, window_bounds = array<i64: 13, 8, 128>}, {pipeline_mode = #tpu.pipeline_mode<synchronous>, transform_indices = @transform_1, window_bounds = array<i64: 128, 512>}, {pipeline_mode = #tpu.pipeline_mode<synchronous>, transform_indices = @transform_2, window_bounds = array<i64: 128, 512>}, {pipeline_mode = #tpu.pipeline_mode<synchronous>, transform_indices = @transform_3, window_bounds = array<i64: 1, 512>}, {transform_indices = @transform_4, window_bounds = array<i64: 8, 1>}, {transform_indices = @transform_5, window_bounds = array<i64: 8, 1664>}, {transform_indices = @transform_6, window_bounds = array<i64: 8, 128>}, {transform_indices = @transform_7, window_bounds = array<i64: 8, 128>}]} {
    %c0_i32 = arith.constant 0 : i32
    %0 = arith.cmpi eq, %arg1, %c0_i32 : i32
    %1 = arith.extui %0 : i1 to i32
    %c0_i32_0 = arith.constant 0 : i32
    %2 = arith.cmpi ne, %1, %c0_i32_0 : i32
    scf.if %2 {
      %cst = arith.constant 0.000000e+00 : f32
      %15 = vector.broadcast %cst : f32 to vector<8x128xf32>
      %c0 = arith.constant 0 : index
      %c0_5 = arith.constant 0 : index
      %16 = vector.load %arg11[%c0, %c0_5] : memref<8x128xf32, #tpu.memory_space<vmem>>, vector<8x128xf32>
      tpu.vector_store %arg11[%c0, %c0_5], %15 {strides = array<i32>} : memref<8x128xf32, #tpu.memory_space<vmem>>, vector<8x128xf32>,
      %cst_6 = arith.constant 0.000000e+00 : f32
      %17 = vector.broadcast %cst_6 : f32 to vector<8x128xf32>
      %c0_7 = arith.constant 0 : index
      %c0_8 = arith.constant 0 : index
      %18 = vector.load %arg12[%c0_7, %c0_8] : memref<8x128xf32, #tpu.memory_space<vmem>>, vector<8x128xf32>
      tpu.vector_store %arg12[%c0_7, %c0_8], %17 {strides = array<i32>} : memref<8x128xf32, #tpu.memory_space<vmem>>, vector<8x128xf32>,
    } else {
    }
    %3 = arith.index_cast %arg0 : i32 to index
    %4 = memref.load %arg2[%3] : memref<1xi32, #tpu.memory_space<smem>>
    %c13_i32 = arith.constant 13 : i32
    %5 = arith.muli %arg1, %c13_i32 : i32
    %6 = arith.cmpi sgt, %4, %5 : i32
    %7 = arith.extui %6 : i1 to i32
    %c0_i32_1 = arith.constant 0 : i32
    %8 = arith.cmpi ne, %7, %c0_i32_1 : i32
    scf.if %8 {
      %c0 = arith.constant 0 : index
      %c0_5 = arith.constant 0 : index
      %15 = vector.load %arg7[%c0, %c0_5] : memref<8x1xi32, #tpu.memory_space<vmem>>, vector<8x1xi32>
      %c0_6 = arith.constant 0 : index
      %c0_7 = arith.constant 0 : index
      %16 = vector.load %arg6[%c0_6, %c0_7] : memref<1x512xf32, #tpu.memory_space<vmem>>, vector<1x512xf32>
      %c0_8 = arith.constant 0 : index
      %c0_9 = arith.constant 0 : index
      %17 = vector.load %arg4[%c0_8, %c0_9] : memref<128x512xbf16, #tpu.memory_space<vmem>>, vector<128x512xbf16>
      %c0_10 = arith.constant 0 : index
      %c0_11 = arith.constant 0 : index
      %18 = vector.load %arg5[%c0_10, %c0_11] : memref<128x512xbf16, #tpu.memory_space<vmem>>, vector<128x512xbf16>
      %c13_i32_12 = arith.constant 13 : i32
      %19 = arith.muli %arg1, %c13_i32_12 : i32
      %c0_i32_13 = arith.constant 0 : i32
      %20 = arith.addi %19, %c0_i32_13 : i32
      %c0_14 = arith.constant 0 : index
      %c0_15 = arith.constant 0 : index
      %c0_16 = arith.constant 0 : index
      %21 = vector.load %arg3[%c0_14, %c0_15, %c0_16] : memref<13x8x128xbf16, #tpu.memory_space<vmem>>, vector<1x8x128xbf16>
      %22 = vector.shape_cast %21 : vector<1x8x128xbf16> to vector<8x128xbf16>
      %c0_17 = arith.constant 0 : index
      %c0_18 = arith.constant 0 : index
      %23 = vector.load %arg11[%c0_17, %c0_18] : memref<8x128xf32, #tpu.memory_space<vmem>>, vector<8x128xf32>
      %24 = arith.truncf %23 : vector<8x128xf32> to vector<8x128xbf16>
      %cst = arith.constant dense<0.000000e+00> : vector<8x512xf32>
      %25 = tpu.matmul %22, %17, %cst {dimension_numbers = #tpu.dot_dimension_numbers<[1], [0], [0], [1], [0, 0, 1, 1], [], []>} : vector<8x128xbf16>, vector<128x512xbf16>, vector<8x512xf32> -> vector<8x512xf32>
      %cst_19 = arith.constant dense<0.000000e+00> : vector<8x512xf32>
      %26 = tpu.matmul %24, %18, %cst_19 {dimension_numbers = #tpu.dot_dimension_numbers<[1], [0], [0], [1], [0, 0, 1, 1], [], []>} : vector<8x128xbf16>, vector<128x512xbf16>, vector<8x512xf32> -> vector<8x512xf32>
      %27 = arith.addf %25, %26 : vector<8x512xf32>
      %28 = vector.broadcast %16 : vector<1x512xf32> to vector<8x512xf32>
      %29 = arith.addf %27, %28 : vector<8x512xf32>
      %30 = vector.extract_strided_slice %29 {offsets = [0, 0], sizes = [8, 128], strides = [1, 1]} : vector<8x512xf32> to vector<8x128xf32>
      %cst_20 = arith.constant 5.000000e-01 : f32
      %31 = vector.broadcast %cst_20 : f32 to vector<8x128xf32>
      %32 = arith.mulf %31, %30 : vector<8x128xf32>
      %33 = math.tanh %32 : vector<8x128xf32>
      %cst_21 = arith.constant 5.000000e-01 : f32
      %34 = vector.broadcast %cst_21 : f32 to vector<8x128xf32>
      %35 = arith.mulf %34, %33 : vector<8x128xf32>
      %cst_22 = arith.constant 5.000000e-01 : f32
      %36 = vector.broadcast %cst_22 : f32 to vector<8x128xf32>
      %37 = arith.addf %35, %36 : vector<8x128xf32>
      %38 = vector.extract_strided_slice %29 {offsets = [0, 128], sizes = [8, 128], strides = [1, 1]} : vector<8x512xf32> to vector<8x128xf32>
      %cst_23 = arith.constant 5.000000e-01 : f32
      %39 = vector.broadcast %cst_23 : f32 to vector<8x128xf32>
      %40 = arith.mulf %39, %38 : vector<8x128xf32>
      %41 = math.tanh %40 : vector<8x128xf32>
      %cst_24 = arith.constant 5.000000e-01 : f32
      %42 = vector.broadcast %cst_24 : f32 to vector<8x128xf32>
      %43 = arith.mulf %42, %41 : vector<8x128xf32>
      %cst_25 = arith.constant 5.000000e-01 : f32
      %44 = vector.broadcast %cst_25 : f32 to vector<8x128xf32>
      %45 = arith.addf %43, %44 : vector<8x128xf32>
      %46 = vector.extract_strided_slice %29 {offsets = [0, 256], sizes = [8, 128], strides = [1, 1]} : vector<8x512xf32> to vector<8x128xf32>
      %47 = math.tanh %46 : vector<8x128xf32>
      %48 = vector.extract_strided_slice %29 {offsets = [0, 384], sizes = [8, 128], strides = [1, 1]} : vector<8x512xf32> to vector<8x128xf32>
      %cst_26 = arith.constant 5.000000e-01 : f32
      %49 = vector.broadcast %cst_26 : f32 to vector<8x128xf32>
      %50 = arith.mulf %49, %48 : vector<8x128xf32>
      %51 = math.tanh %50 : vector<8x128xf32>
      %cst_27 = arith.constant 5.000000e-01 : f32
      %52 = vector.broadcast %cst_27 : f32 to vector<8x128xf32>
      %53 = arith.mulf %52, %51 : vector<8x128xf32>
      %cst_28 = arith.constant 5.000000e-01 : f32
      %54 = vector.broadcast %cst_28 : f32 to vector<8x128xf32>
      %55 = arith.addf %53, %54 : vector<8x128xf32>
      %c0_29 = arith.constant 0 : index
      %c0_30 = arith.constant 0 : index
      %56 = vector.load %arg12[%c0_29, %c0_30] : memref<8x128xf32, #tpu.memory_space<vmem>>, vector<8x128xf32>
      %57 = arith.mulf %45, %56 : vector<8x128xf32>
      %58 = arith.mulf %37, %47 : vector<8x128xf32>
      %59 = arith.addf %57, %58 : vector<8x128xf32>
      %60 = math.tanh %59 : vector<8x128xf32>
      %61 = arith.mulf %55, %60 : vector<8x128xf32>
      %62 = vector.broadcast %20 : i32 to vector<8x1xi32>
      %63 = arith.cmpi slt, %62, %15 : vector<8x1xi32>
      %c0_31 = arith.constant 0 : index
      %c0_32 = arith.constant 0 : index
      %64 = vector.load %arg11[%c0_31, %c0_32] : memref<8x128xf32, #tpu.memory_space<vmem>>, vector<8x128xf32>
      %65 = vector.shape_cast %63 : vector<8x1xi1> to vector<8x1xi1>
      %66 = vector.broadcast %65 : vector<8x1xi1> to vector<8x128xi1>
      %67 = arith.select %66, %61, %64 : vector<8x128xi1>, vector<8x128xf32>
      %c0_33 = arith.constant 0 : index
      %c0_34 = arith.constant 0 : index
      %68 = vector.load %arg11[%c0_33, %c0_34] : memref<8x128xf32, #tpu.memory_space<vmem>>, vector<8x128xf32>
      tpu.vector_store %arg11[%c0_33, %c0_34], %67 {strides = array<i32>} : memref<8x128xf32, #tpu.memory_space<vmem>>, vector<8x128xf32>,
      %c0_35 = arith.constant 0 : index
      %c0_36 = arith.constant 0 : index
      %69 = vector.load %arg12[%c0_35, %c0_36] : memref<8x128xf32, #tpu.memory_space<vmem>>, vector<8x128xf32>
      %70 = vector.shape_cast %63 : vector<8x1xi1> to vector<8x1xi1>
      %71 = vector.broadcast %70 : vector<8x1xi1> to vector<8x128xi1>
      %72 = arith.select %71, %59, %69 : vector<8x128xi1>, vector<8x128xf32>
      %c0_37 = arith.constant 0 : index
      %c0_38 = arith.constant 0 : index
      %73 = vector.load %arg12[%c0_37, %c0_38] : memref<8x128xf32, #tpu.memory_space<vmem>>, vector<8x128xf32>
      tpu.vector_store %arg12[%c0_37, %c0_38], %72 {strides = array<i32>} : memref<8x128xf32, #tpu.memory_space<vmem>>, vector<8x128xf32>,
      %cst_39 = arith.constant 0.000000e+00 : f32
      %74 = vector.shape_cast %63 : vector<8x1xi1> to vector<8x1xi1>
      %75 = vector.broadcast %74 : vector<8x1xi1> to vector<8x128xi1>
      %76 = vector.broadcast %cst_39 : f32 to vector<8x128xf32>
      %77 = arith.select %75, %61, %76 : vector<8x128xi1>, vector<8x128xf32>
      %c0_40 = arith.constant 0 : index
      %c0_41 = arith.constant 0 : index
      %78 = vector.load %arg8[%c0_40, %c0_41] : memref<8x1664xf32, #tpu.memory_space<vmem>>, vector<8x128xf32>
      tpu.vector_store %arg8[%c0_40, %c0_41], %77 {strides = array<i32>} : memref<8x1664xf32, #tpu.memory_space<vmem>>, vector<8x128xf32>,
      %c13_i32_42 = arith.constant 13 : i32
      %79 = arith.muli %arg1, %c13_i32_42 : i32
      %c1_i32 = arith.constant 1 : i32
      %80 = arith.addi %79, %c1_i32 : i32
      %c1 = arith.constant 1 : index
      %c0_43 = arith.constant 0 : index
      %c0_44 = arith.constant 0 : index
      %81 = vector.load %arg3[%c1, %c0_43, %c0_44] : memref<13x8x128xbf16, #tpu.memory_space<vmem>>, vector<1x8x128xbf16>
      %82 = vector.shape_cast %81 : vector<1x8x128xbf16> to vector<8x128xbf16>
      %c0_45 = arith.constant 0 : index
      %c0_46 = arith.constant 0 : index
      %83 = vector.load %arg11[%c0_45, %c0_46] : memref<8x128xf32, #tpu.memory_space<vmem>>, vector<8x128xf32>
      %84 = arith.truncf %83 : vector<8x128xf32> to vector<8x128xbf16>
      %cst_47 = arith.constant dense<0.000000e+00> : vector<8x512xf32>
      %85 = tpu.matmul %82, %17, %cst_47 {dimension_numbers = #tpu.dot_dimension_numbers<[1], [0], [0], [1], [0, 0, 1, 1], [], []>} : vector<8x128xbf16>, vector<128x512xbf16>, vector<8x512xf32> -> vector<8x512xf32>
      %cst_48 = arith.constant dense<0.000000e+00> : vector<8x512xf32>
      %86 = tpu.matmul %84, %18, %cst_48 {dimension_numbers = #tpu.dot_dimension_numbers<[1], [0], [0], [1], [0, 0, 1, 1], [], []>} : vector<8x128xbf16>, vector<128x512xbf16>, vector<8x512xf32> -> vector<8x512xf32>
      %87 = arith.addf %85, %86 : vector<8x512xf32>
      %88 = vector.broadcast %16 : vector<1x512xf32> to vector<8x512xf32>
      %89 = arith.addf %87, %88 : vector<8x512xf32>
      %90 = vector.extract_strided_slice %89 {offsets = [0, 0], sizes = [8, 128], strides = [1, 1]} : vector<8x512xf32> to vector<8x128xf32>
      %cst_49 = arith.constant 5.000000e-01 : f32
      %91 = vector.broadcast %cst_49 : f32 to vector<8x128xf32>
      %92 = arith.mulf %91, %90 : vector<8x128xf32>
      %93 = math.tanh %92 : vector<8x128xf32>
      %cst_50 = arith.constant 5.000000e-01 : f32
      %94 = vector.broadcast %cst_50 : f32 to vector<8x128xf32>
      %95 = arith.mulf %94, %93 : vector<8x128xf32>
      %cst_51 = arith.constant 5.000000e-01 : f32
      %96 = vector.broadcast %cst_51 : f32 to vector<8x128xf32>
      %97 = arith.addf %95, %96 : vector<8x128xf32>
      %98 = vector.extract_strided_slice %89 {offsets = [0, 128], sizes = [8, 128], strides = [1, 1]} : vector<8x512xf32> to vector<8x128xf32>
      %cst_52 = arith.constant 5.000000e-01 : f32
      %99 = vector.broadcast %cst_52 : f32 to vector<8x128xf32>
      %100 = arith.mulf %99, %98 : vector<8x128xf32>
      %101 = math.tanh %100 : vector<8x128xf32>
      %cst_53 = arith.constant 5.000000e-01 : f32
      %102 = vector.broadcast %cst_53 : f32 to vector<8x128xf32>
      %103 = arith.mulf %102, %101 : vector<8x128xf32>
      %cst_54 = arith.constant 5.000000e-01 : f32
      %104 = vector.broadcast %cst_54 : f32 to vector<8x128xf32>
      %105 = arith.addf %103, %104 : vector<8x128xf32>
      %106 = vector.extract_strided_slice %89 {offsets = [0, 256], sizes = [8, 128], strides = [1, 1]} : vector<8x512xf32> to vector<8x128xf32>
      %107 = math.tanh %106 : vector<8x128xf32>
      %108 = vector.extract_strided_slice %89 {offsets = [0, 384], sizes = [8, 128], strides = [1, 1]} : vector<8x512xf32> to vector<8x128xf32>
      %cst_55 = arith.constant 5.000000e-01 : f32
      %109 = vector.broadcast %cst_55 : f32 to vector<8x128xf32>
      %110 = arith.mulf %109, %108 : vector<8x128xf32>
      %111 = math.tanh %110 : vector<8x128xf32>
      %cst_56 = arith.constant 5.000000e-01 : f32
      %112 = vector.broadcast %cst_56 : f32 to vector<8x128xf32>
      %113 = arith.mulf %112, %111 : vector<8x128xf32>
      %cst_57 = arith.constant 5.000000e-01 : f32
      %114 = vector.broadcast %cst_57 : f32 to vector<8x128xf32>
      %115 = arith.addf %113, %114 : vector<8x128xf32>
      %c0_58 = arith.constant 0 : index
      %c0_59 = arith.constant 0 : index
      %116 = vector.load %arg12[%c0_58, %c0_59] : memref<8x128xf32, #tpu.memory_space<vmem>>, vector<8x128xf32>
      %117 = arith.mulf %105, %116 : vector<8x128xf32>
      %118 = arith.mulf %97, %107 : vector<8x128xf32>
      %119 = arith.addf %117, %118 : vector<8x128xf32>
      %120 = math.tanh %119 : vector<8x128xf32>
      %121 = arith.mulf %115, %120 : vector<8x128xf32>
      %122 = vector.broadcast %80 : i32 to vector<8x1xi32>
      %123 = arith.cmpi slt, %122, %15 : vector<8x1xi32>
      %c0_60 = arith.constant 0 : index
      %c0_61 = arith.constant 0 : index
      %124 = vector.load %arg11[%c0_60, %c0_61] : memref<8x128xf32, #tpu.memory_space<vmem>>, vector<8x128xf32>
      %125 = vector.shape_cast %123 : vector<8x1xi1> to vector<8x1xi1>
      %126 = vector.broadcast %125 : vector<8x1xi1> to vector<8x128xi1>
      %127 = arith.select %126, %121, %124 : vector<8x128xi1>, vector<8x128xf32>
      %c0_62 = arith.constant 0 : index
      %c0_63 = arith.constant 0 : index
      %128 = vector.load %arg11[%c0_62, %c0_63] : memref<8x128xf32, #tpu.memory_space<vmem>>, vector<8x128xf32>
      tpu.vector_store %arg11[%c0_62, %c0_63], %127 {strides = array<i32>} : memref<8x128xf32, #tpu.memory_space<vmem>>, vector<8x128xf32>,
      %c0_64 = arith.constant 0 : index
      %c0_65 = arith.constant 0 : index
      %129 = vector.load %arg12[%c0_64, %c0_65] : memref<8x128xf32, #tpu.memory_space<vmem>>, vector<8x128xf32>
      %130 = vector.shape_cast %123 : vector<8x1xi1> to vector<8x1xi1>
      %131 = vector.broadcast %130 : vector<8x1xi1> to vector<8x128xi1>
      %132 = arith.select %131, %119, %129 : vector<8x128xi1>, vector<8x128xf32>
      %c0_66 = arith.constant 0 : index
      %c0_67 = arith.constant 0 : index
      %133 = vector.load %arg12[%c0_66, %c0_67] : memref<8x128xf32, #tpu.memory_space<vmem>>, vector<8x128xf32>
      tpu.vector_store %arg12[%c0_66, %c0_67], %132 {strides = array<i32>} : memref<8x128xf32, #tpu.memory_space<vmem>>, vector<8x128xf32>,
      %cst_68 = arith.constant 0.000000e+00 : f32
      %134 = vector.shape_cast %123 : vector<8x1xi1> to vector<8x1xi1>
      %135 = vector.broadcast %134 : vector<8x1xi1> to vector<8x128xi1>
      %136 = vector.broadcast %cst_68 : f32 to vector<8x128xf32>
      %137 = arith.select %135, %121, %136 : vector<8x128xi1>, vector<8x128xf32>
      %c0_69 = arith.constant 0 : index
      %c128 = arith.constant 128 : index
      %138 = vector.load %arg8[%c0_69, %c128] : memref<8x1664xf32, #tpu.memory_space<vmem>>, vector<8x128xf32>
      tpu.vector_store %arg8[%c0_69, %c128], %137 {strides = array<i32>} : memref<8x1664xf32, #tpu.memory_space<vmem>>, vector<8x128xf32>,
      %c13_i32_70 = arith.constant 13 : i32
      %139 = arith.muli %arg1, %c13_i32_70 : i32
      %c2_i32 = arith.constant 2 : i32
      %140 = arith.addi %139, %c2_i32 : i32
      %c2 = arith.constant 2 : index
      %c0_71 = arith.constant 0 : index
      %c0_72 = arith.constant 0 : index
      %141 = vector.load %arg3[%c2, %c0_71, %c0_72] : memref<13x8x128xbf16, #tpu.memory_space<vmem>>, vector<1x8x128xbf16>
      %142 = vector.shape_cast %141 : vector<1x8x128xbf16> to vector<8x128xbf16>
      %c0_73 = arith.constant 0 : index
      %c0_74 = arith.constant 0 : index
      %143 = vector.load %arg11[%c0_73, %c0_74] : memref<8x128xf32, #tpu.memory_space<vmem>>, vector<8x128xf32>
      %144 = arith.truncf %143 : vector<8x128xf32> to vector<8x128xbf16>
      %cst_75 = arith.constant dense<0.000000e+00> : vector<8x512xf32>
      %145 = tpu.matmul %142, %17, %cst_75 {dimension_numbers = #tpu.dot_dimension_numbers<[1], [0], [0], [1], [0, 0, 1, 1], [], []>} : vector<8x128xbf16>, vector<128x512xbf16>, vector<8x512xf32> -> vector<8x512xf32>
      %cst_76 = arith.constant dense<0.000000e+00> : vector<8x512xf32>
      %146 = tpu.matmul %144, %18, %cst_76 {dimension_numbers = #tpu.dot_dimension_numbers<[1], [0], [0], [1], [0, 0, 1, 1], [], []>} : vector<8x128xbf16>, vector<128x512xbf16>, vector<8x512xf32> -> vector<8x512xf32>
      %147 = arith.addf %145, %146 : vector<8x512xf32>
      %148 = vector.broadcast %16 : vector<1x512xf32> to vector<8x512xf32>
      %149 = arith.addf %147, %148 : vector<8x512xf32>
      %150 = vector.extract_strided_slice %149 {offsets = [0, 0], sizes = [8, 128], strides = [1, 1]} : vector<8x512xf32> to vector<8x128xf32>
      %cst_77 = arith.constant 5.000000e-01 : f32
      %151 = vector.broadcast %cst_77 : f32 to vector<8x128xf32>
      %152 = arith.mulf %151, %150 : vector<8x128xf32>
      %153 = math.tanh %152 : vector<8x128xf32>
      %cst_78 = arith.constant 5.000000e-01 : f32
      %154 = vector.broadcast %cst_78 : f32 to vector<8x128xf32>
      %155 = arith.mulf %154, %153 : vector<8x128xf32>
      %cst_79 = arith.constant 5.000000e-01 : f32
      %156 = vector.broadcast %cst_79 : f32 to vector<8x128xf32>
      %157 = arith.addf %155, %156 : vector<8x128xf32>
      %158 = vector.extract_strided_slice %149 {offsets = [0, 128], sizes = [8, 128], strides = [1, 1]} : vector<8x512xf32> to vector<8x128xf32>
      %cst_80 = arith.constant 5.000000e-01 : f32
      %159 = vector.broadcast %cst_80 : f32 to vector<8x128xf32>
      %160 = arith.mulf %159, %158 : vector<8x128xf32>
      %161 = math.tanh %160 : vector<8x128xf32>
      %cst_81 = arith.constant 5.000000e-01 : f32
      %162 = vector.broadcast %cst_81 : f32 to vector<8x128xf32>
      %163 = arith.mulf %162, %161 : vector<8x128xf32>
      %cst_82 = arith.constant 5.000000e-01 : f32
      %164 = vector.broadcast %cst_82 : f32 to vector<8x128xf32>
      %165 = arith.addf %163, %164 : vector<8x128xf32>
      %166 = vector.extract_strided_slice %149 {offsets = [0, 256], sizes = [8, 128], strides = [1, 1]} : vector<8x512xf32> to vector<8x128xf32>
      %167 = math.tanh %166 : vector<8x128xf32>
      %168 = vector.extract_strided_slice %149 {offsets = [0, 384], sizes = [8, 128], strides = [1, 1]} : vector<8x512xf32> to vector<8x128xf32>
      %cst_83 = arith.constant 5.000000e-01 : f32
      %169 = vector.broadcast %cst_83 : f32 to vector<8x128xf32>
      %170 = arith.mulf %169, %168 : vector<8x128xf32>
      %171 = math.tanh %170 : vector<8x128xf32>
      %cst_84 = arith.constant 5.000000e-01 : f32
      %172 = vector.broadcast %cst_84 : f32 to vector<8x128xf32>
      %173 = arith.mulf %172, %171 : vector<8x128xf32>
      %cst_85 = arith.constant 5.000000e-01 : f32
      %174 = vector.broadcast %cst_85 : f32 to vector<8x128xf32>
      %175 = arith.addf %173, %174 : vector<8x128xf32>
      %c0_86 = arith.constant 0 : index
      %c0_87 = arith.constant 0 : index
      %176 = vector.load %arg12[%c0_86, %c0_87] : memref<8x128xf32, #tpu.memory_space<vmem>>, vector<8x128xf32>
      %177 = arith.mulf %165, %176 : vector<8x128xf32>
      %178 = arith.mulf %157, %167 : vector<8x128xf32>
      %179 = arith.addf %177, %178 : vector<8x128xf32>
      %180 = math.tanh %179 : vector<8x128xf32>
      %181 = arith.mulf %175, %180 : vector<8x128xf32>
      %182 = vector.broadcast %140 : i32 to vector<8x1xi32>
      %183 = arith.cmpi slt, %182, %15 : vector<8x1xi32>
      %c0_88 = arith.constant 0 : index
      %c0_89 = arith.constant 0 : index
      %184 = vector.load %arg11[%c0_88, %c0_89] : memref<8x128xf32, #tpu.memory_space<vmem>>, vector<8x128xf32>
      %185 = vector.shape_cast %183 : vector<8x1xi1> to vector<8x1xi1>
      %186 = vector.broadcast %185 : vector<8x1xi1> to vector<8x128xi1>
      %187 = arith.select %186, %181, %184 : vector<8x128xi1>, vector<8x128xf32>
      %c0_90 = arith.constant 0 : index
      %c0_91 = arith.constant 0 : index
      %188 = vector.load %arg11[%c0_90, %c0_91] : memref<8x128xf32, #tpu.memory_space<vmem>>, vector<8x128xf32>
      tpu.vector_store %arg11[%c0_90, %c0_91], %187 {strides = array<i32>} : memref<8x128xf32, #tpu.memory_space<vmem>>, vector<8x128xf32>,
      %c0_92 = arith.constant 0 : index
      %c0_93 = arith.constant 0 : index
      %189 = vector.load %arg12[%c0_92, %c0_93] : memref<8x128xf32, #tpu.memory_space<vmem>>, vector<8x128xf32>
      %190 = vector.shape_cast %183 : vector<8x1xi1> to vector<8x1xi1>
      %191 = vector.broadcast %190 : vector<8x1xi1> to vector<8x128xi1>
      %192 = arith.select %191, %179, %189 : vector<8x128xi1>, vector<8x128xf32>
      %c0_94 = arith.constant 0 : index
      %c0_95 = arith.constant 0 : index
      %193 = vector.load %arg12[%c0_94, %c0_95] : memref<8x128xf32, #tpu.memory_space<vmem>>, vector<8x128xf32>
      tpu.vector_store %arg12[%c0_94, %c0_95], %192 {strides = array<i32>} : memref<8x128xf32, #tpu.memory_space<vmem>>, vector<8x128xf32>,
      %cst_96 = arith.constant 0.000000e+00 : f32
      %194 = vector.shape_cast %183 : vector<8x1xi1> to vector<8x1xi1>
      %195 = vector.broadcast %194 : vector<8x1xi1> to vector<8x128xi1>
      %196 = vector.broadcast %cst_96 : f32 to vector<8x128xf32>
      %197 = arith.select %195, %181, %196 : vector<8x128xi1>, vector<8x128xf32>
      %c0_97 = arith.constant 0 : index
      %c256 = arith.constant 256 : index
      %198 = vector.load %arg8[%c0_97, %c256] : memref<8x1664xf32, #tpu.memory_space<vmem>>, vector<8x128xf32>
      tpu.vector_store %arg8[%c0_97, %c256], %197 {strides = array<i32>} : memref<8x1664xf32, #tpu.memory_space<vmem>>, vector<8x128xf32>,
      %c13_i32_98 = arith.constant 13 : i32
      %199 = arith.muli %arg1, %c13_i32_98 : i32
      %c3_i32 = arith.constant 3 : i32
      %200 = arith.addi %199, %c3_i32 : i32
      %c3 = arith.constant 3 : index
      %c0_99 = arith.constant 0 : index
      %c0_100 = arith.constant 0 : index
      %201 = vector.load %arg3[%c3, %c0_99, %c0_100] : memref<13x8x128xbf16, #tpu.memory_space<vmem>>, vector<1x8x128xbf16>
      %202 = vector.shape_cast %201 : vector<1x8x128xbf16> to vector<8x128xbf16>
      %c0_101 = arith.constant 0 : index
      %c0_102 = arith.constant 0 : index
      %203 = vector.load %arg11[%c0_101, %c0_102] : memref<8x128xf32, #tpu.memory_space<vmem>>, vector<8x128xf32>
      %204 = arith.truncf %203 : vector<8x128xf32> to vector<8x128xbf16>
      %cst_103 = arith.constant dense<0.000000e+00> : vector<8x512xf32>
      %205 = tpu.matmul %202, %17, %cst_103 {dimension_numbers = #tpu.dot_dimension_numbers<[1], [0], [0], [1], [0, 0, 1, 1], [], []>} : vector<8x128xbf16>, vector<128x512xbf16>, vector<8x512xf32> -> vector<8x512xf32>
      %cst_104 = arith.constant dense<0.000000e+00> : vector<8x512xf32>
      %206 = tpu.matmul %204, %18, %cst_104 {dimension_numbers = #tpu.dot_dimension_numbers<[1], [0], [0], [1], [0, 0, 1, 1], [], []>} : vector<8x128xbf16>, vector<128x512xbf16>, vector<8x512xf32> -> vector<8x512xf32>
      %207 = arith.addf %205, %206 : vector<8x512xf32>
      %208 = vector.broadcast %16 : vector<1x512xf32> to vector<8x512xf32>
      %209 = arith.addf %207, %208 : vector<8x512xf32>
      %210 = vector.extract_strided_slice %209 {offsets = [0, 0], sizes = [8, 128], strides = [1, 1]} : vector<8x512xf32> to vector<8x128xf32>
      %cst_105 = arith.constant 5.000000e-01 : f32
      %211 = vector.broadcast %cst_105 : f32 to vector<8x128xf32>
      %212 = arith.mulf %211, %210 : vector<8x128xf32>
      %213 = math.tanh %212 : vector<8x128xf32>
      %cst_106 = arith.constant 5.000000e-01 : f32
      %214 = vector.broadcast %cst_106 : f32 to vector<8x128xf32>
      %215 = arith.mulf %214, %213 : vector<8x128xf32>
      %cst_107 = arith.constant 5.000000e-01 : f32
      %216 = vector.broadcast %cst_107 : f32 to vector<8x128xf32>
      %217 = arith.addf %215, %216 : vector<8x128xf32>
      %218 = vector.extract_strided_slice %209 {offsets = [0, 128], sizes = [8, 128], strides = [1, 1]} : vector<8x512xf32> to vector<8x128xf32>
      %cst_108 = arith.constant 5.000000e-01 : f32
      %219 = vector.broadcast %cst_108 : f32 to vector<8x128xf32>
      %220 = arith.mulf %219, %218 : vector<8x128xf32>
      %221 = math.tanh %220 : vector<8x128xf32>
      %cst_109 = arith.constant 5.000000e-01 : f32
      %222 = vector.broadcast %cst_109 : f32 to vector<8x128xf32>
      %223 = arith.mulf %222, %221 : vector<8x128xf32>
      %cst_110 = arith.constant 5.000000e-01 : f32
      %224 = vector.broadcast %cst_110 : f32 to vector<8x128xf32>
      %225 = arith.addf %223, %224 : vector<8x128xf32>
      %226 = vector.extract_strided_slice %209 {offsets = [0, 256], sizes = [8, 128], strides = [1, 1]} : vector<8x512xf32> to vector<8x128xf32>
      %227 = math.tanh %226 : vector<8x128xf32>
      %228 = vector.extract_strided_slice %209 {offsets = [0, 384], sizes = [8, 128], strides = [1, 1]} : vector<8x512xf32> to vector<8x128xf32>
      %cst_111 = arith.constant 5.000000e-01 : f32
      %229 = vector.broadcast %cst_111 : f32 to vector<8x128xf32>
      %230 = arith.mulf %229, %228 : vector<8x128xf32>
      %231 = math.tanh %230 : vector<8x128xf32>
      %cst_112 = arith.constant 5.000000e-01 : f32
      %232 = vector.broadcast %cst_112 : f32 to vector<8x128xf32>
      %233 = arith.mulf %232, %231 : vector<8x128xf32>
      %cst_113 = arith.constant 5.000000e-01 : f32
      %234 = vector.broadcast %cst_113 : f32 to vector<8x128xf32>
      %235 = arith.addf %233, %234 : vector<8x128xf32>
      %c0_114 = arith.constant 0 : index
      %c0_115 = arith.constant 0 : index
      %236 = vector.load %arg12[%c0_114, %c0_115] : memref<8x128xf32, #tpu.memory_space<vmem>>, vector<8x128xf32>
      %237 = arith.mulf %225, %236 : vector<8x128xf32>
      %238 = arith.mulf %217, %227 : vector<8x128xf32>
      %239 = arith.addf %237, %238 : vector<8x128xf32>
      %240 = math.tanh %239 : vector<8x128xf32>
      %241 = arith.mulf %235, %240 : vector<8x128xf32>
      %242 = vector.broadcast %200 : i32 to vector<8x1xi32>
      %243 = arith.cmpi slt, %242, %15 : vector<8x1xi32>
      %c0_116 = arith.constant 0 : index
      %c0_117 = arith.constant 0 : index
      %244 = vector.load %arg11[%c0_116, %c0_117] : memref<8x128xf32, #tpu.memory_space<vmem>>, vector<8x128xf32>
      %245 = vector.shape_cast %243 : vector<8x1xi1> to vector<8x1xi1>
      %246 = vector.broadcast %245 : vector<8x1xi1> to vector<8x128xi1>
      %247 = arith.select %246, %241, %244 : vector<8x128xi1>, vector<8x128xf32>
      %c0_118 = arith.constant 0 : index
      %c0_119 = arith.constant 0 : index
      %248 = vector.load %arg11[%c0_118, %c0_119] : memref<8x128xf32, #tpu.memory_space<vmem>>, vector<8x128xf32>
      tpu.vector_store %arg11[%c0_118, %c0_119], %247 {strides = array<i32>} : memref<8x128xf32, #tpu.memory_space<vmem>>, vector<8x128xf32>,
      %c0_120 = arith.constant 0 : index
      %c0_121 = arith.constant 0 : index
      %249 = vector.load %arg12[%c0_120, %c0_121] : memref<8x128xf32, #tpu.memory_space<vmem>>, vector<8x128xf32>
      %250 = vector.shape_cast %243 : vector<8x1xi1> to vector<8x1xi1>
      %251 = vector.broadcast %250 : vector<8x1xi1> to vector<8x128xi1>
      %252 = arith.select %251, %239, %249 : vector<8x128xi1>, vector<8x128xf32>
      %c0_122 = arith.constant 0 : index
      %c0_123 = arith.constant 0 : index
      %253 = vector.load %arg12[%c0_122, %c0_123] : memref<8x128xf32, #tpu.memory_space<vmem>>, vector<8x128xf32>
      tpu.vector_store %arg12[%c0_122, %c0_123], %252 {strides = array<i32>} : memref<8x128xf32, #tpu.memory_space<vmem>>, vector<8x128xf32>,
      %cst_124 = arith.constant 0.000000e+00 : f32
      %254 = vector.shape_cast %243 : vector<8x1xi1> to vector<8x1xi1>
      %255 = vector.broadcast %254 : vector<8x1xi1> to vector<8x128xi1>
      %256 = vector.broadcast %cst_124 : f32 to vector<8x128xf32>
      %257 = arith.select %255, %241, %256 : vector<8x128xi1>, vector<8x128xf32>
      %c0_125 = arith.constant 0 : index
      %c384 = arith.constant 384 : index
      %258 = vector.load %arg8[%c0_125, %c384] : memref<8x1664xf32, #tpu.memory_space<vmem>>, vector<8x128xf32>
      tpu.vector_store %arg8[%c0_125, %c384], %257 {strides = array<i32>} : memref<8x1664xf32, #tpu.memory_space<vmem>>, vector<8x128xf32>,
      %c13_i32_126 = arith.constant 13 : i32
      %259 = arith.muli %arg1, %c13_i32_126 : i32
      %c4_i32 = arith.constant 4 : i32
      %260 = arith.addi %259, %c4_i32 : i32
      %c4 = arith.constant 4 : index
      %c0_127 = arith.constant 0 : index
      %c0_128 = arith.constant 0 : index
      %261 = vector.load %arg3[%c4, %c0_127, %c0_128] : memref<13x8x128xbf16, #tpu.memory_space<vmem>>, vector<1x8x128xbf16>
      %262 = vector.shape_cast %261 : vector<1x8x128xbf16> to vector<8x128xbf16>
      %c0_129 = arith.constant 0 : index
      %c0_130 = arith.constant 0 : index
      %263 = vector.load %arg11[%c0_129, %c0_130] : memref<8x128xf32, #tpu.memory_space<vmem>>, vector<8x128xf32>
      %264 = arith.truncf %263 : vector<8x128xf32> to vector<8x128xbf16>
      %cst_131 = arith.constant dense<0.000000e+00> : vector<8x512xf32>
      %265 = tpu.matmul %262, %17, %cst_131 {dimension_numbers = #tpu.dot_dimension_numbers<[1], [0], [0], [1], [0, 0, 1, 1], [], []>} : vector<8x128xbf16>, vector<128x512xbf16>, vector<8x512xf32> -> vector<8x512xf32>
      %cst_132 = arith.constant dense<0.000000e+00> : vector<8x512xf32>
      %266 = tpu.matmul %264, %18, %cst_132 {dimension_numbers = #tpu.dot_dimension_numbers<[1], [0], [0], [1], [0, 0, 1, 1], [], []>} : vector<8x128xbf16>, vector<128x512xbf16>, vector<8x512xf32> -> vector<8x512xf32>
      %267 = arith.addf %265, %266 : vector<8x512xf32>
      %268 = vector.broadcast %16 : vector<1x512xf32> to vector<8x512xf32>
      %269 = arith.addf %267, %268 : vector<8x512xf32>
      %270 = vector.extract_strided_slice %269 {offsets = [0, 0], sizes = [8, 128], strides = [1, 1]} : vector<8x512xf32> to vector<8x128xf32>
      %cst_133 = arith.constant 5.000000e-01 : f32
      %271 = vector.broadcast %cst_133 : f32 to vector<8x128xf32>
      %272 = arith.mulf %271, %270 : vector<8x128xf32>
      %273 = math.tanh %272 : vector<8x128xf32>
      %cst_134 = arith.constant 5.000000e-01 : f32
      %274 = vector.broadcast %cst_134 : f32 to vector<8x128xf32>
      %275 = arith.mulf %274, %273 : vector<8x128xf32>
      %cst_135 = arith.constant 5.000000e-01 : f32
      %276 = vector.broadcast %cst_135 : f32 to vector<8x128xf32>
      %277 = arith.addf %275, %276 : vector<8x128xf32>
      %278 = vector.extract_strided_slice %269 {offsets = [0, 128], sizes = [8, 128], strides = [1, 1]} : vector<8x512xf32> to vector<8x128xf32>
      %cst_136 = arith.constant 5.000000e-01 : f32
      %279 = vector.broadcast %cst_136 : f32 to vector<8x128xf32>
      %280 = arith.mulf %279, %278 : vector<8x128xf32>
      %281 = math.tanh %280 : vector<8x128xf32>
      %cst_137 = arith.constant 5.000000e-01 : f32
      %282 = vector.broadcast %cst_137 : f32 to vector<8x128xf32>
      %283 = arith.mulf %282, %281 : vector<8x128xf32>
      %cst_138 = arith.constant 5.000000e-01 : f32
      %284 = vector.broadcast %cst_138 : f32 to vector<8x128xf32>
      %285 = arith.addf %283, %284 : vector<8x128xf32>
      %286 = vector.extract_strided_slice %269 {offsets = [0, 256], sizes = [8, 128], strides = [1, 1]} : vector<8x512xf32> to vector<8x128xf32>
      %287 = math.tanh %286 : vector<8x128xf32>
      %288 = vector.extract_strided_slice %269 {offsets = [0, 384], sizes = [8, 128], strides = [1, 1]} : vector<8x512xf32> to vector<8x128xf32>
      %cst_139 = arith.constant 5.000000e-01 : f32
      %289 = vector.broadcast %cst_139 : f32 to vector<8x128xf32>
      %290 = arith.mulf %289, %288 : vector<8x128xf32>
      %291 = math.tanh %290 : vector<8x128xf32>
      %cst_140 = arith.constant 5.000000e-01 : f32
      %292 = vector.broadcast %cst_140 : f32 to vector<8x128xf32>
      %293 = arith.mulf %292, %291 : vector<8x128xf32>
      %cst_141 = arith.constant 5.000000e-01 : f32
      %294 = vector.broadcast %cst_141 : f32 to vector<8x128xf32>
      %295 = arith.addf %293, %294 : vector<8x128xf32>
      %c0_142 = arith.constant 0 : index
      %c0_143 = arith.constant 0 : index
      %296 = vector.load %arg12[%c0_142, %c0_143] : memref<8x128xf32, #tpu.memory_space<vmem>>, vector<8x128xf32>
      %297 = arith.mulf %285, %296 : vector<8x128xf32>
      %298 = arith.mulf %277, %287 : vector<8x128xf32>
      %299 = arith.addf %297, %298 : vector<8x128xf32>
      %300 = math.tanh %299 : vector<8x128xf32>
      %301 = arith.mulf %295, %300 : vector<8x128xf32>
      %302 = vector.broadcast %260 : i32 to vector<8x1xi32>
      %303 = arith.cmpi slt, %302, %15 : vector<8x1xi32>
      %c0_144 = arith.constant 0 : index
      %c0_145 = arith.constant 0 : index
      %304 = vector.load %arg11[%c0_144, %c0_145] : memref<8x128xf32, #tpu.memory_space<vmem>>, vector<8x128xf32>
      %305 = vector.shape_cast %303 : vector<8x1xi1> to vector<8x1xi1>
      %306 = vector.broadcast %305 : vector<8x1xi1> to vector<8x128xi1>
      %307 = arith.select %306, %301, %304 : vector<8x128xi1>, vector<8x128xf32>
      %c0_146 = arith.constant 0 : index
      %c0_147 = arith.constant 0 : index
      %308 = vector.load %arg11[%c0_146, %c0_147] : memref<8x128xf32, #tpu.memory_space<vmem>>, vector<8x128xf32>
      tpu.vector_store %arg11[%c0_146, %c0_147], %307 {strides = array<i32>} : memref<8x128xf32, #tpu.memory_space<vmem>>, vector<8x128xf32>,
      %c0_148 = arith.constant 0 : index
      %c0_149 = arith.constant 0 : index
      %309 = vector.load %arg12[%c0_148, %c0_149] : memref<8x128xf32, #tpu.memory_space<vmem>>, vector<8x128xf32>
      %310 = vector.shape_cast %303 : vector<8x1xi1> to vector<8x1xi1>
      %311 = vector.broadcast %310 : vector<8x1xi1> to vector<8x128xi1>
      %312 = arith.select %311, %299, %309 : vector<8x128xi1>, vector<8x128xf32>
      %c0_150 = arith.constant 0 : index
      %c0_151 = arith.constant 0 : index
      %313 = vector.load %arg12[%c0_150, %c0_151] : memref<8x128xf32, #tpu.memory_space<vmem>>, vector<8x128xf32>
      tpu.vector_store %arg12[%c0_150, %c0_151], %312 {strides = array<i32>} : memref<8x128xf32, #tpu.memory_space<vmem>>, vector<8x128xf32>,
      %cst_152 = arith.constant 0.000000e+00 : f32
      %314 = vector.shape_cast %303 : vector<8x1xi1> to vector<8x1xi1>
      %315 = vector.broadcast %314 : vector<8x1xi1> to vector<8x128xi1>
      %316 = vector.broadcast %cst_152 : f32 to vector<8x128xf32>
      %317 = arith.select %315, %301, %316 : vector<8x128xi1>, vector<8x128xf32>
      %c0_153 = arith.constant 0 : index
      %c512 = arith.constant 512 : index
      %318 = vector.load %arg8[%c0_153, %c512] : memref<8x1664xf32, #tpu.memory_space<vmem>>, vector<8x128xf32>
      tpu.vector_store %arg8[%c0_153, %c512], %317 {strides = array<i32>} : memref<8x1664xf32, #tpu.memory_space<vmem>>, vector<8x128xf32>,
      %c13_i32_154 = arith.constant 13 : i32
      %319 = arith.muli %arg1, %c13_i32_154 : i32
      %c5_i32 = arith.constant 5 : i32
      %320 = arith.addi %319, %c5_i32 : i32
      %c5 = arith.constant 5 : index
      %c0_155 = arith.constant 0 : index
      %c0_156 = arith.constant 0 : index
      %321 = vector.load %arg3[%c5, %c0_155, %c0_156] : memref<13x8x128xbf16, #tpu.memory_space<vmem>>, vector<1x8x128xbf16>
      %322 = vector.shape_cast %321 : vector<1x8x128xbf16> to vector<8x128xbf16>
      %c0_157 = arith.constant 0 : index
      %c0_158 = arith.constant 0 : index
      %323 = vector.load %arg11[%c0_157, %c0_158] : memref<8x128xf32, #tpu.memory_space<vmem>>, vector<8x128xf32>
      %324 = arith.truncf %323 : vector<8x128xf32> to vector<8x128xbf16>
      %cst_159 = arith.constant dense<0.000000e+00> : vector<8x512xf32>
      %325 = tpu.matmul %322, %17, %cst_159 {dimension_numbers = #tpu.dot_dimension_numbers<[1], [0], [0], [1], [0, 0, 1, 1], [], []>} : vector<8x128xbf16>, vector<128x512xbf16>, vector<8x512xf32> -> vector<8x512xf32>
      %cst_160 = arith.constant dense<0.000000e+00> : vector<8x512xf32>
      %326 = tpu.matmul %324, %18, %cst_160 {dimension_numbers = #tpu.dot_dimension_numbers<[1], [0], [0], [1], [0, 0, 1, 1], [], []>} : vector<8x128xbf16>, vector<128x512xbf16>, vector<8x512xf32> -> vector<8x512xf32>
      %327 = arith.addf %325, %326 : vector<8x512xf32>
      %328 = vector.broadcast %16 : vector<1x512xf32> to vector<8x512xf32>
      %329 = arith.addf %327, %328 : vector<8x512xf32>
      %330 = vector.extract_strided_slice %329 {offsets = [0, 0], sizes = [8, 128], strides = [1, 1]} : vector<8x512xf32> to vector<8x128xf32>
      %cst_161 = arith.constant 5.000000e-01 : f32
      %331 = vector.broadcast %cst_161 : f32 to vector<8x128xf32>
      %332 = arith.mulf %331, %330 : vector<8x128xf32>
      %333 = math.tanh %332 : vector<8x128xf32>
      %cst_162 = arith.constant 5.000000e-01 : f32
      %334 = vector.broadcast %cst_162 : f32 to vector<8x128xf32>
      %335 = arith.mulf %334, %333 : vector<8x128xf32>
      %cst_163 = arith.constant 5.000000e-01 : f32
      %336 = vector.broadcast %cst_163 : f32 to vector<8x128xf32>
      %337 = arith.addf %335, %336 : vector<8x128xf32>
      %338 = vector.extract_strided_slice %329 {offsets = [0, 128], sizes = [8, 128], strides = [1, 1]} : vector<8x512xf32> to vector<8x128xf32>
      %cst_164 = arith.constant 5.000000e-01 : f32
      %339 = vector.broadcast %cst_164 : f32 to vector<8x128xf32>
      %340 = arith.mulf %339, %338 : vector<8x128xf32>
      %341 = math.tanh %340 : vector<8x128xf32>
      %cst_165 = arith.constant 5.000000e-01 : f32
      %342 = vector.broadcast %cst_165 : f32 to vector<8x128xf32>
      %343 = arith.mulf %342, %341 : vector<8x128xf32>
      %cst_166 = arith.constant 5.000000e-01 : f32
      %344 = vector.broadcast %cst_166 : f32 to vector<8x128xf32>
      %345 = arith.addf %343, %344 : vector<8x128xf32>
      %346 = vector.extract_strided_slice %329 {offsets = [0, 256], sizes = [8, 128], strides = [1, 1]} : vector<8x512xf32> to vector<8x128xf32>
      %347 = math.tanh %346 : vector<8x128xf32>
      %348 = vector.extract_strided_slice %329 {offsets = [0, 384], sizes = [8, 128], strides = [1, 1]} : vector<8x512xf32> to vector<8x128xf32>
      %cst_167 = arith.constant 5.000000e-01 : f32
      %349 = vector.broadcast %cst_167 : f32 to vector<8x128xf32>
      %350 = arith.mulf %349, %348 : vector<8x128xf32>
      %351 = math.tanh %350 : vector<8x128xf32>
      %cst_168 = arith.constant 5.000000e-01 : f32
      %352 = vector.broadcast %cst_168 : f32 to vector<8x128xf32>
      %353 = arith.mulf %352, %351 : vector<8x128xf32>
      %cst_169 = arith.constant 5.000000e-01 : f32
      %354 = vector.broadcast %cst_169 : f32 to vector<8x128xf32>
      %355 = arith.addf %353, %354 : vector<8x128xf32>
      %c0_170 = arith.constant 0 : index
      %c0_171 = arith.constant 0 : index
      %356 = vector.load %arg12[%c0_170, %c0_171] : memref<8x128xf32, #tpu.memory_space<vmem>>, vector<8x128xf32>
      %357 = arith.mulf %345, %356 : vector<8x128xf32>
      %358 = arith.mulf %337, %347 : vector<8x128xf32>
      %359 = arith.addf %357, %358 : vector<8x128xf32>
      %360 = math.tanh %359 : vector<8x128xf32>
      %361 = arith.mulf %355, %360 : vector<8x128xf32>
      %362 = vector.broadcast %320 : i32 to vector<8x1xi32>
      %363 = arith.cmpi slt, %362, %15 : vector<8x1xi32>
      %c0_172 = arith.constant 0 : index
      %c0_173 = arith.constant 0 : index
      %364 = vector.load %arg11[%c0_172, %c0_173] : memref<8x128xf32, #tpu.memory_space<vmem>>, vector<8x128xf32>
      %365 = vector.shape_cast %363 : vector<8x1xi1> to vector<8x1xi1>
      %366 = vector.broadcast %365 : vector<8x1xi1> to vector<8x128xi1>
      %367 = arith.select %366, %361, %364 : vector<8x128xi1>, vector<8x128xf32>
      %c0_174 = arith.constant 0 : index
      %c0_175 = arith.constant 0 : index
      %368 = vector.load %arg11[%c0_174, %c0_175] : memref<8x128xf32, #tpu.memory_space<vmem>>, vector<8x128xf32>
      tpu.vector_store %arg11[%c0_174, %c0_175], %367 {strides = array<i32>} : memref<8x128xf32, #tpu.memory_space<vmem>>, vector<8x128xf32>,
      %c0_176 = arith.constant 0 : index
      %c0_177 = arith.constant 0 : index
      %369 = vector.load %arg12[%c0_176, %c0_177] : memref<8x128xf32, #tpu.memory_space<vmem>>, vector<8x128xf32>
      %370 = vector.shape_cast %363 : vector<8x1xi1> to vector<8x1xi1>
      %371 = vector.broadcast %370 : vector<8x1xi1> to vector<8x128xi1>
      %372 = arith.select %371, %359, %369 : vector<8x128xi1>, vector<8x128xf32>
      %c0_178 = arith.constant 0 : index
      %c0_179 = arith.constant 0 : index
      %373 = vector.load %arg12[%c0_178, %c0_179] : memref<8x128xf32, #tpu.memory_space<vmem>>, vector<8x128xf32>
      tpu.vector_store %arg12[%c0_178, %c0_179], %372 {strides = array<i32>} : memref<8x128xf32, #tpu.memory_space<vmem>>, vector<8x128xf32>,
      %cst_180 = arith.constant 0.000000e+00 : f32
      %374 = vector.shape_cast %363 : vector<8x1xi1> to vector<8x1xi1>
      %375 = vector.broadcast %374 : vector<8x1xi1> to vector<8x128xi1>
      %376 = vector.broadcast %cst_180 : f32 to vector<8x128xf32>
      %377 = arith.select %375, %361, %376 : vector<8x128xi1>, vector<8x128xf32>
      %c0_181 = arith.constant 0 : index
      %c640 = arith.constant 640 : index
      %378 = vector.load %arg8[%c0_181, %c640] : memref<8x1664xf32, #tpu.memory_space<vmem>>, vector<8x128xf32>
      tpu.vector_store %arg8[%c0_181, %c640], %377 {strides = array<i32>} : memref<8x1664xf32, #tpu.memory_space<vmem>>, vector<8x128xf32>,
      %c13_i32_182 = arith.constant 13 : i32
      %379 = arith.muli %arg1, %c13_i32_182 : i32
      %c6_i32 = arith.constant 6 : i32
      %380 = arith.addi %379, %c6_i32 : i32
      %c6 = arith.constant 6 : index
      %c0_183 = arith.constant 0 : index
      %c0_184 = arith.constant 0 : index
      %381 = vector.load %arg3[%c6, %c0_183, %c0_184] : memref<13x8x128xbf16, #tpu.memory_space<vmem>>, vector<1x8x128xbf16>
      %382 = vector.shape_cast %381 : vector<1x8x128xbf16> to vector<8x128xbf16>
      %c0_185 = arith.constant 0 : index
      %c0_186 = arith.constant 0 : index
      %383 = vector.load %arg11[%c0_185, %c0_186] : memref<8x128xf32, #tpu.memory_space<vmem>>, vector<8x128xf32>
      %384 = arith.truncf %383 : vector<8x128xf32> to vector<8x128xbf16>
      %cst_187 = arith.constant dense<0.000000e+00> : vector<8x512xf32>
      %385 = tpu.matmul %382, %17, %cst_187 {dimension_numbers = #tpu.dot_dimension_numbers<[1], [0], [0], [1], [0, 0, 1, 1], [], []>} : vector<8x128xbf16>, vector<128x512xbf16>, vector<8x512xf32> -> vector<8x512xf32>
      %cst_188 = arith.constant dense<0.000000e+00> : vector<8x512xf32>
      %386 = tpu.matmul %384, %18, %cst_188 {dimension_numbers = #tpu.dot_dimension_numbers<[1], [0], [0], [1], [0, 0, 1, 1], [], []>} : vector<8x128xbf16>, vector<128x512xbf16>, vector<8x512xf32> -> vector<8x512xf32>
      %387 = arith.addf %385, %386 : vector<8x512xf32>
      %388 = vector.broadcast %16 : vector<1x512xf32> to vector<8x512xf32>
      %389 = arith.addf %387, %388 : vector<8x512xf32>
      %390 = vector.extract_strided_slice %389 {offsets = [0, 0], sizes = [8, 128], strides = [1, 1]} : vector<8x512xf32> to vector<8x128xf32>
      %cst_189 = arith.constant 5.000000e-01 : f32
      %391 = vector.broadcast %cst_189 : f32 to vector<8x128xf32>
      %392 = arith.mulf %391, %390 : vector<8x128xf32>
      %393 = math.tanh %392 : vector<8x128xf32>
      %cst_190 = arith.constant 5.000000e-01 : f32
      %394 = vector.broadcast %cst_190 : f32 to vector<8x128xf32>
      %395 = arith.mulf %394, %393 : vector<8x128xf32>
      %cst_191 = arith.constant 5.000000e-01 : f32
      %396 = vector.broadcast %cst_191 : f32 to vector<8x128xf32>
      %397 = arith.addf %395, %396 : vector<8x128xf32>
      %398 = vector.extract_strided_slice %389 {offsets = [0, 128], sizes = [8, 128], strides = [1, 1]} : vector<8x512xf32> to vector<8x128xf32>
      %cst_192 = arith.constant 5.000000e-01 : f32
      %399 = vector.broadcast %cst_192 : f32 to vector<8x128xf32>
      %400 = arith.mulf %399, %398 : vector<8x128xf32>
      %401 = math.tanh %400 : vector<8x128xf32>
      %cst_193 = arith.constant 5.000000e-01 : f32
      %402 = vector.broadcast %cst_193 : f32 to vector<8x128xf32>
      %403 = arith.mulf %402, %401 : vector<8x128xf32>
      %cst_194 = arith.constant 5.000000e-01 : f32
      %404 = vector.broadcast %cst_194 : f32 to vector<8x128xf32>
      %405 = arith.addf %403, %404 : vector<8x128xf32>
      %406 = vector.extract_strided_slice %389 {offsets = [0, 256], sizes = [8, 128], strides = [1, 1]} : vector<8x512xf32> to vector<8x128xf32>
      %407 = math.tanh %406 : vector<8x128xf32>
      %408 = vector.extract_strided_slice %389 {offsets = [0, 384], sizes = [8, 128], strides = [1, 1]} : vector<8x512xf32> to vector<8x128xf32>
      %cst_195 = arith.constant 5.000000e-01 : f32
      %409 = vector.broadcast %cst_195 : f32 to vector<8x128xf32>
      %410 = arith.mulf %409, %408 : vector<8x128xf32>
      %411 = math.tanh %410 : vector<8x128xf32>
      %cst_196 = arith.constant 5.000000e-01 : f32
      %412 = vector.broadcast %cst_196 : f32 to vector<8x128xf32>
      %413 = arith.mulf %412, %411 : vector<8x128xf32>
      %cst_197 = arith.constant 5.000000e-01 : f32
      %414 = vector.broadcast %cst_197 : f32 to vector<8x128xf32>
      %415 = arith.addf %413, %414 : vector<8x128xf32>
      %c0_198 = arith.constant 0 : index
      %c0_199 = arith.constant 0 : index
      %416 = vector.load %arg12[%c0_198, %c0_199] : memref<8x128xf32, #tpu.memory_space<vmem>>, vector<8x128xf32>
      %417 = arith.mulf %405, %416 : vector<8x128xf32>
      %418 = arith.mulf %397, %407 : vector<8x128xf32>
      %419 = arith.addf %417, %418 : vector<8x128xf32>
      %420 = math.tanh %419 : vector<8x128xf32>
      %421 = arith.mulf %415, %420 : vector<8x128xf32>
      %422 = vector.broadcast %380 : i32 to vector<8x1xi32>
      %423 = arith.cmpi slt, %422, %15 : vector<8x1xi32>
      %c0_200 = arith.constant 0 : index
      %c0_201 = arith.constant 0 : index
      %424 = vector.load %arg11[%c0_200, %c0_201] : memref<8x128xf32, #tpu.memory_space<vmem>>, vector<8x128xf32>
      %425 = vector.shape_cast %423 : vector<8x1xi1> to vector<8x1xi1>
      %426 = vector.broadcast %425 : vector<8x1xi1> to vector<8x128xi1>
      %427 = arith.select %426, %421, %424 : vector<8x128xi1>, vector<8x128xf32>
      %c0_202 = arith.constant 0 : index
      %c0_203 = arith.constant 0 : index
      %428 = vector.load %arg11[%c0_202, %c0_203] : memref<8x128xf32, #tpu.memory_space<vmem>>, vector<8x128xf32>
      tpu.vector_store %arg11[%c0_202, %c0_203], %427 {strides = array<i32>} : memref<8x128xf32, #tpu.memory_space<vmem>>, vector<8x128xf32>,
      %c0_204 = arith.constant 0 : index
      %c0_205 = arith.constant 0 : index
      %429 = vector.load %arg12[%c0_204, %c0_205] : memref<8x128xf32, #tpu.memory_space<vmem>>, vector<8x128xf32>
      %430 = vector.shape_cast %423 : vector<8x1xi1> to vector<8x1xi1>
      %431 = vector.broadcast %430 : vector<8x1xi1> to vector<8x128xi1>
      %432 = arith.select %431, %419, %429 : vector<8x128xi1>, vector<8x128xf32>
      %c0_206 = arith.constant 0 : index
      %c0_207 = arith.constant 0 : index
      %433 = vector.load %arg12[%c0_206, %c0_207] : memref<8x128xf32, #tpu.memory_space<vmem>>, vector<8x128xf32>
      tpu.vector_store %arg12[%c0_206, %c0_207], %432 {strides = array<i32>} : memref<8x128xf32, #tpu.memory_space<vmem>>, vector<8x128xf32>,
      %cst_208 = arith.constant 0.000000e+00 : f32
      %434 = vector.shape_cast %423 : vector<8x1xi1> to vector<8x1xi1>
      %435 = vector.broadcast %434 : vector<8x1xi1> to vector<8x128xi1>
      %436 = vector.broadcast %cst_208 : f32 to vector<8x128xf32>
      %437 = arith.select %435, %421, %436 : vector<8x128xi1>, vector<8x128xf32>
      %c0_209 = arith.constant 0 : index
      %c768 = arith.constant 768 : index
      %438 = vector.load %arg8[%c0_209, %c768] : memref<8x1664xf32, #tpu.memory_space<vmem>>, vector<8x128xf32>
      tpu.vector_store %arg8[%c0_209, %c768], %437 {strides = array<i32>} : memref<8x1664xf32, #tpu.memory_space<vmem>>, vector<8x128xf32>,
      %c13_i32_210 = arith.constant 13 : i32
      %439 = arith.muli %arg1, %c13_i32_210 : i32
      %c7_i32 = arith.constant 7 : i32
      %440 = arith.addi %439, %c7_i32 : i32
      %c7 = arith.constant 7 : index
      %c0_211 = arith.constant 0 : index
      %c0_212 = arith.constant 0 : index
      %441 = vector.load %arg3[%c7, %c0_211, %c0_212] : memref<13x8x128xbf16, #tpu.memory_space<vmem>>, vector<1x8x128xbf16>
      %442 = vector.shape_cast %441 : vector<1x8x128xbf16> to vector<8x128xbf16>
      %c0_213 = arith.constant 0 : index
      %c0_214 = arith.constant 0 : index
      %443 = vector.load %arg11[%c0_213, %c0_214] : memref<8x128xf32, #tpu.memory_space<vmem>>, vector<8x128xf32>
      %444 = arith.truncf %443 : vector<8x128xf32> to vector<8x128xbf16>
      %cst_215 = arith.constant dense<0.000000e+00> : vector<8x512xf32>
      %445 = tpu.matmul %442, %17, %cst_215 {dimension_numbers = #tpu.dot_dimension_numbers<[1], [0], [0], [1], [0, 0, 1, 1], [], []>} : vector<8x128xbf16>, vector<128x512xbf16>, vector<8x512xf32> -> vector<8x512xf32>
      %cst_216 = arith.constant dense<0.000000e+00> : vector<8x512xf32>
      %446 = tpu.matmul %444, %18, %cst_216 {dimension_numbers = #tpu.dot_dimension_numbers<[1], [0], [0], [1], [0, 0, 1, 1], [], []>} : vector<8x128xbf16>, vector<128x512xbf16>, vector<8x512xf32> -> vector<8x512xf32>
      %447 = arith.addf %445, %446 : vector<8x512xf32>
      %448 = vector.broadcast %16 : vector<1x512xf32> to vector<8x512xf32>
      %449 = arith.addf %447, %448 : vector<8x512xf32>
      %450 = vector.extract_strided_slice %449 {offsets = [0, 0], sizes = [8, 128], strides = [1, 1]} : vector<8x512xf32> to vector<8x128xf32>
      %cst_217 = arith.constant 5.000000e-01 : f32
      %451 = vector.broadcast %cst_217 : f32 to vector<8x128xf32>
      %452 = arith.mulf %451, %450 : vector<8x128xf32>
      %453 = math.tanh %452 : vector<8x128xf32>
      %cst_218 = arith.constant 5.000000e-01 : f32
      %454 = vector.broadcast %cst_218 : f32 to vector<8x128xf32>
      %455 = arith.mulf %454, %453 : vector<8x128xf32>
      %cst_219 = arith.constant 5.000000e-01 : f32
      %456 = vector.broadcast %cst_219 : f32 to vector<8x128xf32>
      %457 = arith.addf %455, %456 : vector<8x128xf32>
      %458 = vector.extract_strided_slice %449 {offsets = [0, 128], sizes = [8, 128], strides = [1, 1]} : vector<8x512xf32> to vector<8x128xf32>
      %cst_220 = arith.constant 5.000000e-01 : f32
      %459 = vector.broadcast %cst_220 : f32 to vector<8x128xf32>
      %460 = arith.mulf %459, %458 : vector<8x128xf32>
      %461 = math.tanh %460 : vector<8x128xf32>
      %cst_221 = arith.constant 5.000000e-01 : f32
      %462 = vector.broadcast %cst_221 : f32 to vector<8x128xf32>
      %463 = arith.mulf %462, %461 : vector<8x128xf32>
      %cst_222 = arith.constant 5.000000e-01 : f32
      %464 = vector.broadcast %cst_222 : f32 to vector<8x128xf32>
      %465 = arith.addf %463, %464 : vector<8x128xf32>
      %466 = vector.extract_strided_slice %449 {offsets = [0, 256], sizes = [8, 128], strides = [1, 1]} : vector<8x512xf32> to vector<8x128xf32>
      %467 = math.tanh %466 : vector<8x128xf32>
      %468 = vector.extract_strided_slice %449 {offsets = [0, 384], sizes = [8, 128], strides = [1, 1]} : vector<8x512xf32> to vector<8x128xf32>
      %cst_223 = arith.constant 5.000000e-01 : f32
      %469 = vector.broadcast %cst_223 : f32 to vector<8x128xf32>
      %470 = arith.mulf %469, %468 : vector<8x128xf32>
      %471 = math.tanh %470 : vector<8x128xf32>
      %cst_224 = arith.constant 5.000000e-01 : f32
      %472 = vector.broadcast %cst_224 : f32 to vector<8x128xf32>
      %473 = arith.mulf %472, %471 : vector<8x128xf32>
      %cst_225 = arith.constant 5.000000e-01 : f32
      %474 = vector.broadcast %cst_225 : f32 to vector<8x128xf32>
      %475 = arith.addf %473, %474 : vector<8x128xf32>
      %c0_226 = arith.constant 0 : index
      %c0_227 = arith.constant 0 : index
      %476 = vector.load %arg12[%c0_226, %c0_227] : memref<8x128xf32, #tpu.memory_space<vmem>>, vector<8x128xf32>
      %477 = arith.mulf %465, %476 : vector<8x128xf32>
      %478 = arith.mulf %457, %467 : vector<8x128xf32>
      %479 = arith.addf %477, %478 : vector<8x128xf32>
      %480 = math.tanh %479 : vector<8x128xf32>
      %481 = arith.mulf %475, %480 : vector<8x128xf32>
      %482 = vector.broadcast %440 : i32 to vector<8x1xi32>
      %483 = arith.cmpi slt, %482, %15 : vector<8x1xi32>
      %c0_228 = arith.constant 0 : index
      %c0_229 = arith.constant 0 : index
      %484 = vector.load %arg11[%c0_228, %c0_229] : memref<8x128xf32, #tpu.memory_space<vmem>>, vector<8x128xf32>
      %485 = vector.shape_cast %483 : vector<8x1xi1> to vector<8x1xi1>
      %486 = vector.broadcast %485 : vector<8x1xi1> to vector<8x128xi1>
      %487 = arith.select %486, %481, %484 : vector<8x128xi1>, vector<8x128xf32>
      %c0_230 = arith.constant 0 : index
      %c0_231 = arith.constant 0 : index
      %488 = vector.load %arg11[%c0_230, %c0_231] : memref<8x128xf32, #tpu.memory_space<vmem>>, vector<8x128xf32>
      tpu.vector_store %arg11[%c0_230, %c0_231], %487 {strides = array<i32>} : memref<8x128xf32, #tpu.memory_space<vmem>>, vector<8x128xf32>,
      %c0_232 = arith.constant 0 : index
      %c0_233 = arith.constant 0 : index
      %489 = vector.load %arg12[%c0_232, %c0_233] : memref<8x128xf32, #tpu.memory_space<vmem>>, vector<8x128xf32>
      %490 = vector.shape_cast %483 : vector<8x1xi1> to vector<8x1xi1>
      %491 = vector.broadcast %490 : vector<8x1xi1> to vector<8x128xi1>
      %492 = arith.select %491, %479, %489 : vector<8x128xi1>, vector<8x128xf32>
      %c0_234 = arith.constant 0 : index
      %c0_235 = arith.constant 0 : index
      %493 = vector.load %arg12[%c0_234, %c0_235] : memref<8x128xf32, #tpu.memory_space<vmem>>, vector<8x128xf32>
      tpu.vector_store %arg12[%c0_234, %c0_235], %492 {strides = array<i32>} : memref<8x128xf32, #tpu.memory_space<vmem>>, vector<8x128xf32>,
      %cst_236 = arith.constant 0.000000e+00 : f32
      %494 = vector.shape_cast %483 : vector<8x1xi1> to vector<8x1xi1>
      %495 = vector.broadcast %494 : vector<8x1xi1> to vector<8x128xi1>
      %496 = vector.broadcast %cst_236 : f32 to vector<8x128xf32>
      %497 = arith.select %495, %481, %496 : vector<8x128xi1>, vector<8x128xf32>
      %c0_237 = arith.constant 0 : index
      %c896 = arith.constant 896 : index
      %498 = vector.load %arg8[%c0_237, %c896] : memref<8x1664xf32, #tpu.memory_space<vmem>>, vector<8x128xf32>
      tpu.vector_store %arg8[%c0_237, %c896], %497 {strides = array<i32>} : memref<8x1664xf32, #tpu.memory_space<vmem>>, vector<8x128xf32>,
      %c13_i32_238 = arith.constant 13 : i32
      %499 = arith.muli %arg1, %c13_i32_238 : i32
      %c8_i32 = arith.constant 8 : i32
      %500 = arith.addi %499, %c8_i32 : i32
      %c8 = arith.constant 8 : index
      %c0_239 = arith.constant 0 : index
      %c0_240 = arith.constant 0 : index
      %501 = vector.load %arg3[%c8, %c0_239, %c0_240] : memref<13x8x128xbf16, #tpu.memory_space<vmem>>, vector<1x8x128xbf16>
      %502 = vector.shape_cast %501 : vector<1x8x128xbf16> to vector<8x128xbf16>
      %c0_241 = arith.constant 0 : index
      %c0_242 = arith.constant 0 : index
      %503 = vector.load %arg11[%c0_241, %c0_242] : memref<8x128xf32, #tpu.memory_space<vmem>>, vector<8x128xf32>
      %504 = arith.truncf %503 : vector<8x128xf32> to vector<8x128xbf16>
      %cst_243 = arith.constant dense<0.000000e+00> : vector<8x512xf32>
      %505 = tpu.matmul %502, %17, %cst_243 {dimension_numbers = #tpu.dot_dimension_numbers<[1], [0], [0], [1], [0, 0, 1, 1], [], []>} : vector<8x128xbf16>, vector<128x512xbf16>, vector<8x512xf32> -> vector<8x512xf32>
      %cst_244 = arith.constant dense<0.000000e+00> : vector<8x512xf32>
      %506 = tpu.matmul %504, %18, %cst_244 {dimension_numbers = #tpu.dot_dimension_numbers<[1], [0], [0], [1], [0, 0, 1, 1], [], []>} : vector<8x128xbf16>, vector<128x512xbf16>, vector<8x512xf32> -> vector<8x512xf32>
      %507 = arith.addf %505, %506 : vector<8x512xf32>
      %508 = vector.broadcast %16 : vector<1x512xf32> to vector<8x512xf32>
      %509 = arith.addf %507, %508 : vector<8x512xf32>
      %510 = vector.extract_strided_slice %509 {offsets = [0, 0], sizes = [8, 128], strides = [1, 1]} : vector<8x512xf32> to vector<8x128xf32>
      %cst_245 = arith.constant 5.000000e-01 : f32
      %511 = vector.broadcast %cst_245 : f32 to vector<8x128xf32>
      %512 = arith.mulf %511, %510 : vector<8x128xf32>
      %513 = math.tanh %512 : vector<8x128xf32>
      %cst_246 = arith.constant 5.000000e-01 : f32
      %514 = vector.broadcast %cst_246 : f32 to vector<8x128xf32>
      %515 = arith.mulf %514, %513 : vector<8x128xf32>
      %cst_247 = arith.constant 5.000000e-01 : f32
      %516 = vector.broadcast %cst_247 : f32 to vector<8x128xf32>
      %517 = arith.addf %515, %516 : vector<8x128xf32>
      %518 = vector.extract_strided_slice %509 {offsets = [0, 128], sizes = [8, 128], strides = [1, 1]} : vector<8x512xf32> to vector<8x128xf32>
      %cst_248 = arith.constant 5.000000e-01 : f32
      %519 = vector.broadcast %cst_248 : f32 to vector<8x128xf32>
      %520 = arith.mulf %519, %518 : vector<8x128xf32>
      %521 = math.tanh %520 : vector<8x128xf32>
      %cst_249 = arith.constant 5.000000e-01 : f32
      %522 = vector.broadcast %cst_249 : f32 to vector<8x128xf32>
      %523 = arith.mulf %522, %521 : vector<8x128xf32>
      %cst_250 = arith.constant 5.000000e-01 : f32
      %524 = vector.broadcast %cst_250 : f32 to vector<8x128xf32>
      %525 = arith.addf %523, %524 : vector<8x128xf32>
      %526 = vector.extract_strided_slice %509 {offsets = [0, 256], sizes = [8, 128], strides = [1, 1]} : vector<8x512xf32> to vector<8x128xf32>
      %527 = math.tanh %526 : vector<8x128xf32>
      %528 = vector.extract_strided_slice %509 {offsets = [0, 384], sizes = [8, 128], strides = [1, 1]} : vector<8x512xf32> to vector<8x128xf32>
      %cst_251 = arith.constant 5.000000e-01 : f32
      %529 = vector.broadcast %cst_251 : f32 to vector<8x128xf32>
      %530 = arith.mulf %529, %528 : vector<8x128xf32>
      %531 = math.tanh %530 : vector<8x128xf32>
      %cst_252 = arith.constant 5.000000e-01 : f32
      %532 = vector.broadcast %cst_252 : f32 to vector<8x128xf32>
      %533 = arith.mulf %532, %531 : vector<8x128xf32>
      %cst_253 = arith.constant 5.000000e-01 : f32
      %534 = vector.broadcast %cst_253 : f32 to vector<8x128xf32>
      %535 = arith.addf %533, %534 : vector<8x128xf32>
      %c0_254 = arith.constant 0 : index
      %c0_255 = arith.constant 0 : index
      %536 = vector.load %arg12[%c0_254, %c0_255] : memref<8x128xf32, #tpu.memory_space<vmem>>, vector<8x128xf32>
      %537 = arith.mulf %525, %536 : vector<8x128xf32>
      %538 = arith.mulf %517, %527 : vector<8x128xf32>
      %539 = arith.addf %537, %538 : vector<8x128xf32>
      %540 = math.tanh %539 : vector<8x128xf32>
      %541 = arith.mulf %535, %540 : vector<8x128xf32>
      %542 = vector.broadcast %500 : i32 to vector<8x1xi32>
      %543 = arith.cmpi slt, %542, %15 : vector<8x1xi32>
      %c0_256 = arith.constant 0 : index
      %c0_257 = arith.constant 0 : index
      %544 = vector.load %arg11[%c0_256, %c0_257] : memref<8x128xf32, #tpu.memory_space<vmem>>, vector<8x128xf32>
      %545 = vector.shape_cast %543 : vector<8x1xi1> to vector<8x1xi1>
      %546 = vector.broadcast %545 : vector<8x1xi1> to vector<8x128xi1>
      %547 = arith.select %546, %541, %544 : vector<8x128xi1>, vector<8x128xf32>
      %c0_258 = arith.constant 0 : index
      %c0_259 = arith.constant 0 : index
      %548 = vector.load %arg11[%c0_258, %c0_259] : memref<8x128xf32, #tpu.memory_space<vmem>>, vector<8x128xf32>
      tpu.vector_store %arg11[%c0_258, %c0_259], %547 {strides = array<i32>} : memref<8x128xf32, #tpu.memory_space<vmem>>, vector<8x128xf32>,
      %c0_260 = arith.constant 0 : index
      %c0_261 = arith.constant 0 : index
      %549 = vector.load %arg12[%c0_260, %c0_261] : memref<8x128xf32, #tpu.memory_space<vmem>>, vector<8x128xf32>
      %550 = vector.shape_cast %543 : vector<8x1xi1> to vector<8x1xi1>
      %551 = vector.broadcast %550 : vector<8x1xi1> to vector<8x128xi1>
      %552 = arith.select %551, %539, %549 : vector<8x128xi1>, vector<8x128xf32>
      %c0_262 = arith.constant 0 : index
      %c0_263 = arith.constant 0 : index
      %553 = vector.load %arg12[%c0_262, %c0_263] : memref<8x128xf32, #tpu.memory_space<vmem>>, vector<8x128xf32>
      tpu.vector_store %arg12[%c0_262, %c0_263], %552 {strides = array<i32>} : memref<8x128xf32, #tpu.memory_space<vmem>>, vector<8x128xf32>,
      %cst_264 = arith.constant 0.000000e+00 : f32
      %554 = vector.shape_cast %543 : vector<8x1xi1> to vector<8x1xi1>
      %555 = vector.broadcast %554 : vector<8x1xi1> to vector<8x128xi1>
      %556 = vector.broadcast %cst_264 : f32 to vector<8x128xf32>
      %557 = arith.select %555, %541, %556 : vector<8x128xi1>, vector<8x128xf32>
      %c0_265 = arith.constant 0 : index
      %c1024 = arith.constant 1024 : index
      %558 = vector.load %arg8[%c0_265, %c1024] : memref<8x1664xf32, #tpu.memory_space<vmem>>, vector<8x128xf32>
      tpu.vector_store %arg8[%c0_265, %c1024], %557 {strides = array<i32>} : memref<8x1664xf32, #tpu.memory_space<vmem>>, vector<8x128xf32>,
      %c13_i32_266 = arith.constant 13 : i32
      %559 = arith.muli %arg1, %c13_i32_266 : i32
      %c9_i32 = arith.constant 9 : i32
      %560 = arith.addi %559, %c9_i32 : i32
      %c9 = arith.constant 9 : index
      %c0_267 = arith.constant 0 : index
      %c0_268 = arith.constant 0 : index
      %561 = vector.load %arg3[%c9, %c0_267, %c0_268] : memref<13x8x128xbf16, #tpu.memory_space<vmem>>, vector<1x8x128xbf16>
      %562 = vector.shape_cast %561 : vector<1x8x128xbf16> to vector<8x128xbf16>
      %c0_269 = arith.constant 0 : index
      %c0_270 = arith.constant 0 : index
      %563 = vector.load %arg11[%c0_269, %c0_270] : memref<8x128xf32, #tpu.memory_space<vmem>>, vector<8x128xf32>
      %564 = arith.truncf %563 : vector<8x128xf32> to vector<8x128xbf16>
      %cst_271 = arith.constant dense<0.000000e+00> : vector<8x512xf32>
      %565 = tpu.matmul %562, %17, %cst_271 {dimension_numbers = #tpu.dot_dimension_numbers<[1], [0], [0], [1], [0, 0, 1, 1], [], []>} : vector<8x128xbf16>, vector<128x512xbf16>, vector<8x512xf32> -> vector<8x512xf32>
      %cst_272 = arith.constant dense<0.000000e+00> : vector<8x512xf32>
      %566 = tpu.matmul %564, %18, %cst_272 {dimension_numbers = #tpu.dot_dimension_numbers<[1], [0], [0], [1], [0, 0, 1, 1], [], []>} : vector<8x128xbf16>, vector<128x512xbf16>, vector<8x512xf32> -> vector<8x512xf32>
      %567 = arith.addf %565, %566 : vector<8x512xf32>
      %568 = vector.broadcast %16 : vector<1x512xf32> to vector<8x512xf32>
      %569 = arith.addf %567, %568 : vector<8x512xf32>
      %570 = vector.extract_strided_slice %569 {offsets = [0, 0], sizes = [8, 128], strides = [1, 1]} : vector<8x512xf32> to vector<8x128xf32>
      %cst_273 = arith.constant 5.000000e-01 : f32
      %571 = vector.broadcast %cst_273 : f32 to vector<8x128xf32>
      %572 = arith.mulf %571, %570 : vector<8x128xf32>
      %573 = math.tanh %572 : vector<8x128xf32>
      %cst_274 = arith.constant 5.000000e-01 : f32
      %574 = vector.broadcast %cst_274 : f32 to vector<8x128xf32>
      %575 = arith.mulf %574, %573 : vector<8x128xf32>
      %cst_275 = arith.constant 5.000000e-01 : f32
      %576 = vector.broadcast %cst_275 : f32 to vector<8x128xf32>
      %577 = arith.addf %575, %576 : vector<8x128xf32>
      %578 = vector.extract_strided_slice %569 {offsets = [0, 128], sizes = [8, 128], strides = [1, 1]} : vector<8x512xf32> to vector<8x128xf32>
      %cst_276 = arith.constant 5.000000e-01 : f32
      %579 = vector.broadcast %cst_276 : f32 to vector<8x128xf32>
      %580 = arith.mulf %579, %578 : vector<8x128xf32>
      %581 = math.tanh %580 : vector<8x128xf32>
      %cst_277 = arith.constant 5.000000e-01 : f32
      %582 = vector.broadcast %cst_277 : f32 to vector<8x128xf32>
      %583 = arith.mulf %582, %581 : vector<8x128xf32>
      %cst_278 = arith.constant 5.000000e-01 : f32
      %584 = vector.broadcast %cst_278 : f32 to vector<8x128xf32>
      %585 = arith.addf %583, %584 : vector<8x128xf32>
      %586 = vector.extract_strided_slice %569 {offsets = [0, 256], sizes = [8, 128], strides = [1, 1]} : vector<8x512xf32> to vector<8x128xf32>
      %587 = math.tanh %586 : vector<8x128xf32>
      %588 = vector.extract_strided_slice %569 {offsets = [0, 384], sizes = [8, 128], strides = [1, 1]} : vector<8x512xf32> to vector<8x128xf32>
      %cst_279 = arith.constant 5.000000e-01 : f32
      %589 = vector.broadcast %cst_279 : f32 to vector<8x128xf32>
      %590 = arith.mulf %589, %588 : vector<8x128xf32>
      %591 = math.tanh %590 : vector<8x128xf32>
      %cst_280 = arith.constant 5.000000e-01 : f32
      %592 = vector.broadcast %cst_280 : f32 to vector<8x128xf32>
      %593 = arith.mulf %592, %591 : vector<8x128xf32>
      %cst_281 = arith.constant 5.000000e-01 : f32
      %594 = vector.broadcast %cst_281 : f32 to vector<8x128xf32>
      %595 = arith.addf %593, %594 : vector<8x128xf32>
      %c0_282 = arith.constant 0 : index
      %c0_283 = arith.constant 0 : index
      %596 = vector.load %arg12[%c0_282, %c0_283] : memref<8x128xf32, #tpu.memory_space<vmem>>, vector<8x128xf32>
      %597 = arith.mulf %585, %596 : vector<8x128xf32>
      %598 = arith.mulf %577, %587 : vector<8x128xf32>
      %599 = arith.addf %597, %598 : vector<8x128xf32>
      %600 = math.tanh %599 : vector<8x128xf32>
      %601 = arith.mulf %595, %600 : vector<8x128xf32>
      %602 = vector.broadcast %560 : i32 to vector<8x1xi32>
      %603 = arith.cmpi slt, %602, %15 : vector<8x1xi32>
      %c0_284 = arith.constant 0 : index
      %c0_285 = arith.constant 0 : index
      %604 = vector.load %arg11[%c0_284, %c0_285] : memref<8x128xf32, #tpu.memory_space<vmem>>, vector<8x128xf32>
      %605 = vector.shape_cast %603 : vector<8x1xi1> to vector<8x1xi1>
      %606 = vector.broadcast %605 : vector<8x1xi1> to vector<8x128xi1>
      %607 = arith.select %606, %601, %604 : vector<8x128xi1>, vector<8x128xf32>
      %c0_286 = arith.constant 0 : index
      %c0_287 = arith.constant 0 : index
      %608 = vector.load %arg11[%c0_286, %c0_287] : memref<8x128xf32, #tpu.memory_space<vmem>>, vector<8x128xf32>
      tpu.vector_store %arg11[%c0_286, %c0_287], %607 {strides = array<i32>} : memref<8x128xf32, #tpu.memory_space<vmem>>, vector<8x128xf32>,
      %c0_288 = arith.constant 0 : index
      %c0_289 = arith.constant 0 : index
      %609 = vector.load %arg12[%c0_288, %c0_289] : memref<8x128xf32, #tpu.memory_space<vmem>>, vector<8x128xf32>
      %610 = vector.shape_cast %603 : vector<8x1xi1> to vector<8x1xi1>
      %611 = vector.broadcast %610 : vector<8x1xi1> to vector<8x128xi1>
      %612 = arith.select %611, %599, %609 : vector<8x128xi1>, vector<8x128xf32>
      %c0_290 = arith.constant 0 : index
      %c0_291 = arith.constant 0 : index
      %613 = vector.load %arg12[%c0_290, %c0_291] : memref<8x128xf32, #tpu.memory_space<vmem>>, vector<8x128xf32>
      tpu.vector_store %arg12[%c0_290, %c0_291], %612 {strides = array<i32>} : memref<8x128xf32, #tpu.memory_space<vmem>>, vector<8x128xf32>,
      %cst_292 = arith.constant 0.000000e+00 : f32
      %614 = vector.shape_cast %603 : vector<8x1xi1> to vector<8x1xi1>
      %615 = vector.broadcast %614 : vector<8x1xi1> to vector<8x128xi1>
      %616 = vector.broadcast %cst_292 : f32 to vector<8x128xf32>
      %617 = arith.select %615, %601, %616 : vector<8x128xi1>, vector<8x128xf32>
      %c0_293 = arith.constant 0 : index
      %c1152 = arith.constant 1152 : index
      %618 = vector.load %arg8[%c0_293, %c1152] : memref<8x1664xf32, #tpu.memory_space<vmem>>, vector<8x128xf32>
      tpu.vector_store %arg8[%c0_293, %c1152], %617 {strides = array<i32>} : memref<8x1664xf32, #tpu.memory_space<vmem>>, vector<8x128xf32>,
      %c13_i32_294 = arith.constant 13 : i32
      %619 = arith.muli %arg1, %c13_i32_294 : i32
      %c10_i32 = arith.constant 10 : i32
      %620 = arith.addi %619, %c10_i32 : i32
      %c10 = arith.constant 10 : index
      %c0_295 = arith.constant 0 : index
      %c0_296 = arith.constant 0 : index
      %621 = vector.load %arg3[%c10, %c0_295, %c0_296] : memref<13x8x128xbf16, #tpu.memory_space<vmem>>, vector<1x8x128xbf16>
      %622 = vector.shape_cast %621 : vector<1x8x128xbf16> to vector<8x128xbf16>
      %c0_297 = arith.constant 0 : index
      %c0_298 = arith.constant 0 : index
      %623 = vector.load %arg11[%c0_297, %c0_298] : memref<8x128xf32, #tpu.memory_space<vmem>>, vector<8x128xf32>
      %624 = arith.truncf %623 : vector<8x128xf32> to vector<8x128xbf16>
      %cst_299 = arith.constant dense<0.000000e+00> : vector<8x512xf32>
      %625 = tpu.matmul %622, %17, %cst_299 {dimension_numbers = #tpu.dot_dimension_numbers<[1], [0], [0], [1], [0, 0, 1, 1], [], []>} : vector<8x128xbf16>, vector<128x512xbf16>, vector<8x512xf32> -> vector<8x512xf32>
      %cst_300 = arith.constant dense<0.000000e+00> : vector<8x512xf32>
      %626 = tpu.matmul %624, %18, %cst_300 {dimension_numbers = #tpu.dot_dimension_numbers<[1], [0], [0], [1], [0, 0, 1, 1], [], []>} : vector<8x128xbf16>, vector<128x512xbf16>, vector<8x512xf32> -> vector<8x512xf32>
      %627 = arith.addf %625, %626 : vector<8x512xf32>
      %628 = vector.broadcast %16 : vector<1x512xf32> to vector<8x512xf32>
      %629 = arith.addf %627, %628 : vector<8x512xf32>
      %630 = vector.extract_strided_slice %629 {offsets = [0, 0], sizes = [8, 128], strides = [1, 1]} : vector<8x512xf32> to vector<8x128xf32>
      %cst_301 = arith.constant 5.000000e-01 : f32
      %631 = vector.broadcast %cst_301 : f32 to vector<8x128xf32>
      %632 = arith.mulf %631, %630 : vector<8x128xf32>
      %633 = math.tanh %632 : vector<8x128xf32>
      %cst_302 = arith.constant 5.000000e-01 : f32
      %634 = vector.broadcast %cst_302 : f32 to vector<8x128xf32>
      %635 = arith.mulf %634, %633 : vector<8x128xf32>
      %cst_303 = arith.constant 5.000000e-01 : f32
      %636 = vector.broadcast %cst_303 : f32 to vector<8x128xf32>
      %637 = arith.addf %635, %636 : vector<8x128xf32>
      %638 = vector.extract_strided_slice %629 {offsets = [0, 128], sizes = [8, 128], strides = [1, 1]} : vector<8x512xf32> to vector<8x128xf32>
      %cst_304 = arith.constant 5.000000e-01 : f32
      %639 = vector.broadcast %cst_304 : f32 to vector<8x128xf32>
      %640 = arith.mulf %639, %638 : vector<8x128xf32>
      %641 = math.tanh %640 : vector<8x128xf32>
      %cst_305 = arith.constant 5.000000e-01 : f32
      %642 = vector.broadcast %cst_305 : f32 to vector<8x128xf32>
      %643 = arith.mulf %642, %641 : vector<8x128xf32>
      %cst_306 = arith.constant 5.000000e-01 : f32
      %644 = vector.broadcast %cst_306 : f32 to vector<8x128xf32>
      %645 = arith.addf %643, %644 : vector<8x128xf32>
      %646 = vector.extract_strided_slice %629 {offsets = [0, 256], sizes = [8, 128], strides = [1, 1]} : vector<8x512xf32> to vector<8x128xf32>
      %647 = math.tanh %646 : vector<8x128xf32>
      %648 = vector.extract_strided_slice %629 {offsets = [0, 384], sizes = [8, 128], strides = [1, 1]} : vector<8x512xf32> to vector<8x128xf32>
      %cst_307 = arith.constant 5.000000e-01 : f32
      %649 = vector.broadcast %cst_307 : f32 to vector<8x128xf32>
      %650 = arith.mulf %649, %648 : vector<8x128xf32>
      %651 = math.tanh %650 : vector<8x128xf32>
      %cst_308 = arith.constant 5.000000e-01 : f32
      %652 = vector.broadcast %cst_308 : f32 to vector<8x128xf32>
      %653 = arith.mulf %652, %651 : vector<8x128xf32>
      %cst_309 = arith.constant 5.000000e-01 : f32
      %654 = vector.broadcast %cst_309 : f32 to vector<8x128xf32>
      %655 = arith.addf %653, %654 : vector<8x128xf32>
      %c0_310 = arith.constant 0 : index
      %c0_311 = arith.constant 0 : index
      %656 = vector.load %arg12[%c0_310, %c0_311] : memref<8x128xf32, #tpu.memory_space<vmem>>, vector<8x128xf32>
      %657 = arith.mulf %645, %656 : vector<8x128xf32>
      %658 = arith.mulf %637, %647 : vector<8x128xf32>
      %659 = arith.addf %657, %658 : vector<8x128xf32>
      %660 = math.tanh %659 : vector<8x128xf32>
      %661 = arith.mulf %655, %660 : vector<8x128xf32>
      %662 = vector.broadcast %620 : i32 to vector<8x1xi32>
      %663 = arith.cmpi slt, %662, %15 : vector<8x1xi32>
      %c0_312 = arith.constant 0 : index
      %c0_313 = arith.constant 0 : index
      %664 = vector.load %arg11[%c0_312, %c0_313] : memref<8x128xf32, #tpu.memory_space<vmem>>, vector<8x128xf32>
      %665 = vector.shape_cast %663 : vector<8x1xi1> to vector<8x1xi1>
      %666 = vector.broadcast %665 : vector<8x1xi1> to vector<8x128xi1>
      %667 = arith.select %666, %661, %664 : vector<8x128xi1>, vector<8x128xf32>
      %c0_314 = arith.constant 0 : index
      %c0_315 = arith.constant 0 : index
      %668 = vector.load %arg11[%c0_314, %c0_315] : memref<8x128xf32, #tpu.memory_space<vmem>>, vector<8x128xf32>
      tpu.vector_store %arg11[%c0_314, %c0_315], %667 {strides = array<i32>} : memref<8x128xf32, #tpu.memory_space<vmem>>, vector<8x128xf32>,
      %c0_316 = arith.constant 0 : index
      %c0_317 = arith.constant 0 : index
      %669 = vector.load %arg12[%c0_316, %c0_317] : memref<8x128xf32, #tpu.memory_space<vmem>>, vector<8x128xf32>
      %670 = vector.shape_cast %663 : vector<8x1xi1> to vector<8x1xi1>
      %671 = vector.broadcast %670 : vector<8x1xi1> to vector<8x128xi1>
      %672 = arith.select %671, %659, %669 : vector<8x128xi1>, vector<8x128xf32>
      %c0_318 = arith.constant 0 : index
      %c0_319 = arith.constant 0 : index
      %673 = vector.load %arg12[%c0_318, %c0_319] : memref<8x128xf32, #tpu.memory_space<vmem>>, vector<8x128xf32>
      tpu.vector_store %arg12[%c0_318, %c0_319], %672 {strides = array<i32>} : memref<8x128xf32, #tpu.memory_space<vmem>>, vector<8x128xf32>,
      %cst_320 = arith.constant 0.000000e+00 : f32
      %674 = vector.shape_cast %663 : vector<8x1xi1> to vector<8x1xi1>
      %675 = vector.broadcast %674 : vector<8x1xi1> to vector<8x128xi1>
      %676 = vector.broadcast %cst_320 : f32 to vector<8x128xf32>
      %677 = arith.select %675, %661, %676 : vector<8x128xi1>, vector<8x128xf32>
      %c0_321 = arith.constant 0 : index
      %c1280 = arith.constant 1280 : index
      %678 = vector.load %arg8[%c0_321, %c1280] : memref<8x1664xf32, #tpu.memory_space<vmem>>, vector<8x128xf32>
      tpu.vector_store %arg8[%c0_321, %c1280], %677 {strides = array<i32>} : memref<8x1664xf32, #tpu.memory_space<vmem>>, vector<8x128xf32>,
      %c13_i32_322 = arith.constant 13 : i32
      %679 = arith.muli %arg1, %c13_i32_322 : i32
      %c11_i32 = arith.constant 11 : i32
      %680 = arith.addi %679, %c11_i32 : i32
      %c11 = arith.constant 11 : index
      %c0_323 = arith.constant 0 : index
      %c0_324 = arith.constant 0 : index
      %681 = vector.load %arg3[%c11, %c0_323, %c0_324] : memref<13x8x128xbf16, #tpu.memory_space<vmem>>, vector<1x8x128xbf16>
      %682 = vector.shape_cast %681 : vector<1x8x128xbf16> to vector<8x128xbf16>
      %c0_325 = arith.constant 0 : index
      %c0_326 = arith.constant 0 : index
      %683 = vector.load %arg11[%c0_325, %c0_326] : memref<8x128xf32, #tpu.memory_space<vmem>>, vector<8x128xf32>
      %684 = arith.truncf %683 : vector<8x128xf32> to vector<8x128xbf16>
      %cst_327 = arith.constant dense<0.000000e+00> : vector<8x512xf32>
      %685 = tpu.matmul %682, %17, %cst_327 {dimension_numbers = #tpu.dot_dimension_numbers<[1], [0], [0], [1], [0, 0, 1, 1], [], []>} : vector<8x128xbf16>, vector<128x512xbf16>, vector<8x512xf32> -> vector<8x512xf32>
      %cst_328 = arith.constant dense<0.000000e+00> : vector<8x512xf32>
      %686 = tpu.matmul %684, %18, %cst_328 {dimension_numbers = #tpu.dot_dimension_numbers<[1], [0], [0], [1], [0, 0, 1, 1], [], []>} : vector<8x128xbf16>, vector<128x512xbf16>, vector<8x512xf32> -> vector<8x512xf32>
      %687 = arith.addf %685, %686 : vector<8x512xf32>
      %688 = vector.broadcast %16 : vector<1x512xf32> to vector<8x512xf32>
      %689 = arith.addf %687, %688 : vector<8x512xf32>
      %690 = vector.extract_strided_slice %689 {offsets = [0, 0], sizes = [8, 128], strides = [1, 1]} : vector<8x512xf32> to vector<8x128xf32>
      %cst_329 = arith.constant 5.000000e-01 : f32
      %691 = vector.broadcast %cst_329 : f32 to vector<8x128xf32>
      %692 = arith.mulf %691, %690 : vector<8x128xf32>
      %693 = math.tanh %692 : vector<8x128xf32>
      %cst_330 = arith.constant 5.000000e-01 : f32
      %694 = vector.broadcast %cst_330 : f32 to vector<8x128xf32>
      %695 = arith.mulf %694, %693 : vector<8x128xf32>
      %cst_331 = arith.constant 5.000000e-01 : f32
      %696 = vector.broadcast %cst_331 : f32 to vector<8x128xf32>
      %697 = arith.addf %695, %696 : vector<8x128xf32>
      %698 = vector.extract_strided_slice %689 {offsets = [0, 128], sizes = [8, 128], strides = [1, 1]} : vector<8x512xf32> to vector<8x128xf32>
      %cst_332 = arith.constant 5.000000e-01 : f32
      %699 = vector.broadcast %cst_332 : f32 to vector<8x128xf32>
      %700 = arith.mulf %699, %698 : vector<8x128xf32>
      %701 = math.tanh %700 : vector<8x128xf32>
      %cst_333 = arith.constant 5.000000e-01 : f32
      %702 = vector.broadcast %cst_333 : f32 to vector<8x128xf32>
      %703 = arith.mulf %702, %701 : vector<8x128xf32>
      %cst_334 = arith.constant 5.000000e-01 : f32
      %704 = vector.broadcast %cst_334 : f32 to vector<8x128xf32>
      %705 = arith.addf %703, %704 : vector<8x128xf32>
      %706 = vector.extract_strided_slice %689 {offsets = [0, 256], sizes = [8, 128], strides = [1, 1]} : vector<8x512xf32> to vector<8x128xf32>
      %707 = math.tanh %706 : vector<8x128xf32>
      %708 = vector.extract_strided_slice %689 {offsets = [0, 384], sizes = [8, 128], strides = [1, 1]} : vector<8x512xf32> to vector<8x128xf32>
      %cst_335 = arith.constant 5.000000e-01 : f32
      %709 = vector.broadcast %cst_335 : f32 to vector<8x128xf32>
      %710 = arith.mulf %709, %708 : vector<8x128xf32>
      %711 = math.tanh %710 : vector<8x128xf32>
      %cst_336 = arith.constant 5.000000e-01 : f32
      %712 = vector.broadcast %cst_336 : f32 to vector<8x128xf32>
      %713 = arith.mulf %712, %711 : vector<8x128xf32>
      %cst_337 = arith.constant 5.000000e-01 : f32
      %714 = vector.broadcast %cst_337 : f32 to vector<8x128xf32>
      %715 = arith.addf %713, %714 : vector<8x128xf32>
      %c0_338 = arith.constant 0 : index
      %c0_339 = arith.constant 0 : index
      %716 = vector.load %arg12[%c0_338, %c0_339] : memref<8x128xf32, #tpu.memory_space<vmem>>, vector<8x128xf32>
      %717 = arith.mulf %705, %716 : vector<8x128xf32>
      %718 = arith.mulf %697, %707 : vector<8x128xf32>
      %719 = arith.addf %717, %718 : vector<8x128xf32>
      %720 = math.tanh %719 : vector<8x128xf32>
      %721 = arith.mulf %715, %720 : vector<8x128xf32>
      %722 = vector.broadcast %680 : i32 to vector<8x1xi32>
      %723 = arith.cmpi slt, %722, %15 : vector<8x1xi32>
      %c0_340 = arith.constant 0 : index
      %c0_341 = arith.constant 0 : index
      %724 = vector.load %arg11[%c0_340, %c0_341] : memref<8x128xf32, #tpu.memory_space<vmem>>, vector<8x128xf32>
      %725 = vector.shape_cast %723 : vector<8x1xi1> to vector<8x1xi1>
      %726 = vector.broadcast %725 : vector<8x1xi1> to vector<8x128xi1>
      %727 = arith.select %726, %721, %724 : vector<8x128xi1>, vector<8x128xf32>
      %c0_342 = arith.constant 0 : index
      %c0_343 = arith.constant 0 : index
      %728 = vector.load %arg11[%c0_342, %c0_343] : memref<8x128xf32, #tpu.memory_space<vmem>>, vector<8x128xf32>
      tpu.vector_store %arg11[%c0_342, %c0_343], %727 {strides = array<i32>} : memref<8x128xf32, #tpu.memory_space<vmem>>, vector<8x128xf32>,
      %c0_344 = arith.constant 0 : index
      %c0_345 = arith.constant 0 : index
      %729 = vector.load %arg12[%c0_344, %c0_345] : memref<8x128xf32, #tpu.memory_space<vmem>>, vector<8x128xf32>
      %730 = vector.shape_cast %723 : vector<8x1xi1> to vector<8x1xi1>
      %731 = vector.broadcast %730 : vector<8x1xi1> to vector<8x128xi1>
      %732 = arith.select %731, %719, %729 : vector<8x128xi1>, vector<8x128xf32>
      %c0_346 = arith.constant 0 : index
      %c0_347 = arith.constant 0 : index
      %733 = vector.load %arg12[%c0_346, %c0_347] : memref<8x128xf32, #tpu.memory_space<vmem>>, vector<8x128xf32>
      tpu.vector_store %arg12[%c0_346, %c0_347], %732 {strides = array<i32>} : memref<8x128xf32, #tpu.memory_space<vmem>>, vector<8x128xf32>,
      %cst_348 = arith.constant 0.000000e+00 : f32
      %734 = vector.shape_cast %723 : vector<8x1xi1> to vector<8x1xi1>
      %735 = vector.broadcast %734 : vector<8x1xi1> to vector<8x128xi1>
      %736 = vector.broadcast %cst_348 : f32 to vector<8x128xf32>
      %737 = arith.select %735, %721, %736 : vector<8x128xi1>, vector<8x128xf32>
      %c0_349 = arith.constant 0 : index
      %c1408 = arith.constant 1408 : index
      %738 = vector.load %arg8[%c0_349, %c1408] : memref<8x1664xf32, #tpu.memory_space<vmem>>, vector<8x128xf32>
      tpu.vector_store %arg8[%c0_349, %c1408], %737 {strides = array<i32>} : memref<8x1664xf32, #tpu.memory_space<vmem>>, vector<8x128xf32>,
      %c13_i32_350 = arith.constant 13 : i32
      %739 = arith.muli %arg1, %c13_i32_350 : i32
      %c12_i32 = arith.constant 12 : i32
      %740 = arith.addi %739, %c12_i32 : i32
      %c12 = arith.constant 12 : index
      %c0_351 = arith.constant 0 : index
      %c0_352 = arith.constant 0 : index
      %741 = vector.load %arg3[%c12, %c0_351, %c0_352] : memref<13x8x128xbf16, #tpu.memory_space<vmem>>, vector<1x8x128xbf16>
      %742 = vector.shape_cast %741 : vector<1x8x128xbf16> to vector<8x128xbf16>
      %c0_353 = arith.constant 0 : index
      %c0_354 = arith.constant 0 : index
      %743 = vector.load %arg11[%c0_353, %c0_354] : memref<8x128xf32, #tpu.memory_space<vmem>>, vector<8x128xf32>
      %744 = arith.truncf %743 : vector<8x128xf32> to vector<8x128xbf16>
      %cst_355 = arith.constant dense<0.000000e+00> : vector<8x512xf32>
      %745 = tpu.matmul %742, %17, %cst_355 {dimension_numbers = #tpu.dot_dimension_numbers<[1], [0], [0], [1], [0, 0, 1, 1], [], []>} : vector<8x128xbf16>, vector<128x512xbf16>, vector<8x512xf32> -> vector<8x512xf32>
      %cst_356 = arith.constant dense<0.000000e+00> : vector<8x512xf32>
      %746 = tpu.matmul %744, %18, %cst_356 {dimension_numbers = #tpu.dot_dimension_numbers<[1], [0], [0], [1], [0, 0, 1, 1], [], []>} : vector<8x128xbf16>, vector<128x512xbf16>, vector<8x512xf32> -> vector<8x512xf32>
      %747 = arith.addf %745, %746 : vector<8x512xf32>
      %748 = vector.broadcast %16 : vector<1x512xf32> to vector<8x512xf32>
      %749 = arith.addf %747, %748 : vector<8x512xf32>
      %750 = vector.extract_strided_slice %749 {offsets = [0, 0], sizes = [8, 128], strides = [1, 1]} : vector<8x512xf32> to vector<8x128xf32>
      %cst_357 = arith.constant 5.000000e-01 : f32
      %751 = vector.broadcast %cst_357 : f32 to vector<8x128xf32>
      %752 = arith.mulf %751, %750 : vector<8x128xf32>
      %753 = math.tanh %752 : vector<8x128xf32>
      %cst_358 = arith.constant 5.000000e-01 : f32
      %754 = vector.broadcast %cst_358 : f32 to vector<8x128xf32>
      %755 = arith.mulf %754, %753 : vector<8x128xf32>
      %cst_359 = arith.constant 5.000000e-01 : f32
      %756 = vector.broadcast %cst_359 : f32 to vector<8x128xf32>
      %757 = arith.addf %755, %756 : vector<8x128xf32>
      %758 = vector.extract_strided_slice %749 {offsets = [0, 128], sizes = [8, 128], strides = [1, 1]} : vector<8x512xf32> to vector<8x128xf32>
      %cst_360 = arith.constant 5.000000e-01 : f32
      %759 = vector.broadcast %cst_360 : f32 to vector<8x128xf32>
      %760 = arith.mulf %759, %758 : vector<8x128xf32>
      %761 = math.tanh %760 : vector<8x128xf32>
      %cst_361 = arith.constant 5.000000e-01 : f32
      %762 = vector.broadcast %cst_361 : f32 to vector<8x128xf32>
      %763 = arith.mulf %762, %761 : vector<8x128xf32>
      %cst_362 = arith.constant 5.000000e-01 : f32
      %764 = vector.broadcast %cst_362 : f32 to vector<8x128xf32>
      %765 = arith.addf %763, %764 : vector<8x128xf32>
      %766 = vector.extract_strided_slice %749 {offsets = [0, 256], sizes = [8, 128], strides = [1, 1]} : vector<8x512xf32> to vector<8x128xf32>
      %767 = math.tanh %766 : vector<8x128xf32>
      %768 = vector.extract_strided_slice %749 {offsets = [0, 384], sizes = [8, 128], strides = [1, 1]} : vector<8x512xf32> to vector<8x128xf32>
      %cst_363 = arith.constant 5.000000e-01 : f32
      %769 = vector.broadcast %cst_363 : f32 to vector<8x128xf32>
      %770 = arith.mulf %769, %768 : vector<8x128xf32>
      %771 = math.tanh %770 : vector<8x128xf32>
      %cst_364 = arith.constant 5.000000e-01 : f32
      %772 = vector.broadcast %cst_364 : f32 to vector<8x128xf32>
      %773 = arith.mulf %772, %771 : vector<8x128xf32>
      %cst_365 = arith.constant 5.000000e-01 : f32
      %774 = vector.broadcast %cst_365 : f32 to vector<8x128xf32>
      %775 = arith.addf %773, %774 : vector<8x128xf32>
      %c0_366 = arith.constant 0 : index
      %c0_367 = arith.constant 0 : index
      %776 = vector.load %arg12[%c0_366, %c0_367] : memref<8x128xf32, #tpu.memory_space<vmem>>, vector<8x128xf32>
      %777 = arith.mulf %765, %776 : vector<8x128xf32>
      %778 = arith.mulf %757, %767 : vector<8x128xf32>
      %779 = arith.addf %777, %778 : vector<8x128xf32>
      %780 = math.tanh %779 : vector<8x128xf32>
      %781 = arith.mulf %775, %780 : vector<8x128xf32>
      %782 = vector.broadcast %740 : i32 to vector<8x1xi32>
      %783 = arith.cmpi slt, %782, %15 : vector<8x1xi32>
      %c0_368 = arith.constant 0 : index
      %c0_369 = arith.constant 0 : index
      %784 = vector.load %arg11[%c0_368, %c0_369] : memref<8x128xf32, #tpu.memory_space<vmem>>, vector<8x128xf32>
      %785 = vector.shape_cast %783 : vector<8x1xi1> to vector<8x1xi1>
      %786 = vector.broadcast %785 : vector<8x1xi1> to vector<8x128xi1>
      %787 = arith.select %786, %781, %784 : vector<8x128xi1>, vector<8x128xf32>
      %c0_370 = arith.constant 0 : index
      %c0_371 = arith.constant 0 : index
      %788 = vector.load %arg11[%c0_370, %c0_371] : memref<8x128xf32, #tpu.memory_space<vmem>>, vector<8x128xf32>
      tpu.vector_store %arg11[%c0_370, %c0_371], %787 {strides = array<i32>} : memref<8x128xf32, #tpu.memory_space<vmem>>, vector<8x128xf32>,
      %c0_372 = arith.constant 0 : index
      %c0_373 = arith.constant 0 : index
      %789 = vector.load %arg12[%c0_372, %c0_373] : memref<8x128xf32, #tpu.memory_space<vmem>>, vector<8x128xf32>
      %790 = vector.shape_cast %783 : vector<8x1xi1> to vector<8x1xi1>
      %791 = vector.broadcast %790 : vector<8x1xi1> to vector<8x128xi1>
      %792 = arith.select %791, %779, %789 : vector<8x128xi1>, vector<8x128xf32>
      %c0_374 = arith.constant 0 : index
      %c0_375 = arith.constant 0 : index
      %793 = vector.load %arg12[%c0_374, %c0_375] : memref<8x128xf32, #tpu.memory_space<vmem>>, vector<8x128xf32>
      tpu.vector_store %arg12[%c0_374, %c0_375], %792 {strides = array<i32>} : memref<8x128xf32, #tpu.memory_space<vmem>>, vector<8x128xf32>,
      %cst_376 = arith.constant 0.000000e+00 : f32
      %794 = vector.shape_cast %783 : vector<8x1xi1> to vector<8x1xi1>
      %795 = vector.broadcast %794 : vector<8x1xi1> to vector<8x128xi1>
      %796 = vector.broadcast %cst_376 : f32 to vector<8x128xf32>
      %797 = arith.select %795, %781, %796 : vector<8x128xi1>, vector<8x128xf32>
      %c0_377 = arith.constant 0 : index
      %c1536 = arith.constant 1536 : index
      %798 = vector.load %arg8[%c0_377, %c1536] : memref<8x1664xf32, #tpu.memory_space<vmem>>, vector<8x128xf32>
      tpu.vector_store %arg8[%c0_377, %c1536], %797 {strides = array<i32>} : memref<8x1664xf32, #tpu.memory_space<vmem>>, vector<8x128xf32>,
    } else {
    }
    %true = arith.constant true
    %9 = arith.xori %6, %true : i1
    %10 = arith.extui %9 : i1 to i32
    %c0_i32_2 = arith.constant 0 : i32
    %11 = arith.cmpi ne, %10, %c0_i32_2 : i32
    scf.if %11 {
      %cst = arith.constant 0.000000e+00 : f32
      %15 = vector.broadcast %cst : f32 to vector<8x1664xf32>
      %c0 = arith.constant 0 : index
      %c0_5 = arith.constant 0 : index
      %16 = vector.load %arg8[%c0, %c0_5] : memref<8x1664xf32, #tpu.memory_space<vmem>>, vector<8x1664xf32>
      tpu.vector_store %arg8[%c0, %c0_5], %15 {strides = array<i32>} : memref<8x1664xf32, #tpu.memory_space<vmem>>, vector<8x1664xf32>,
    } else {
    }
    %c0_i32_3 = arith.constant 0 : i32
    %12 = arith.cmpi eq, %arg1, %c0_i32_3 : i32
    %13 = arith.extui %12 : i1 to i32
    %c0_i32_4 = arith.constant 0 : i32
    %14 = arith.cmpi ne, %13, %c0_i32_4 : i32
    scf.if %14 {
      %c0 = arith.constant 0 : index
      %c0_5 = arith.constant 0 : index
      %15 = vector.load %arg11[%c0, %c0_5] : memref<8x128xf32, #tpu.memory_space<vmem>>, vector<8x128xf32>
      %c0_6 = arith.constant 0 : index
      %c0_7 = arith.constant 0 : index
      %16 = vector.load %arg9[%c0_6, %c0_7] : memref<8x128xf32, #tpu.memory_space<vmem>>, vector<8x128xf32>
      tpu.vector_store %arg9[%c0_6, %c0_7], %15 {strides = array<i32>} : memref<8x128xf32, #tpu.memory_space<vmem>>, vector<8x128xf32>,
      %c0_8 = arith.constant 0 : index
      %c0_9 = arith.constant 0 : index
      %17 = vector.load %arg12[%c0_8, %c0_9] : memref<8x128xf32, #tpu.memory_space<vmem>>, vector<8x128xf32>
      %c0_10 = arith.constant 0 : index
      %c0_11 = arith.constant 0 : index
      %18 = vector.load %arg10[%c0_10, %c0_11] : memref<8x128xf32, #tpu.memory_space<vmem>>, vector<8x128xf32>
      tpu.vector_store %arg10[%c0_10, %c0_11], %17 {strides = array<i32>} : memref<8x128xf32, #tpu.memory_space<vmem>>, vector<8x128xf32>,
    } else {
    }
    return
  }
  func.func @transform_0(%arg0: i32, %arg1: i32, %arg2: memref<1xi32, #tpu.memory_space<smem>>) -> (i32, i32, i32) {
    %c0_i32 = arith.constant 0 : i32
    %c0_i32_0 = arith.constant 0 : i32
    return %arg1, %arg0, %c0_i32 : i32, i32, i32
  }
  func.func @transform_1(%arg0: i32, %arg1: i32, %arg2: memref<1xi32, #tpu.memory_space<smem>>) -> (i32, i32) {
    %c0_i32 = arith.constant 0 : i32
    %c0_i32_0 = arith.constant 0 : i32
    %c0_i32_1 = arith.constant 0 : i32
    return %c0_i32, %c0_i32_0 : i32, i32
  }
  func.func @transform_2(%arg0: i32, %arg1: i32, %arg2: memref<1xi32, #tpu.memory_space<smem>>) -> (i32, i32) {
    %c0_i32 = arith.constant 0 : i32
    %c0_i32_0 = arith.constant 0 : i32
    %c0_i32_1 = arith.constant 0 : i32
    return %c0_i32, %c0_i32_0 : i32, i32
  }
  func.func @transform_3(%arg0: i32, %arg1: i32, %arg2: memref<1xi32, #tpu.memory_space<smem>>) -> (i32, i32) {
    %c0_i32 = arith.constant 0 : i32
    %c0_i32_0 = arith.constant 0 : i32
    %c0_i32_1 = arith.constant 0 : i32
    return %c0_i32, %c0_i32_0 : i32, i32
  }
  func.func @transform_4(%arg0: i32, %arg1: i32, %arg2: memref<1xi32, #tpu.memory_space<smem>>) -> (i32, i32) {
    %c0_i32 = arith.constant 0 : i32
    %c0_i32_0 = arith.constant 0 : i32
    return %arg0, %c0_i32 : i32, i32
  }
  func.func @transform_5(%arg0: i32, %arg1: i32, %arg2: memref<1xi32, #tpu.memory_space<smem>>) -> (i32, i32) {
    %c0_i32 = arith.constant 0 : i32
    return %arg0, %arg1 : i32, i32
  }
  func.func @transform_6(%arg0: i32, %arg1: i32, %arg2: memref<1xi32, #tpu.memory_space<smem>>) -> (i32, i32) {
    %c0_i32 = arith.constant 0 : i32
    %c0_i32_0 = arith.constant 0 : i32
    return %arg0, %c0_i32 : i32, i32
  }
  func.func @transform_7(%arg0: i32, %arg1: i32, %arg2: memref<1xi32, #tpu.memory_space<smem>>) -> (i32, i32) {
    %c0_i32 = arith.constant 0 : i32
    %c0_i32_0 = arith.constant 0 : i32
    return %arg0, %c0_i32 : i32, i32
  }
}

</mosaic_0001>

<bundles_post_ra>
// kernel: tpu_custom_call.1
= control target key start
LH: loop header
LB: loop body
LE: loop exit
PB: predicated region body
PF: predicated region fallthrough
CT: control target
= control target key end

     0   :  { %15 = vsyncpa [#allocation7], 0  ;;  %s5438_s0 = inlined_call_operand.<no memory space> [shape: s32[1], index: 0, kind: input, shape index: {}]   ;;  %s5439_s1 = inlined_call_operand.hbm [shape: bf16[13,8,128], index: 1, kind: input, shape index: {}]   ;;  %s5440_s2 = inlined_call_operand.hbm [shape: bf16[128,512], index: 2, kind: input, shape index: {}]   ;;  %s5441_s3 = inlined_call_operand.hbm [shape: bf16[128,512], index: 3, kind: input, shape index: {}]   ;;  %s5442_s4 = inlined_call_operand.vmem [shape: f32[1,512], index: 4, kind: input, shape index: {}]   ;;  %s5443_s5 = inlined_call_operand.vmem [shape: s32[8,1], index: 5, kind: input, shape index: {}]   ;;  %s5444_s6 = inlined_call_operand.hbm [shape: f32[8,1664], index: 6, kind: output, shape index: {0}]   ;;  %s5445_s7 = inlined_call_operand.hbm [shape: f32[8,128], index: 7, kind: output, shape index: {1}]   ;;  %s5446_s8 = inlined_call_operand.hbm [shape: f32[8,128], index: 8, kind: output, shape index: {2}]  }
   0x1   :  { %16 = vsyncpa [#allocation10], 0 }
   0x2   :  { %17 = vsyncpa [#allocation8], 0 }
   0x3   :  { %18 = vsyncpa [#allocation14], 0  ;;  %s3819_s27 = smov [#allocation9]   ;;  %s3679_s9 = scalar_lea.hbm %s5440_s2, 4096 }
   0x4   :  { %s36_s28 = sshll.u32 %s3819_s27, 4  ;;  %p3680_p0 = scmp.ne.s32.totalorder %s5440_s2, %s3679_s9  ;;  %s37_s28 = int_to_ptr.vmem [resolvable:$true] %s36_s28 }
   0x5   :  { %p3683_p1 = scmp.lt.u32.totalorder %s3679_s9, %s5440_s2 }
   0x7   :  { %p3685_p2 = pnand %p3683_p1, %p3680_p0 }
   0x9   :  { %3688 = shalt.err (!%p3685_p2)
}
   0xa   :  { %s3689_s14 = scalar_lea.vmem %s37_s28, 4096  ;;  %p3694_p4 = scmp.lt.s32.totalorder %s37_s28, %s37_s28 }
   0xb   :  { %p3690_p3 = scmp.ne.s32.totalorder %s37_s28, %s3689_s14  ;;  %p3695_p5 = scmp.lt.s32.totalorder %s3689_s14, %s3689_s14 }
   0xd   :  { %p3696_p6 = por %p3695_p5, %p3694_p4 }
   0xf   :  { %p3697_p7 = pnand %p3696_p6, %p3690_p3 }
  0x11   :  { %3700 = shalt.err (!%p3697_p7)
}
  0x12   :  { %s3820_s15 = smov 256   ;;  %s3821_s16 = smov 16  }
  0x13   :  { %42 = dma.hbm_to_vmem [thread:$0]  %s5440_s2, 4096, %s37_s28, [#allocation10], %s3820_s15, %s3820_s15, %s3821_s16  }
  0x14   :  { %s3822_s19 = smov [#allocation6]   ;;  %s3701_s23 = scalar_lea.hbm %s5439_s1, 832 }
  0x15   :  { %s24_s20 = sshll.u32 %s3822_s19, 4  ;;  %p3702_p8 = scmp.ne.s32.totalorder %s5439_s1, %s3701_s23  ;;  %s25_s20 = int_to_ptr.vmem [resolvable:$true] %s24_s20 }
  0x16   :  { %p3705_p9 = scmp.lt.u32.totalorder %s3701_s23, %s5439_s1 }
  0x18   :  { %p3707_p10 = pnand %p3705_p9, %p3702_p8 }
  0x1a   :  { %3710 = shalt.err (!%p3707_p10)
}
  0x1b   :  { %s3711_s29 = scalar_lea.vmem %s25_s20, 832  ;;  %p3716_p12 = scmp.lt.s32.totalorder %s25_s20, %s25_s20 }
  0x1c   :  { %p3712_p11 = scmp.ne.s32.totalorder %s25_s20, %s3711_s29  ;;  %p3717_p13 = scmp.lt.s32.totalorder %s3711_s29, %s3711_s29 }
  0x1e   :  { %p3718_p0 = por %p3717_p13, %p3716_p12 }
  0x20   :  { %p3719_p1 = pnand %p3718_p0, %p3712_p11 }
  0x22   :  { %3722 = shalt.err (!%p3719_p1)
}
  0x23   :  { %s3823_s2 = smov 64   ;;  %s3824_s28 = smov 4  }
  0x24   :  { %30 = dma.hbm_to_vmem [thread:$0]  %s5439_s1, 832, %s25_s20, [#allocation7], %s3823_s2, %s3823_s2, %s3824_s28  }
  0x25   :  { %s3825_s10 = smov [#allocation11]   ;;  %s3723_s14 = scalar_lea.hbm %s5441_s3, 4096 }
  0x26   :  { %s48_s11 = sshll.u32 %s3825_s10, 4  ;;  %p3724_p2 = scmp.ne.s32.totalorder %s5441_s3, %s3723_s14  ;;  %s49_s11 = int_to_ptr.vmem [resolvable:$true] %s48_s11 }
  0x27   :  { %p3727_p3 = scmp.lt.u32.totalorder %s3723_s14, %s5441_s3 }
  0x29   :  { %p3729_p4 = pnand %p3727_p3, %p3724_p2 }
  0x2b   :  { %3732 = shalt.err (!%p3729_p4)
}
  0x2c   :  { %s3733_s22 = scalar_lea.vmem %s49_s11, 4096  ;;  %p3738_p6 = scmp.lt.s32.totalorder %s49_s11, %s49_s11 }
  0x2d   :  { %p3734_p5 = scmp.ne.s32.totalorder %s49_s11, %s3733_s22  ;;  %p3739_p7 = scmp.lt.s32.totalorder %s3733_s22, %s3733_s22 }
  0x2f   :  { %p3740_p8 = por %p3739_p7, %p3738_p6 }
  0x31   :  { %p3741_p9 = pnand %p3740_p8, %p3734_p5 }
  0x33   :  { %3744 = shalt.err (!%p3741_p9)
}
  0x34   :  { %54 = dma.hbm_to_vmem [thread:$0]  %s5441_s3, 4096, %s49_s11, [#allocation10], %s3820_s15, %s3820_s15, %s3821_s16  }
  0x35   :  { %3811 = dma.done.wait [#allocation7], 832  }
  0x36   :  { %3812 = vsyncadd [#allocation7], 4294966464 }
  0x37   :  { %3813 = dma.done.wait [#allocation10], 8192  }
  0x38   :  { %3814 = vsyncadd [#allocation10], 4294959104  ;;  %v3826_v0 = vmov 0.0   ;;  %p3231_p10 = scmp.le.s32.totalorder %s5438_s0, 0 }
  0x39   :  { %73 = vst [vmem:[#allocation2] sm:$0xff] %v3826_v0  ;;  %74 = vst [vmem:[#allocation3] sm:$0xff] %v3826_v0 }
  0x3a   :  { %80 = sbr.rel (%p3231_p10) target bundleno = 3817 (0xee9), region = 41 }
  0x41   :  { %v3922_v1 = vld [vmem:[#allocation11 + $0x4] ss:$16 sps:$4 sm:$0xff]   ;;  %v3924_v2 = vld [vmem:[#allocation11 + $0xc] ss:$16 sps:$4 sm:$0xff]   ;;  %v5461_v3 = vmov 0  }
  0x42   :  { %342 = vmatprep.mubr.bf16.mxu0 %v5461_v3  ;;  %383 = vmatprep.mubr.bf16.mxu1 %v5461_v3  ;;  %v3929_v4 = vld [vmem:[#allocation11] ss:$16 sps:$4 sm:$0xff]   ;;  %v3931_v5 = vld [vmem:[#allocation11 + $0x8] ss:$16 sps:$4 sm:$0xff]   ;;  %v3935_v6 = vld [vmem:[#allocation11 + $0x24] ss:$16 sps:$4 sm:$0xff]  }
  0x43   :  { %310 = vmatprep.subr.bf16.mxu0 %v3922_v1  ;;  %3323 = vset.pattern.permute.xlu0 %v5461_v3  ;;  %v3940_v7 = vld [vmem:[#allocation11 + $0x2c] ss:$16 sps:$4 sm:$0xff]   ;;  %v3942_v8 = vld [vmem:[#allocation11 + $0x20] ss:$16 sps:$4 sm:$0xff]   ;;  %v3945_v9 = vld [vmem:[#allocation11 + $0x28] ss:$16 sps:$4 sm:$0xff]  }
  0x44   :  { %351 = vmatprep.subr.bf16.mxu1 %v3924_v2  ;;  %3324 = vset.pattern.permute.xlu1 %v5461_v3  ;;  %5655 = vst [vmem:[#allocation20_spill] sm:$0xff] %v3940_v7  ;;  %5656 = vst [vmem:[#allocation21_spill] sm:$0xff] %v3942_v8  ;;  %v3948_v10 = vld [vmem:[#allocation11 + $0x44] ss:$16 sps:$4 sm:$0xff]   ;;  %v3950_v11 = vld [vmem:[#allocation11 + $0x4c] ss:$16 sps:$4 sm:$0xff]  }
  0x45   :  { %311 = vmatpush1.bf16.msra.mxu0 %v3929_v4  ;;  %352 = vmatpush1.bf16.msra.mxu1 %v3931_v5  ;;  %5657 = vst [vmem:[#allocation22_spill] sm:$0xff] %v3945_v9  ;;  %5658 = vst [vmem:[#allocation23_spill] sm:$0xff] %v3948_v10  ;;  %v3952_v12 = vld [vmem:[#allocation11 + $0x40] ss:$16 sps:$4 sm:$0xff]   ;;  %v3954_v13 = vld [vmem:[#allocation11 + $0x48] ss:$16 sps:$4 sm:$0xff]  }
  0x46   :  { %312 = vmatprep.subr.bf16.mxu0 %v3935_v6  ;;  %353 = vmatprep.subr.bf16.mxu1 %v3940_v7  ;;  %5659 = vst [vmem:[#allocation24_spill] sm:$0xff] %v3950_v11  ;;  %5660 = vst [vmem:[#allocation25_spill] sm:$0xff] %v3952_v12  ;;  %v3958_v14 = vld [vmem:[#allocation11 + $0x64] ss:$16 sps:$4 sm:$0xff]   ;;  %v3962_v15 = vld [vmem:[#allocation11 + $0x6c] ss:$16 sps:$4 sm:$0xff]  }
  0x47   :  { %5661 = vst [vmem:[#allocation26_spill] sm:$0xff] %v3954_v13  ;;  %5662 = vst [vmem:[#allocation27_spill] sm:$0xff] %v3958_v14  ;;  %v3964_v16 = vld [vmem:[#allocation11 + $0x60] ss:$16 sps:$4 sm:$0xff]   ;;  %v3968_v17 = vld [vmem:[#allocation11 + $0x68] ss:$16 sps:$4 sm:$0xff]  }
  0x48   :  { %5663 = vst [vmem:[#allocation28_spill] sm:$0xff] %v3962_v15  ;;  %5664 = vst [vmem:[#allocation29_spill] sm:$0xff] %v3964_v16  ;;  %v3970_v18 = vld [vmem:[#allocation11 + $0x84] ss:$16 sps:$4 sm:$0xff]   ;;  %v3974_v19 = vld [vmem:[#allocation11 + $0x8c] ss:$16 sps:$4 sm:$0xff]  }
  0x49   :  { %313 = vmatpush1.bf16.msra.mxu0 %v3942_v8  ;;  %354 = vmatpush1.bf16.msra.mxu1 %v3945_v9  ;;  %5665 = vst [vmem:[#allocation30_spill] sm:$0xff] %v3968_v17  ;;  %5666 = vst [vmem:[#allocation31_spill] sm:$0xff] %v3970_v18  ;;  %v3976_v20 = vld [vmem:[#allocation11 + $0x80] ss:$16 sps:$4 sm:$0xff]   ;;  %v3978_v21 = vld [vmem:[#allocation11 + $0x88] ss:$16 sps:$4 sm:$0xff]  }
  0x4a   :  { %314 = vmatprep.subr.bf16.mxu0 %v3948_v10  ;;  %355 = vmatprep.subr.bf16.mxu1 %v3950_v11  ;;  %5667 = vst [vmem:[#allocation32_spill] sm:$0xff] %v3974_v19  ;;  %5668 = vst [vmem:[#allocation33_spill] sm:$0xff] %v3976_v20  ;;  %v3982_v22 = vld [vmem:[#allocation11 + $0xa4] ss:$16 sps:$4 sm:$0xff]   ;;  %v3986_v23 = vld [vmem:[#allocation11 + $0xac] ss:$16 sps:$4 sm:$0xff]  }
  0x4b   :  { %5669 = vst [vmem:[#allocation34_spill] sm:$0xff] %v3978_v21  ;;  %5670 = vst [vmem:[#allocation35_spill] sm:$0xff] %v3982_v22  ;;  %v3990_v24 = vld [vmem:[#allocation11 + $0xa0] ss:$16 sps:$4 sm:$0xff]   ;;  %v3992_v25 = vld [vmem:[#allocation11 + $0xa8] ss:$16 sps:$4 sm:$0xff]  }
  0x4c   :  { %5671 = vst [vmem:[#allocation36_spill] sm:$0xff] %v3986_v23  ;;  %5672 = vst [vmem:[#allocation37_spill] sm:$0xff] %v3990_v24  ;;  %v3996_v26 = vld [vmem:[#allocation11 + $0xc4] ss:$16 sps:$4 sm:$0xff]   ;;  %v3998_v27 = vld [vmem:[#allocation11 + $0xcc] ss:$16 sps:$4 sm:$0xff]  }
  0x4d   :  { %315 = vmatpush1.bf16.msra.mxu0 %v3952_v12  ;;  %356 = vmatpush1.bf16.msra.mxu1 %v3954_v13  ;;  %5673 = vst [vmem:[#allocation38_spill] sm:$0xff] %v3992_v25  ;;  %5674 = vst [vmem:[#allocation39_spill] sm:$0xff] %v3996_v26  ;;  %v4000_v28 = vld [vmem:[#allocation11 + $0xc0] ss:$16 sps:$4 sm:$0xff]   ;;  %v4002_v29 = vld [vmem:[#allocation11 + $0xc8] ss:$16 sps:$4 sm:$0xff]  }
  0x4e   :  { %316 = vmatprep.subr.bf16.mxu0 %v3958_v14  ;;  %357 = vmatprep.subr.bf16.mxu1 %v3962_v15  ;;  %5675 = vst [vmem:[#allocation40_spill] sm:$0xff] %v3998_v27  ;;  %5676 = vst [vmem:[#allocation41_spill] sm:$0xff] %v4000_v28  ;;  %v4006_v30 = vld [vmem:[#allocation11 + $0xe4] ss:$16 sps:$4 sm:$0xff]   ;;  %v4010_v31 = vld [vmem:[#allocation11 + $0xec] ss:$16 sps:$4 sm:$0xff]  }
  0x4f   :  { %5677 = vst [vmem:[#allocation42_spill] sm:$0xff] %v4002_v29  ;;  %5678 = vst [vmem:[#allocation43_spill] sm:$0xff] %v4006_v30  ;;  %v4012_v32 = vld [vmem:[#allocation11 + $0xe0] ss:$16 sps:$4 sm:$0xff]   ;;  %v4014_v33 = vld [vmem:[#allocation11 + $0xe8] ss:$16 sps:$4 sm:$0xff]  }
  0x50   :  { %5679 = vst [vmem:[#allocation44_spill] sm:$0xff] %v4010_v31  ;;  %5680 = vst [vmem:[#allocation45_spill] sm:$0xff] %v4012_v32  ;;  %v4018_v34 = vld [vmem:[#allocation2] sm:$0xff]  ;;  %v4022_v35 = vld [vmem:[#allocation9 + $0x4] ss:$16 sps:$4 sm:$0xff]  }
  0x51   :  { %317 = vmatpush1.bf16.msra.mxu0 %v3964_v16  ;;  %358 = vmatpush1.bf16.msra.mxu1 %v3968_v17  ;;  %5681 = vst [vmem:[#allocation46_spill] sm:$0xff] %v4014_v33  ;;  %5682 = vst [vmem:[#allocation47_spill] sm:$0xff] %v4022_v35  ;;  %v4024_v36 = vld [vmem:[#allocation9 + $0xc] ss:$16 sps:$4 sm:$0xff]   ;;  %v149_v37 = vpack.c.bf16 %v4018_v34, %v4018_v34  ;;  %v4028_v38 = vld [vmem:[#allocation9] ss:$16 sps:$4 sm:$0xff]  }
  0x52   :  { %318 = vmatprep.subr.bf16.mxu0 %v3970_v18  ;;  %359 = vmatprep.subr.bf16.mxu1 %v3974_v19  ;;  %5683 = vst [vmem:[#allocation48_spill] sm:$0xff] %v4024_v36  ;;  %v4030_v39 = vld [vmem:[#allocation9 + $0x8] ss:$16 sps:$4 sm:$0xff]   ;;  %v4034_v40 = vld [vmem:[#allocation9 + $0x24] ss:$16 sps:$4 sm:$0xff]   ;;  %v4069_v50 = vld [vmem:[%s5443_s5] sm:$0xff] }
  0x53   :  { %v4038_v41 = vld [vmem:[#allocation9 + $0x2c] ss:$16 sps:$4 sm:$0xff]   ;;  %v4040_v42 = vld [vmem:[#allocation9 + $0x20] ss:$16 sps:$4 sm:$0xff]   ;;  %v4044_v43 = vld [vmem:[#allocation9 + $0x28] ss:$16 sps:$4 sm:$0xff]  }
  0x54   :  { %v4048_v44 = vld [vmem:[#allocation9 + $0x44] ss:$16 sps:$4 sm:$0xff]   ;;  %v4050_v45 = vld [vmem:[#allocation9 + $0x4c] ss:$16 sps:$4 sm:$0xff]   ;;  %v4054_v46 = vld [vmem:[#allocation9 + $0x40] ss:$16 sps:$4 sm:$0xff]  }
  0x55   :  { %319 = vmatpush1.bf16.msra.mxu0 %v3976_v20  ;;  %360 = vmatpush1.bf16.msra.mxu1 %v3978_v21  ;;  %v4056_v47 = vld [vmem:[#allocation9 + $0x48] ss:$16 sps:$4 sm:$0xff]   ;;  %v4060_v48 = vld [vmem:[#allocation9 + $0x64] ss:$16 sps:$4 sm:$0xff]   ;;  %v4064_v49 = vld [vmem:[#allocation9 + $0x6c] ss:$16 sps:$4 sm:$0xff]  }
  0x56   :  { %320 = vmatprep.subr.bf16.mxu0 %v3982_v22  ;;  %361 = vmatprep.subr.bf16.mxu1 %v3986_v23  ;;  %5684 = vst [vmem:[#allocation49_spill] sm:$0xff] %v4069_v50  ;;  %v4073_v51 = vld [vmem:[#allocation9 + $0x60] ss:$16 sps:$4 sm:$0xff]   ;;  %v4075_v52 = vld [vmem:[#allocation9 + $0x68] ss:$16 sps:$4 sm:$0xff]   ;;  %vm3296_vm0 = vcmp.gt.s32.totalorder %v4069_v50, 0 }
  0x57   :  { %vm3297_vm1 = vcmp.gt.s32.totalorder %v4069_v50, 1  ;;  %v4081_v53 = vld [vmem:[#allocation9 + $0x84] ss:$16 sps:$4 sm:$0xff]   ;;  %v4083_v54 = vld [vmem:[#allocation9 + $0x8c] ss:$16 sps:$4 sm:$0xff]   ;;  %v680_v55 = vsel %vm3296_vm0, 1, %v5461_v3 }
  0x58   :  { %682 = vperm.xlu0 %3323, %v680_v55   ;;  %v886_v56 = vsel %vm3297_vm1, 1, %v5461_v3  ;;  %v4089_v57 = vld [vmem:[#allocation9 + $0x80] ss:$16 sps:$4 sm:$0xff]   ;;  %v4091_v58 = vld [vmem:[#allocation9 + $0x88] ss:$16 sps:$4 sm:$0xff]   ;;  %vm3300_vm2 = vcmp.gt.s32.totalorder %v4069_v50, 4 }
  0x59   :  { %321 = vmatpush1.bf16.msra.mxu0 %v3990_v24  ;;  %362 = vmatpush1.bf16.msra.mxu1 %v3992_v25  ;;  %5685 = vst [vmem:[#allocation50_spill] sm:$0xff] %v4091_v58  ;;  %v4096_v59 = vld [vmem:[#allocation9 + $0xa4] ss:$16 sps:$4 sm:$0xff]   ;;  %v4098_v60 = vld [vmem:[#allocation9 + $0xac] ss:$16 sps:$4 sm:$0xff]   ;;  %v1504_v61 = vsel %vm3300_vm2, 1, %v5461_v3 }
  0x5a   :  { %322 = vmatprep.subr.bf16.mxu0 %v3996_v26  ;;  %363 = vmatprep.subr.bf16.mxu1 %v3998_v27  ;;  %5686 = vst [vmem:[#allocation51_spill] sm:$0xff] %v4096_v59  ;;  %5687 = vst [vmem:[#allocation52_spill] sm:$0xff] %v4098_v60  ;;  %v4103_v62 = vld [vmem:[#allocation9 + $0xa0] ss:$16 sps:$4 sm:$0xff]   ;;  %v4105_v63 = vld [vmem:[#allocation9 + $0xa8] ss:$16 sps:$4 sm:$0xff]  }
  0x5b   :  { %5688 = vst [vmem:[#allocation53_spill] sm:$0xff] %v4103_v62  ;;  %5689 = vst [vmem:[#allocation54_spill] sm:$0xff] %v4105_v63  ;;  %vm3302_vm3 = vcmp.gt.s32.totalorder %v4069_v50, 6  ;;  %v4110_v0 = vld [vmem:[#allocation9 + $0xc4] ss:$16 sps:$4 sm:$0xff]   ;;  %vm3304_vm4 = vcmp.gt.s32.totalorder %v4069_v50, 8 }
  0x5c   :  { %888 = vperm.xlu0 %3323, %v886_v56   ;;  %v1916_v55 = vsel %vm3302_vm3, 1, %v5461_v3  ;;  %v4117_v56 = vld [vmem:[#allocation9 + $0xc0] ss:$16 sps:$4 sm:$0xff]   ;;  %vm3306_vm5 = vcmp.gt.s32.totalorder %v4069_v50, 10  ;;  %vm3308_vm6 = vcmp.gt.s32.totalorder %v4069_v50, 12 }
  0x5d   :  { %323 = vmatpush1.bf16.msra.mxu0 %v4000_v28  ;;  %364 = vmatpush1.bf16.msra.mxu1 %v4002_v29 }
  0x5e   :  { %324 = vmatprep.subr.bf16.mxu0 %v4006_v30  ;;  %365 = vmatprep.subr.bf16.mxu1 %v4010_v31 }
  0x60   :  { %1506 = vperm.xlu0 %3323, %v1504_v61   ;;  %v2328_v61 = vsel %vm3304_vm4, 1, %v5461_v3 }
  0x61   :  { %325 = vmatpush1.bf16.msra.mxu0 %v4012_v32  ;;  %366 = vmatpush1.bf16.msra.mxu1 %v4014_v33 }
  0x62   :  { %552 = vmatprep.subr.bf16.mxu0 %v4022_v35  ;;  %593 = vmatprep.subr.bf16.mxu1 %v4024_v36 }
  0x64   :  { %343 = vmatmul.mubr.bf16.vlgmr.msra.gmra.mrb[0].mxu0 %v149_v37  ;;  %384 = vmatmul.mubr.bf16.vlgmr.msra.gmra.mrb[0].mxu1 %v149_v37  ;;  %v4112_v37 = vld [vmem:[#allocation9 + $0xcc] ss:$16 sps:$4 sm:$0xff]  }
  0x65   :  { %553 = vmatpush1.bf16.msra.mxu0 %v4028_v38  ;;  %594 = vmatpush1.bf16.msra.mxu1 %v4030_v39  ;;  %5690 = vst [vmem:[#allocation55_spill] sm:$0xff] %v4112_v37 }
  0x66   :  { %554 = vmatprep.subr.bf16.mxu0 %v4034_v40  ;;  %595 = vmatprep.subr.bf16.mxu1 %v4038_v41 }
  0x67   :  { %584 = vmatprep.mubr.bf16.mxu0 %v5461_v3  ;;  %625 = vmatprep.mubr.bf16.mxu1 %v5461_v3 }
  0x68   :  { %1918 = vperm.xlu0 %3323, %v1916_v55   ;;  %v147_v55 = vld [vmem:[#allocation6] sm:$0xf] }
  0x69   :  { %555 = vmatpush1.bf16.msra.mxu0 %v4040_v42  ;;  %596 = vmatpush1.bf16.msra.mxu1 %v4044_v43 }
  0x6a   :  { %556 = vmatprep.subr.bf16.mxu0 %v4048_v44  ;;  %597 = vmatprep.subr.bf16.mxu1 %v4050_v45 }
  0x6c   :  { %2330 = vperm.xlu0 %3323, %v2328_v61  }
  0x6d   :  { %557 = vmatpush1.bf16.msra.mxu0 %v4054_v46  ;;  %598 = vmatpush1.bf16.msra.mxu1 %v4056_v47 }
  0x6e   :  { %558 = vmatprep.subr.bf16.mxu0 %v4060_v48  ;;  %599 = vmatprep.subr.bf16.mxu1 %v4064_v49 }
  0x71   :  { %559 = vmatpush1.bf16.msra.mxu0 %v4073_v51  ;;  %600 = vmatpush1.bf16.msra.mxu1 %v4075_v52 }
  0x72   :  { %560 = vmatprep.subr.bf16.mxu0 %v4081_v53  ;;  %601 = vmatprep.subr.bf16.mxu1 %v4083_v54 }
  0x75   :  { %561 = vmatpush1.bf16.msra.mxu0 %v4089_v57  ;;  %602 = vmatpush1.bf16.msra.mxu1 %v4091_v58  ;;  %v4119_v58 = vld [vmem:[#allocation9 + $0xc8] ss:$16 sps:$4 sm:$0xff]  }
  0x76   :  { %562 = vmatprep.subr.bf16.mxu0 %v4096_v59  ;;  %603 = vmatprep.subr.bf16.mxu1 %v4098_v60  ;;  %v4124_v60 = vld [vmem:[#allocation9 + $0xe4] ss:$16 sps:$4 sm:$0xff]   ;;  %v4126_v59 = vld [vmem:[#allocation9 + $0xec] ss:$16 sps:$4 sm:$0xff]  }
  0x77   :  { %5691 = vst [vmem:[#allocation56_spill] sm:$0xff] %v4124_v60 }
  0x79   :  { %563 = vmatpush1.bf16.msra.mxu0 %v4103_v62  ;;  %604 = vmatpush1.bf16.msra.mxu1 %v4105_v63  ;;  %v4131_v63 = vld [vmem:[#allocation9 + $0xe0] ss:$16 sps:$4 sm:$0xff]   ;;  %v4133_v62 = vld [vmem:[#allocation9 + $0xe8] ss:$16 sps:$4 sm:$0xff]  }
  0x7a   :  { %564 = vmatprep.subr.bf16.mxu0 %v4110_v0  ;;  %605 = vmatprep.subr.bf16.mxu1 %v4112_v37  ;;  %v2740_v37 = vsel %vm3306_vm5, 1, %v5461_v3 }
  0x7b   :  { %2742 = vperm.xlu0 %3323, %v2740_v37  }
  0x7d   :  { %565 = vmatpush1.bf16.msra.mxu0 %v4117_v56  ;;  %606 = vmatpush1.bf16.msra.mxu1 %v4119_v58 }
  0x7e   :  { %566 = vmatprep.subr.bf16.mxu0 %v4124_v60  ;;  %607 = vmatprep.subr.bf16.mxu1 %v4126_v59  ;;  %v3152_v60 = vsel %vm3308_vm6, 1, %v5461_v3 }
  0x7f   :  { %3154 = vperm.xlu0 %3323, %v3152_v60  }
  0x81   :  { %567 = vmatpush1.bf16.msra.mxu0 %v4131_v63  ;;  %608 = vmatpush1.bf16.msra.mxu1 %v4133_v62 }
  0x82   :  { %697 = vmatprep.subr.bf16.mxu0 %v3922_v1  ;;  %738 = vmatprep.subr.bf16.mxu1 %v3924_v2 }
  0x84   :  { %585 = vmatmul.mubr.bf16.vlgmr.msra.gmra.mrb[4].mxu0 %v147_v55  ;;  %626 = vmatmul.mubr.bf16.vlgmr.msra.gmra.mrb[4].mxu1 %v147_v55 }
  0x85   :  { %698 = vmatpush1.bf16.msra.mxu0 %v3929_v4  ;;  %739 = vmatpush1.bf16.msra.mxu1 %v3931_v5 }
  0x86   :  { %699 = vmatprep.subr.bf16.mxu0 %v3935_v6  ;;  %740 = vmatprep.subr.bf16.mxu1 %v3940_v7 }
  0x87   :  { %729 = vmatprep.mubr.bf16.mxu0 %v5461_v3  ;;  %770 = vmatprep.mubr.bf16.mxu1 %v5461_v3 }
  0x89   :  { %700 = vmatpush1.bf16.msra.mxu0 %v3942_v8  ;;  %741 = vmatpush1.bf16.msra.mxu1 %v3945_v9 }
  0x8a   :  { %701 = vmatprep.subr.bf16.mxu0 %v3948_v10  ;;  %742 = vmatprep.subr.bf16.mxu1 %v3950_v11 }
  0x8d   :  { %702 = vmatpush1.bf16.msra.mxu0 %v3952_v12  ;;  %743 = vmatpush1.bf16.msra.mxu1 %v3954_v13 }
  0x8e   :  { %703 = vmatprep.subr.bf16.mxu0 %v3958_v14  ;;  %744 = vmatprep.subr.bf16.mxu1 %v3962_v15 }
  0x91   :  { %704 = vmatpush1.bf16.msra.mxu0 %v3964_v16  ;;  %745 = vmatpush1.bf16.msra.mxu1 %v3968_v17 }
  0x92   :  { %705 = vmatprep.subr.bf16.mxu0 %v3970_v18  ;;  %746 = vmatprep.subr.bf16.mxu1 %v3974_v19 }
  0x95   :  { %706 = vmatpush1.bf16.msra.mxu0 %v3976_v20  ;;  %747 = vmatpush1.bf16.msra.mxu1 %v3978_v21 }
  0x96   :  { %707 = vmatprep.subr.bf16.mxu0 %v3982_v22  ;;  %748 = vmatprep.subr.bf16.mxu1 %v3986_v23 }
  0x99   :  { %708 = vmatpush1.bf16.msra.mxu0 %v3990_v24  ;;  %749 = vmatpush1.bf16.msra.mxu1 %v3992_v25 }
  0x9a   :  { %709 = vmatprep.subr.bf16.mxu0 %v3996_v26  ;;  %750 = vmatprep.subr.bf16.mxu1 %v3998_v27  ;;  %v635_v27 = vlaneseq }
  0x9d   :  { %710 = vmatpush1.bf16.msra.mxu0 %v4000_v28  ;;  %751 = vmatpush1.bf16.msra.mxu1 %v4002_v29 }
  0x9e   :  { %711 = vmatprep.subr.bf16.mxu0 %v4006_v30  ;;  %752 = vmatprep.subr.bf16.mxu1 %v4010_v31  ;;  %v636_v30 = vshrl.u32 %v635_v27, 7 }
  0xa0   :  { %v637_v26 = vsub.s32 0, %v636_v30  ;;  %v649_v18 = vsub.s32 3, %v636_v30 }
  0xa1   :  { %712 = vmatpush1.bf16.msra.mxu0 %v4012_v32  ;;  %753 = vmatpush1.bf16.msra.mxu1 %v4014_v33  ;;  %v82_v32 = vld [vmem:[%s5442_s4] sm:$0xf]  ;;  %v641_v33 = vsub.s32 1, %v636_v30 }
  0xa2   :  { %779 = vmatprep.subr.bf16.mxu0 %v4022_v35  ;;  %820 = vmatprep.subr.bf16.mxu1 %v4024_v36  ;;  %v4182_v31 = vrot.slane %v82_v32, %v637_v26  ;;  %v645_v35 = vsub.s32 2, %v636_v30 }
  0xa3   :  { %v4184_v24 = vrot.slane %v82_v32, %v641_v33 }
  0xa4   :  { %v4187_v19 = vrot.slane %v82_v32, %v645_v35 }
 0x137   :  { %v344_v60 = vpop.f32.mrb[0].mxu0  ;;  %v385_v37 = vpop.f32.mrb[0].mxu1 }
 0x138   :  { %v346_v61 = vpop.f32.mrb[1].mxu0  ;;  %v387_v55 = vpop.f32.mrb[1].mxu1 }
 0x139   :  { %v348_v3 = vpop.f32.mrb[2].mxu0  ;;  %v389_v50 = vpop.f32.mrb[2].mxu1 }
 0x13a   :  { %v349_v28 = vpop.f32.mrb[3].mxu0  ;;  %v390_v29 = vpop.f32.mrb[3].mxu1 }
 0x157   :  { %v586_v36 = vpop.f32.mrb[4].mxu0  ;;  %v627_v25 = vpop.f32.mrb[4].mxu1 }
 0x158   :  { %v587_v23 = vadd.f32 %v586_v36, %v344_v60  ;;  %v628_v3 = vadd.f32 %v627_v25, %v385_v37  ;;  %v588_v50 = vpop.f32.mrb[5].mxu0  ;;  %v629_v28 = vpop.f32.mrb[5].mxu1  ;;  %v4191_v36 = vrot.slane %v82_v32, %v649_v18 }
 0x159   :  { %v589_v29 = vadd.f32 %v588_v50, %v346_v61  ;;  %v630_v22 = vadd.f32 %v629_v28, %v387_v55  ;;  %v590_v27 = vpop.f32.mrb[6].mxu0  ;;  %v631_v21 = vpop.f32.mrb[6].mxu1  ;;  %v672_v61 = vld [vmem:[#allocation3] sm:$0xff] }
 0x15a   :  { %v655_v20 = vadd.f32 %v4182_v31, %v587_v23  ;;  %v591_v26 = vpop.f32.mrb[7].mxu0  ;;  %v632_v17 = vpop.f32.mrb[7].mxu1  ;;  %v657_v25 = vadd.f32 %v4187_v19, %v628_v3 }
 0x15b   :  { %v656_v16 = vadd.f32 %v4184_v24, %v589_v29  ;;  %v658_v21 = vadd.f32 %v4191_v36, %v630_v22  ;;  %v683_v50 = vpop.permute.xlu0 %682 }
 0x15c   :  { %v659_v15 = vmul.f32 0.5, %v655_v20  ;;  %vm684_vm7 = vcmp.eq.s32.totalorder %v683_v50, 1  ;;  %v5704_v50 = vld [vmem:[#allocation32_spill] sm:$0xff] }
 0x15d   :  { %v663_v33 = vmul.f32 0.5, %v656_v16  ;;  %v668_v60 = vmul.f32 0.5, %v658_v21  ;;  %v5692_v21 = vmov 0  }
 0x15e   :  { %3421 = vtanh.f32 %v659_v15 }
 0x15f   :  { %3423 = vtanh.f32 %v663_v33 }
 0x160   :  { %3425 = vtanh.f32 %v657_v25 }
 0x161   :  { %3427 = vtanh.f32 %v668_v60  ;;  %v5694_v60 = vld [vmem:[#allocation51_spill] sm:$0xff] }
 0x168   :  { %v3422_v23 = vpop.eup %3421 }
 0x169   :  { %v3424_v35 = vpop.eup %3423  ;;  %v661_v37 = vmul.f32 0.5, %v3422_v23  ;;  %v5695_v23 = vld [vmem:[#allocation52_spill] sm:$0xff] }
 0x16a   :  { %v665_v30 = vmul.f32 0.5, %v3424_v35  ;;  %v3426_v55 = vpop.eup %3425  ;;  %v5696_v35 = vld [vmem:[#allocation53_spill] sm:$0xff] }
 0x16b   :  { %v662_v17 = vadd.f32 0.5, %v661_v37  ;;  %v3428_v3 = vpop.eup %3427  ;;  %v5697_v37 = vld [vmem:[#allocation54_spill] sm:$0xff] }
 0x16c   :  { %v666_v20 = vadd.f32 0.5, %v665_v30  ;;  %v670_v22 = vmul.f32 0.5, %v3428_v3  ;;  %v5698_v30 = vld [vmem:[#allocation55_spill] sm:$0xff]  ;;  %v5706_v3 = vld [vmem:[#allocation34_spill] sm:$0xff] }
 0x16d   :  { %v674_v16 = vmul.f32 %v3426_v55, %v662_v17  ;;  %v5699_v17 = vld [vmem:[#allocation56_spill] sm:$0xff] }
 0x16e   :  { %v673_v15 = vmul.f32 %v672_v61, %v666_v20  ;;  %v671_v28 = vadd.f32 0.5, %v670_v22  ;;  %v5700_v55 = vld [vmem:[#allocation28_spill] sm:$0xff]  ;;  %v5701_v20 = vld [vmem:[#allocation29_spill] sm:$0xff]  ;;  %v5707_v22 = vld [vmem:[#allocation35_spill] sm:$0xff] }
 0x170   :  { %v675_v18 = vadd.f32 %v674_v16, %v673_v15  ;;  %v5702_v16 = vld [vmem:[#allocation30_spill] sm:$0xff]  ;;  %v5703_v15 = vld [vmem:[#allocation31_spill] sm:$0xff] }
 0x172   :  { %3429 = vtanh.f32 %v675_v18  ;;  %v4194_v32 = vsel %vm684_vm7, %v675_v18, %v672_v61  ;;  %v694_v61 = vld [vmem:[#allocation6 + $0x4] sm:$0xf]  ;;  %v5705_v18 = vld [vmem:[#allocation33_spill] sm:$0xff] }
 0x17c   :  { %v3430_v29 = vpop.eup %3429 }
 0x17d   :  { %v677_v27 = vmul.f32 %v3430_v29, %v671_v28  ;;  %v5708_v28 = vld [vmem:[#allocation36_spill] sm:$0xff]  ;;  %v5709_v29 = vld [vmem:[#allocation37_spill] sm:$0xff] }
 0x17f   :  { %v4197_v26 = vsel %vm684_vm7, %v677_v27, %v4018_v34  ;;  %v690_v33 = vsel %vm684_vm7, %v677_v27, 0.0  ;;  %v5693_v34 = vld [vmem:[#allocation50_spill] sm:$0xff] }
 0x180   :  { %691 = vst [vmem:[#allocation12] sm:$0xff] %v690_v33  ;;  %v696_v25 = vpack.c.bf16 %v4197_v26, %v4197_v26  ;;  %v5710_v27 = vld [vmem:[#allocation38_spill] sm:$0xff]  ;;  %v5711_v33 = vld [vmem:[#allocation39_spill] sm:$0xff] }
 0x182   :  { %730 = vmatmul.mubr.bf16.vlgmr.msra.gmra.mrb[8].mxu0 %v696_v25  ;;  %771 = vmatmul.mubr.bf16.vlgmr.msra.gmra.mrb[8].mxu1 %v696_v25  ;;  %v5712_v25 = vld [vmem:[#allocation40_spill] sm:$0xff] }
 0x183   :  { %780 = vmatpush1.bf16.msra.mxu0 %v4028_v38  ;;  %821 = vmatpush1.bf16.msra.mxu1 %v4030_v39 }
 0x184   :  { %781 = vmatprep.subr.bf16.mxu0 %v4034_v40  ;;  %822 = vmatprep.subr.bf16.mxu1 %v4038_v41 }
 0x185   :  { %811 = vmatprep.mubr.bf16.mxu0 %v5692_v21  ;;  %852 = vmatprep.mubr.bf16.mxu1 %v5692_v21 }
 0x187   :  { %782 = vmatpush1.bf16.msra.mxu0 %v4040_v42  ;;  %823 = vmatpush1.bf16.msra.mxu1 %v4044_v43 }
 0x188   :  { %783 = vmatprep.subr.bf16.mxu0 %v4048_v44  ;;  %824 = vmatprep.subr.bf16.mxu1 %v4050_v45 }
 0x18b   :  { %784 = vmatpush1.bf16.msra.mxu0 %v4054_v46  ;;  %825 = vmatpush1.bf16.msra.mxu1 %v4056_v47 }
 0x18c   :  { %785 = vmatprep.subr.bf16.mxu0 %v4060_v48  ;;  %826 = vmatprep.subr.bf16.mxu1 %v4064_v49 }
 0x18f   :  { %786 = vmatpush1.bf16.msra.mxu0 %v4073_v51  ;;  %827 = vmatpush1.bf16.msra.mxu1 %v4075_v52 }
 0x190   :  { %787 = vmatprep.subr.bf16.mxu0 %v4081_v53  ;;  %828 = vmatprep.subr.bf16.mxu1 %v4083_v54 }
 0x193   :  { %788 = vmatpush1.bf16.msra.mxu0 %v4089_v57  ;;  %829 = vmatpush1.bf16.msra.mxu1 %v5693_v34 }
 0x194   :  { %789 = vmatprep.subr.bf16.mxu0 %v5694_v60  ;;  %830 = vmatprep.subr.bf16.mxu1 %v5695_v23 }
 0x197   :  { %790 = vmatpush1.bf16.msra.mxu0 %v5696_v35  ;;  %831 = vmatpush1.bf16.msra.mxu1 %v5697_v37 }
 0x198   :  { %791 = vmatprep.subr.bf16.mxu0 %v4110_v0  ;;  %832 = vmatprep.subr.bf16.mxu1 %v5698_v30 }
 0x19b   :  { %792 = vmatpush1.bf16.msra.mxu0 %v4117_v56  ;;  %833 = vmatpush1.bf16.msra.mxu1 %v4119_v58 }
 0x19c   :  { %793 = vmatprep.subr.bf16.mxu0 %v5699_v17  ;;  %834 = vmatprep.subr.bf16.mxu1 %v4126_v59 }
 0x19f   :  { %794 = vmatpush1.bf16.msra.mxu0 %v4131_v63  ;;  %835 = vmatpush1.bf16.msra.mxu1 %v4133_v62 }
 0x1a0   :  { %903 = vmatprep.subr.bf16.mxu0 %v3922_v1  ;;  %944 = vmatprep.subr.bf16.mxu1 %v3924_v2 }
 0x1a2   :  { %812 = vmatmul.mubr.bf16.vlgmr.msra.gmra.mrb[12].mxu0 %v694_v61  ;;  %853 = vmatmul.mubr.bf16.vlgmr.msra.gmra.mrb[12].mxu1 %v694_v61  ;;  %v5713_v61 = vld [vmem:[#allocation41_spill] sm:$0xff] }
 0x1a3   :  { %904 = vmatpush1.bf16.msra.mxu0 %v3929_v4  ;;  %945 = vmatpush1.bf16.msra.mxu1 %v3931_v5 }
 0x1a4   :  { %905 = vmatprep.subr.bf16.mxu0 %v3935_v6  ;;  %946 = vmatprep.subr.bf16.mxu1 %v3940_v7 }
 0x1a5   :  { %935 = vmatprep.mubr.bf16.mxu0 %v5692_v21  ;;  %976 = vmatprep.mubr.bf16.mxu1 %v5692_v21 }
 0x1a7   :  { %906 = vmatpush1.bf16.msra.mxu0 %v3942_v8  ;;  %947 = vmatpush1.bf16.msra.mxu1 %v3945_v9 }
 0x1a8   :  { %907 = vmatprep.subr.bf16.mxu0 %v3948_v10  ;;  %948 = vmatprep.subr.bf16.mxu1 %v3950_v11 }
 0x1ab   :  { %908 = vmatpush1.bf16.msra.mxu0 %v3952_v12  ;;  %949 = vmatpush1.bf16.msra.mxu1 %v3954_v13 }
 0x1ac   :  { %909 = vmatprep.subr.bf16.mxu0 %v3958_v14  ;;  %950 = vmatprep.subr.bf16.mxu1 %v5700_v55 }
 0x1af   :  { %910 = vmatpush1.bf16.msra.mxu0 %v5701_v20  ;;  %951 = vmatpush1.bf16.msra.mxu1 %v5702_v16 }
 0x1b0   :  { %911 = vmatprep.subr.bf16.mxu0 %v5703_v15  ;;  %952 = vmatprep.subr.bf16.mxu1 %v5704_v50  ;;  %v5714_v15 = vld [vmem:[#allocation42_spill] sm:$0xff]  ;;  %v5715_v50 = vld [vmem:[#allocation43_spill] sm:$0xff] }
 0x1b3   :  { %912 = vmatpush1.bf16.msra.mxu0 %v5705_v18  ;;  %953 = vmatpush1.bf16.msra.mxu1 %v5706_v3  ;;  %v5716_v18 = vld [vmem:[#allocation44_spill] sm:$0xff]  ;;  %v5717_v3 = vld [vmem:[#allocation45_spill] sm:$0xff] }
 0x1b4   :  { %913 = vmatprep.subr.bf16.mxu0 %v5707_v22  ;;  %954 = vmatprep.subr.bf16.mxu1 %v5708_v28  ;;  %v5718_v22 = vld [vmem:[#allocation46_spill] sm:$0xff]  ;;  %v5719_v28 = vld [vmem:[#allocation47_spill] sm:$0xff] }
 0x1b7   :  { %914 = vmatpush1.bf16.msra.mxu0 %v5709_v29  ;;  %955 = vmatpush1.bf16.msra.mxu1 %v5710_v27  ;;  %v5720_v29 = vld [vmem:[#allocation48_spill] sm:$0xff]  ;;  %v5721_v27 = vld [vmem:[#allocation49_spill] sm:$0xff] }
 0x1b8   :  { %915 = vmatprep.subr.bf16.mxu0 %v5711_v33  ;;  %956 = vmatprep.subr.bf16.mxu1 %v5712_v25  ;;  %vm3298_vm8 = vcmp.gt.s32.totalorder %v5721_v27, 2  ;;  %vm3299_vm9 = vcmp.gt.s32.totalorder %v5721_v27, 3  ;;  %vm3301_vm10 = vcmp.gt.s32.totalorder %v5721_v27, 5  ;;  %vm3303_vm11 = vcmp.gt.s32.totalorder %v5721_v27, 7 }
 0x1b9   :  { %vm3305_vm12 = vcmp.gt.s32.totalorder %v5721_v27, 9  ;;  %vm3307_vm13 = vcmp.gt.s32.totalorder %v5721_v27, 11 }
 0x1bb   :  { %916 = vmatpush1.bf16.msra.mxu0 %v5713_v61  ;;  %957 = vmatpush1.bf16.msra.mxu1 %v5714_v15  ;;  %v1092_v61 = vsel %vm3298_vm8, 1, %v5692_v21  ;;  %v1298_v15 = vsel %vm3299_vm9, 1, %v5692_v21 }
 0x1bc   :  { %917 = vmatprep.subr.bf16.mxu0 %v5715_v50  ;;  %958 = vmatprep.subr.bf16.mxu1 %v5716_v18 }
 0x1bd   :  { %1094 = vperm.xlu1 %3324, %v1092_v61   ;;  %v2946_v61 = vsel %vm3307_vm13, 1, %v5692_v21 }
 0x1bf   :  { %918 = vmatpush1.bf16.msra.mxu0 %v5717_v3  ;;  %959 = vmatpush1.bf16.msra.mxu1 %v5718_v22  ;;  %v1710_v3 = vsel %vm3301_vm10, 1, %v5692_v21 }
 0x1c0   :  { %985 = vmatprep.subr.bf16.mxu0 %v5719_v28  ;;  %1026 = vmatprep.subr.bf16.mxu1 %v5720_v29  ;;  %v2122_v28 = vsel %vm3303_vm11, 1, %v5692_v21  ;;  %v2534_v29 = vsel %vm3305_vm12, 1, %v5692_v21 }
 0x1c1   :  { %1300 = vperm.xlu1 %3324, %v1298_v15  }
 0x1c5   :  { %1712 = vperm.xlu1 %3324, %v1710_v3  }
 0x1c9   :  { %2124 = vperm.xlu1 %3324, %v2122_v28  }
 0x1cd   :  { %2536 = vperm.xlu1 %3324, %v2534_v29  }
 0x1d1   :  { %2948 = vperm.xlu1 %3324, %v2946_v61  }
 0x255   :  { %v731_v22 = vpop.f32.mrb[8].mxu0  ;;  %v772_v18 = vpop.f32.mrb[8].mxu1 }
 0x256   :  { %v733_v15 = vpop.f32.mrb[9].mxu0  ;;  %v774_v50 = vpop.f32.mrb[9].mxu1 }
 0x257   :  { %v735_v25 = vpop.f32.mrb[10].mxu0  ;;  %v776_v33 = vpop.f32.mrb[10].mxu1 }
 0x258   :  { %v736_v3 = vpop.f32.mrb[11].mxu0  ;;  %v777_v16 = vpop.f32.mrb[11].mxu1 }
 0x275   :  { %v813_v20 = vpop.f32.mrb[12].mxu0  ;;  %v854_v55 = vpop.f32.mrb[12].mxu1 }
 0x276   :  { %v814_v14 = vadd.f32 %v813_v20, %v731_v22  ;;  %v855_v28 = vadd.f32 %v854_v55, %v772_v18  ;;  %v815_v13 = vpop.f32.mrb[13].mxu0  ;;  %v856_v12 = vpop.f32.mrb[13].mxu1 }
 0x277   :  { %v816_v11 = vadd.f32 %v815_v13, %v733_v15  ;;  %v857_v27 = vadd.f32 %v856_v12, %v774_v50  ;;  %v817_v29 = vpop.f32.mrb[14].mxu0  ;;  %v858_v10 = vpop.f32.mrb[14].mxu1 }
 0x278   :  { %v861_v9 = vadd.f32 %v814_v14, %v4182_v31  ;;  %v818_v8 = vpop.f32.mrb[15].mxu0  ;;  %v859_v7 = vpop.f32.mrb[15].mxu1  ;;  %v863_v16 = vadd.f32 %v855_v28, %v4187_v19 }
 0x279   :  { %v862_v61 = vadd.f32 %v816_v11, %v4184_v24  ;;  %v864_v55 = vadd.f32 %v857_v27, %v4191_v36  ;;  %v889_v11 = vpop.permute.xlu0 %888 }
 0x27a   :  { %v865_v25 = vmul.f32 0.5, %v861_v9  ;;  %vm890_vm14 = vcmp.eq.s32.totalorder %v889_v11, 1  ;;  %v5739_v11 = vld [vmem:[#allocation37_spill] sm:$0xff] }
 0x27b   :  { %v869_v33 = vmul.f32 0.5, %v862_v61  ;;  %v874_v20 = vmul.f32 0.5, %v864_v55  ;;  %v5723_v55 = vld [vmem:[#allocation21_spill] sm:$0xff] }
 0x27c   :  { %3431 = vtanh.f32 %v865_v25 }
 0x27d   :  { %3433 = vtanh.f32 %v869_v33 }
 0x27e   :  { %3435 = vtanh.f32 %v863_v16 }
 0x27f   :  { %3437 = vtanh.f32 %v874_v20  ;;  %v5724_v20 = vld [vmem:[#allocation22_spill] sm:$0xff] }
 0x286   :  { %v3432_v13 = vpop.eup %3431 }
 0x287   :  { %v3434_v12 = vpop.eup %3433  ;;  %v867_v50 = vmul.f32 0.5, %v3432_v13  ;;  %v5727_v13 = vld [vmem:[#allocation25_spill] sm:$0xff] }
 0x288   :  { %v871_v10 = vmul.f32 0.5, %v3434_v12  ;;  %v3436_v8 = vpop.eup %3435  ;;  %v5731_v12 = vld [vmem:[#allocation29_spill] sm:$0xff] }
 0x289   :  { %v868_v14 = vadd.f32 0.5, %v867_v50  ;;  %v3438_v3 = vpop.eup %3437  ;;  %v5732_v50 = vld [vmem:[#allocation30_spill] sm:$0xff] }
 0x28a   :  { %v872_v7 = vadd.f32 0.5, %v871_v10  ;;  %v876_v28 = vmul.f32 0.5, %v3438_v3  ;;  %v5733_v10 = vld [vmem:[#allocation31_spill] sm:$0xff] }
 0x28b   :  { %v880_v18 = vmul.f32 %v3436_v8, %v868_v14  ;;  %v5734_v14 = vld [vmem:[#allocation32_spill] sm:$0xff]  ;;  %v5735_v8 = vld [vmem:[#allocation33_spill] sm:$0xff]  ;;  %v5741_v3 = vld [vmem:[#allocation39_spill] sm:$0xff] }
 0x28c   :  { %v879_v9 = vmul.f32 %v872_v7, %v4194_v32  ;;  %v877_v27 = vadd.f32 0.5, %v876_v28  ;;  %v5736_v7 = vld [vmem:[#allocation34_spill] sm:$0xff]  ;;  %v5742_v28 = vld [vmem:[#allocation40_spill] sm:$0xff] }
 0x28e   :  { %v881_v22 = vadd.f32 %v880_v18, %v879_v9  ;;  %v5737_v18 = vld [vmem:[#allocation35_spill] sm:$0xff]  ;;  %v5738_v9 = vld [vmem:[#allocation36_spill] sm:$0xff] }
 0x290   :  { %3439 = vtanh.f32 %v881_v22  ;;  %v4287_v15 = vsel %vm890_vm14, %v881_v22, %v4194_v32  ;;  %v900_v32 = vld [vmem:[#allocation6 + $0x8] sm:$0xf]  ;;  %v5740_v22 = vld [vmem:[#allocation38_spill] sm:$0xff] }
 0x29a   :  { %v3440_v29 = vpop.eup %3439 }
 0x29b   :  { %v883_v61 = vmul.f32 %v3440_v29, %v877_v27  ;;  %v5743_v27 = vld [vmem:[#allocation41_spill] sm:$0xff]  ;;  %v5744_v29 = vld [vmem:[#allocation42_spill] sm:$0xff] }
 0x29d   :  { %v4290_v25 = vsel %vm890_vm14, %v883_v61, %v4197_v26  ;;  %v896_v33 = vsel %vm890_vm14, %v883_v61, 0.0  ;;  %v5722_v26 = vld [vmem:[#allocation20_spill] sm:$0xff]  ;;  %v5745_v61 = vld [vmem:[#allocation43_spill] sm:$0xff] }
 0x29e   :  { %897 = vst [vmem:[#allocation12 + $0x8] sm:$0xff] %v896_v33  ;;  %v902_v16 = vpack.c.bf16 %v4290_v25, %v4290_v25  ;;  %v5746_v33 = vld [vmem:[#allocation44_spill] sm:$0xff] }
 0x2a0   :  { %936 = vmatmul.mubr.bf16.vlgmr.msra.gmra.mrb[16].mxu0 %v902_v16  ;;  %977 = vmatmul.mubr.bf16.vlgmr.msra.gmra.mrb[16].mxu1 %v902_v16  ;;  %v5747_v16 = vld [vmem:[#allocation45_spill] sm:$0xff] }
 0x2a1   :  { %986 = vmatpush1.bf16.msra.mxu0 %v4028_v38  ;;  %1027 = vmatpush1.bf16.msra.mxu1 %v4030_v39 }
 0x2a2   :  { %987 = vmatprep.subr.bf16.mxu0 %v4034_v40  ;;  %1028 = vmatprep.subr.bf16.mxu1 %v4038_v41 }
 0x2a3   :  { %1017 = vmatprep.mubr.bf16.mxu0 %v5692_v21  ;;  %1058 = vmatprep.mubr.bf16.mxu1 %v5692_v21 }
 0x2a5   :  { %988 = vmatpush1.bf16.msra.mxu0 %v4040_v42  ;;  %1029 = vmatpush1.bf16.msra.mxu1 %v4044_v43 }
 0x2a6   :  { %989 = vmatprep.subr.bf16.mxu0 %v4048_v44  ;;  %1030 = vmatprep.subr.bf16.mxu1 %v4050_v45 }
 0x2a9   :  { %990 = vmatpush1.bf16.msra.mxu0 %v4054_v46  ;;  %1031 = vmatpush1.bf16.msra.mxu1 %v4056_v47 }
 0x2aa   :  { %991 = vmatprep.subr.bf16.mxu0 %v4060_v48  ;;  %1032 = vmatprep.subr.bf16.mxu1 %v4064_v49 }
 0x2ad   :  { %992 = vmatpush1.bf16.msra.mxu0 %v4073_v51  ;;  %1033 = vmatpush1.bf16.msra.mxu1 %v4075_v52 }
 0x2ae   :  { %993 = vmatprep.subr.bf16.mxu0 %v4081_v53  ;;  %1034 = vmatprep.subr.bf16.mxu1 %v4083_v54 }
 0x2b1   :  { %994 = vmatpush1.bf16.msra.mxu0 %v4089_v57  ;;  %1035 = vmatpush1.bf16.msra.mxu1 %v5693_v34 }
 0x2b2   :  { %995 = vmatprep.subr.bf16.mxu0 %v5694_v60  ;;  %1036 = vmatprep.subr.bf16.mxu1 %v5695_v23 }
 0x2b5   :  { %996 = vmatpush1.bf16.msra.mxu0 %v5696_v35  ;;  %1037 = vmatpush1.bf16.msra.mxu1 %v5697_v37 }
 0x2b6   :  { %997 = vmatprep.subr.bf16.mxu0 %v4110_v0  ;;  %1038 = vmatprep.subr.bf16.mxu1 %v5698_v30 }
 0x2b9   :  { %998 = vmatpush1.bf16.msra.mxu0 %v4117_v56  ;;  %1039 = vmatpush1.bf16.msra.mxu1 %v4119_v58 }
 0x2ba   :  { %999 = vmatprep.subr.bf16.mxu0 %v5699_v17  ;;  %1040 = vmatprep.subr.bf16.mxu1 %v4126_v59 }
 0x2bd   :  { %1000 = vmatpush1.bf16.msra.mxu0 %v4131_v63  ;;  %1041 = vmatpush1.bf16.msra.mxu1 %v4133_v62 }
 0x2be   :  { %1109 = vmatprep.subr.bf16.mxu0 %v3922_v1  ;;  %1150 = vmatprep.subr.bf16.mxu1 %v3924_v2  ;;  %v5725_v1 = vld [vmem:[#allocation23_spill] sm:$0xff]  ;;  %v5726_v2 = vld [vmem:[#allocation24_spill] sm:$0xff] }
 0x2c0   :  { %1018 = vmatmul.mubr.bf16.vlgmr.msra.gmra.mrb[20].mxu0 %v900_v32  ;;  %1059 = vmatmul.mubr.bf16.vlgmr.msra.gmra.mrb[20].mxu1 %v900_v32  ;;  %v5748_v32 = vld [vmem:[#allocation46_spill] sm:$0xff] }
 0x2c1   :  { %1110 = vmatpush1.bf16.msra.mxu0 %v3929_v4  ;;  %1151 = vmatpush1.bf16.msra.mxu1 %v3931_v5  ;;  %v5728_v4 = vld [vmem:[#allocation26_spill] sm:$0xff]  ;;  %v5729_v5 = vld [vmem:[#allocation27_spill] sm:$0xff] }
 0x2c2   :  { %1111 = vmatprep.subr.bf16.mxu0 %v3935_v6  ;;  %1152 = vmatprep.subr.bf16.mxu1 %v5722_v26  ;;  %v5730_v6 = vld [vmem:[#allocation28_spill] sm:$0xff]  ;;  %v5749_v26 = vld [vmem:[#allocation47_spill] sm:$0xff] }
 0x2c3   :  { %1141 = vmatprep.mubr.bf16.mxu0 %v5692_v21  ;;  %1182 = vmatprep.mubr.bf16.mxu1 %v5692_v21 }
 0x2c5   :  { %1112 = vmatpush1.bf16.msra.mxu0 %v5723_v55  ;;  %1153 = vmatpush1.bf16.msra.mxu1 %v5724_v20  ;;  %v5750_v55 = vld [vmem:[#allocation48_spill] sm:$0xff] }
 0x2c6   :  { %1113 = vmatprep.subr.bf16.mxu0 %v5725_v1  ;;  %1154 = vmatprep.subr.bf16.mxu1 %v5726_v2 }
 0x2c9   :  { %1114 = vmatpush1.bf16.msra.mxu0 %v5727_v13  ;;  %1155 = vmatpush1.bf16.msra.mxu1 %v5728_v4 }
 0x2ca   :  { %1115 = vmatprep.subr.bf16.mxu0 %v5729_v5  ;;  %1156 = vmatprep.subr.bf16.mxu1 %v5730_v6 }
 0x2cd   :  { %1116 = vmatpush1.bf16.msra.mxu0 %v5731_v12  ;;  %1157 = vmatpush1.bf16.msra.mxu1 %v5732_v50 }
 0x2ce   :  { %1117 = vmatprep.subr.bf16.mxu0 %v5733_v10  ;;  %1158 = vmatprep.subr.bf16.mxu1 %v5734_v14 }
 0x2d1   :  { %1118 = vmatpush1.bf16.msra.mxu0 %v5735_v8  ;;  %1159 = vmatpush1.bf16.msra.mxu1 %v5736_v7 }
 0x2d2   :  { %1119 = vmatprep.subr.bf16.mxu0 %v5737_v18  ;;  %1160 = vmatprep.subr.bf16.mxu1 %v5738_v9 }
 0x2d5   :  { %1120 = vmatpush1.bf16.msra.mxu0 %v5739_v11  ;;  %1161 = vmatpush1.bf16.msra.mxu1 %v5740_v22 }
 0x2d6   :  { %1121 = vmatprep.subr.bf16.mxu0 %v5741_v3  ;;  %1162 = vmatprep.subr.bf16.mxu1 %v5742_v28 }
 0x2d9   :  { %1122 = vmatpush1.bf16.msra.mxu0 %v5743_v27  ;;  %1163 = vmatpush1.bf16.msra.mxu1 %v5744_v29 }
 0x2da   :  { %1123 = vmatprep.subr.bf16.mxu0 %v5745_v61  ;;  %1164 = vmatprep.subr.bf16.mxu1 %v5746_v33 }
 0x2dd   :  { %1124 = vmatpush1.bf16.msra.mxu0 %v5747_v16  ;;  %1165 = vmatpush1.bf16.msra.mxu1 %v5748_v32 }
 0x2de   :  { %1191 = vmatprep.subr.bf16.mxu0 %v5749_v26  ;;  %1232 = vmatprep.subr.bf16.mxu1 %v5750_v55 }
 0x373   :  { %v937_v20 = vpop.f32.mrb[16].mxu0  ;;  %v978_v1 = vpop.f32.mrb[16].mxu1 }
 0x374   :  { %v939_v2 = vpop.f32.mrb[17].mxu0  ;;  %v980_v13 = vpop.f32.mrb[17].mxu1 }
 0x375   :  { %v941_v4 = vpop.f32.mrb[18].mxu0  ;;  %v982_v5 = vpop.f32.mrb[18].mxu1 }
 0x376   :  { %v942_v6 = vpop.f32.mrb[19].mxu0  ;;  %v983_v12 = vpop.f32.mrb[19].mxu1 }
 0x393   :  { %v1019_v50 = vpop.f32.mrb[20].mxu0  ;;  %v1060_v10 = vpop.f32.mrb[20].mxu1 }
 0x394   :  { %v1020_v14 = vadd.f32 %v1019_v50, %v937_v20  ;;  %v1061_v8 = vadd.f32 %v1060_v10, %v978_v1  ;;  %v1021_v7 = vpop.f32.mrb[21].mxu0  ;;  %v1062_v18 = vpop.f32.mrb[21].mxu1 }
 0x395   :  { %v1022_v9 = vadd.f32 %v1021_v7, %v939_v2  ;;  %v1063_v11 = vadd.f32 %v1062_v18, %v980_v13  ;;  %v1023_v22 = vpop.f32.mrb[22].mxu0  ;;  %v1064_v3 = vpop.f32.mrb[22].mxu1 }
 0x396   :  { %v1067_v28 = vadd.f32 %v1020_v14, %v4182_v31  ;;  %v1024_v27 = vpop.f32.mrb[23].mxu0  ;;  %v1065_v29 = vpop.f32.mrb[23].mxu1  ;;  %v1069_v32 = vadd.f32 %v1061_v8, %v4187_v19 }
 0x397   :  { %v1068_v61 = vadd.f32 %v1022_v9, %v4184_v24  ;;  %v1070_v26 = vadd.f32 %v1063_v11, %v4191_v36  ;;  %v1095_v10 = vpop.permute.xlu1 %1094  ;;  %v4502_v29 = vld [vmem:[#allocation11 + $0xe8] ss:$16 sps:$4 sm:$0xff]  }
 0x398   :  { %v1071_v33 = vmul.f32 0.5, %v1067_v28  ;;  %vm1096_vm15 = vcmp.eq.s32.totalorder %v1095_v10, 1  ;;  %5777 = vst [vmem:[#allocation38_spill] sm:$0xff] %v4502_v29 }
 0x399   :  { %v1075_v16 = vmul.f32 0.5, %v1068_v61  ;;  %v1080_v55 = vmul.f32 0.5, %v1070_v26  ;;  %v4505_v61 = vld [vmem:[#allocation9 + $0x4] ss:$16 sps:$4 sm:$0xff]  }
 0x39a   :  { %3441 = vtanh.f32 %v1071_v33  ;;  %5778 = vst [vmem:[#allocation39_spill] sm:$0xff] %v4505_v61  ;;  %v4508_v33 = vld [vmem:[#allocation9 + $0xc] ss:$16 sps:$4 sm:$0xff]  }
 0x39b   :  { %3443 = vtanh.f32 %v1075_v16  ;;  %5779 = vst [vmem:[#allocation40_spill] sm:$0xff] %v4508_v33 }
 0x39c   :  { %3445 = vtanh.f32 %v1069_v32 }
 0x39d   :  { %3447 = vtanh.f32 %v1080_v55 }
 0x3a4   :  { %v3442_v20 = vpop.eup %3441 }
 0x3a5   :  { %v3444_v1 = vpop.eup %3443  ;;  %v1073_v2 = vmul.f32 0.5, %v3442_v20 }
 0x3a6   :  { %v1077_v13 = vmul.f32 0.5, %v3444_v1  ;;  %v3446_v5 = vpop.eup %3445 }
 0x3a7   :  { %v1074_v4 = vadd.f32 0.5, %v1073_v2  ;;  %v3448_v7 = vpop.eup %3447 }
 0x3a8   :  { %v1078_v6 = vadd.f32 0.5, %v1077_v13  ;;  %v1082_v18 = vmul.f32 0.5, %v3448_v7 }
 0x3a9   :  { %v1086_v12 = vmul.f32 %v3446_v5, %v1074_v4 }
 0x3aa   :  { %v1085_v50 = vmul.f32 %v1078_v6, %v4287_v15  ;;  %v1083_v9 = vadd.f32 0.5, %v1082_v18 }
 0x3ac   :  { %v1087_v14 = vadd.f32 %v1086_v12, %v1085_v50 }
 0x3ae   :  { %3449 = vtanh.f32 %v1087_v14  ;;  %v4368_v8 = vsel %vm1096_vm15, %v1087_v14, %v4287_v15  ;;  %v4496_v15 = vld [vmem:[#allocation11 + $0xec] ss:$16 sps:$4 sm:$0xff]  }
 0x3af   :  { %5775 = vst [vmem:[#allocation36_spill] sm:$0xff] %v4496_v15 }
 0x3b8   :  { %v3450_v11 = vpop.eup %3449 }
 0x3b9   :  { %v1089_v22 = vmul.f32 %v3450_v11, %v1083_v9 }
 0x3bb   :  { %v4371_v3 = vsel %vm1096_vm15, %v1089_v22, %v4290_v25  ;;  %v1102_v28 = vsel %vm1096_vm15, %v1089_v22, 0.0  ;;  %v4499_v25 = vld [vmem:[#allocation11 + $0xe0] ss:$16 sps:$4 sm:$0xff]  }
 0x3bc   :  { %1103 = vst [vmem:[#allocation12 + $0x10] sm:$0xff] %v1102_v28  ;;  %v1108_v27 = vpack.c.bf16 %v4371_v3, %v4371_v3  ;;  %5776 = vst [vmem:[#allocation37_spill] sm:$0xff] %v4499_v25 }
 0x3be   :  { %1142 = vmatmul.mubr.bf16.vlgmr.msra.gmra.mrb[24].mxu0 %v1108_v27  ;;  %1183 = vmatmul.mubr.bf16.vlgmr.msra.gmra.mrb[24].mxu1 %v1108_v27 }
 0x3bf   :  { %1192 = vmatpush1.bf16.msra.mxu0 %v4028_v38  ;;  %1233 = vmatpush1.bf16.msra.mxu1 %v4030_v39  ;;  %v1106_v38 = vld [vmem:[#allocation6 + $0xc] sm:$0xf]  ;;  %v4407_v39 = vld [vmem:[#allocation11 + $0x4] ss:$16 sps:$4 sm:$0xff]  }
 0x3c0   :  { %1193 = vmatprep.subr.bf16.mxu0 %v4034_v40  ;;  %1234 = vmatprep.subr.bf16.mxu1 %v4038_v41  ;;  %v4410_v40 = vld [vmem:[#allocation11 + $0xc] ss:$16 sps:$4 sm:$0xff]   ;;  %v4413_v41 = vld [vmem:[#allocation11] ss:$16 sps:$4 sm:$0xff]  }
 0x3c1   :  { %1223 = vmatprep.mubr.bf16.mxu0 %v5692_v21  ;;  %1264 = vmatprep.mubr.bf16.mxu1 %v5692_v21 }
 0x3c3   :  { %1194 = vmatpush1.bf16.msra.mxu0 %v4040_v42  ;;  %1235 = vmatpush1.bf16.msra.mxu1 %v4044_v43  ;;  %v4416_v42 = vld [vmem:[#allocation11 + $0x8] ss:$16 sps:$4 sm:$0xff]   ;;  %v4419_v43 = vld [vmem:[#allocation11 + $0x24] ss:$16 sps:$4 sm:$0xff]  }
 0x3c4   :  { %1195 = vmatprep.subr.bf16.mxu0 %v4048_v44  ;;  %1236 = vmatprep.subr.bf16.mxu1 %v4050_v45  ;;  %v4422_v44 = vld [vmem:[#allocation11 + $0x2c] ss:$16 sps:$4 sm:$0xff]   ;;  %v4427_v45 = vld [vmem:[#allocation11 + $0x20] ss:$16 sps:$4 sm:$0xff]  }
 0x3c5   :  { %5751 = vst [vmem:[#allocation50_spill] sm:$0xff] %v4422_v44  ;;  %5752 = vst [vmem:[#allocation51_spill] sm:$0xff] %v4427_v45 }
 0x3c7   :  { %1196 = vmatpush1.bf16.msra.mxu0 %v4054_v46  ;;  %1237 = vmatpush1.bf16.msra.mxu1 %v4056_v47  ;;  %v4430_v46 = vld [vmem:[#allocation11 + $0x28] ss:$16 sps:$4 sm:$0xff]   ;;  %v4433_v47 = vld [vmem:[#allocation11 + $0x44] ss:$16 sps:$4 sm:$0xff]  }
 0x3c8   :  { %1197 = vmatprep.subr.bf16.mxu0 %v4060_v48  ;;  %1238 = vmatprep.subr.bf16.mxu1 %v4064_v49  ;;  %5753 = vst [vmem:[#allocation52_spill] sm:$0xff] %v4430_v46  ;;  %5754 = vst [vmem:[#allocation53_spill] sm:$0xff] %v4433_v47  ;;  %v4436_v48 = vld [vmem:[#allocation11 + $0x4c] ss:$16 sps:$4 sm:$0xff]   ;;  %v4439_v49 = vld [vmem:[#allocation11 + $0x40] ss:$16 sps:$4 sm:$0xff]  }
 0x3c9   :  { %5755 = vst [vmem:[#allocation54_spill] sm:$0xff] %v4436_v48  ;;  %5756 = vst [vmem:[#allocation55_spill] sm:$0xff] %v4439_v49 }
 0x3cb   :  { %1198 = vmatpush1.bf16.msra.mxu0 %v4073_v51  ;;  %1239 = vmatpush1.bf16.msra.mxu1 %v4075_v52  ;;  %v4442_v51 = vld [vmem:[#allocation11 + $0x48] ss:$16 sps:$4 sm:$0xff]   ;;  %v4445_v52 = vld [vmem:[#allocation11 + $0x64] ss:$16 sps:$4 sm:$0xff]  }
 0x3cc   :  { %1199 = vmatprep.subr.bf16.mxu0 %v4081_v53  ;;  %1240 = vmatprep.subr.bf16.mxu1 %v4083_v54  ;;  %5757 = vst [vmem:[#allocation56_spill] sm:$0xff] %v4442_v51  ;;  %5758 = vst [vmem:[#allocation49_spill] sm:$0xff] %v4445_v52  ;;  %v4448_v53 = vld [vmem:[#allocation11 + $0x6c] ss:$16 sps:$4 sm:$0xff]   ;;  %v4451_v54 = vld [vmem:[#allocation11 + $0x60] ss:$16 sps:$4 sm:$0xff]  }
 0x3cd   :  { %5759 = vst [vmem:[#allocation20_spill] sm:$0xff] %v4448_v53  ;;  %5760 = vst [vmem:[#allocation21_spill] sm:$0xff] %v4451_v54 }
 0x3cf   :  { %1200 = vmatpush1.bf16.msra.mxu0 %v4089_v57  ;;  %1241 = vmatpush1.bf16.msra.mxu1 %v5693_v34  ;;  %v4454_v57 = vld [vmem:[#allocation11 + $0x68] ss:$16 sps:$4 sm:$0xff]   ;;  %v4475_v34 = vld [vmem:[#allocation11 + $0xa0] ss:$16 sps:$4 sm:$0xff]  }
 0x3d0   :  { %1201 = vmatprep.subr.bf16.mxu0 %v5694_v60  ;;  %1242 = vmatprep.subr.bf16.mxu1 %v5695_v23  ;;  %5761 = vst [vmem:[#allocation22_spill] sm:$0xff] %v4454_v57  ;;  %5768 = vst [vmem:[#allocation29_spill] sm:$0xff] %v4475_v34  ;;  %v4478_v60 = vld [vmem:[#allocation11 + $0xa8] ss:$16 sps:$4 sm:$0xff]   ;;  %v4481_v23 = vld [vmem:[#allocation11 + $0xc4] ss:$16 sps:$4 sm:$0xff]  }
 0x3d1   :  { %5769 = vst [vmem:[#allocation30_spill] sm:$0xff] %v4478_v60  ;;  %5770 = vst [vmem:[#allocation31_spill] sm:$0xff] %v4481_v23 }
 0x3d3   :  { %1202 = vmatpush1.bf16.msra.mxu0 %v5696_v35  ;;  %1243 = vmatpush1.bf16.msra.mxu1 %v5697_v37  ;;  %v4484_v35 = vld [vmem:[#allocation11 + $0xcc] ss:$16 sps:$4 sm:$0xff]   ;;  %v4487_v37 = vld [vmem:[#allocation11 + $0xc0] ss:$16 sps:$4 sm:$0xff]  }
 0x3d4   :  { %1203 = vmatprep.subr.bf16.mxu0 %v4110_v0  ;;  %1244 = vmatprep.subr.bf16.mxu1 %v5698_v30  ;;  %v4469_v0 = vld [vmem:[#allocation11 + $0xa4] ss:$16 sps:$4 sm:$0xff]   ;;  %5771 = vst [vmem:[#allocation32_spill] sm:$0xff] %v4484_v35  ;;  %5772 = vst [vmem:[#allocation33_spill] sm:$0xff] %v4487_v37  ;;  %v4490_v30 = vld [vmem:[#allocation11 + $0xc8] ss:$16 sps:$4 sm:$0xff]  }
 0x3d5   :  { %5766 = vst [vmem:[#allocation27_spill] sm:$0xff] %v4469_v0  ;;  %5773 = vst [vmem:[#allocation34_spill] sm:$0xff] %v4490_v30 }
 0x3d7   :  { %1204 = vmatpush1.bf16.msra.mxu0 %v4117_v56  ;;  %1245 = vmatpush1.bf16.msra.mxu1 %v4119_v58  ;;  %v4457_v58 = vld [vmem:[#allocation11 + $0x84] ss:$16 sps:$4 sm:$0xff]   ;;  %v4472_v56 = vld [vmem:[#allocation11 + $0xac] ss:$16 sps:$4 sm:$0xff]  }
 0x3d8   :  { %1205 = vmatprep.subr.bf16.mxu0 %v5699_v17  ;;  %1246 = vmatprep.subr.bf16.mxu1 %v4126_v59  ;;  %5762 = vst [vmem:[#allocation23_spill] sm:$0xff] %v4457_v58  ;;  %v4460_v59 = vld [vmem:[#allocation11 + $0x8c] ss:$16 sps:$4 sm:$0xff]   ;;  %5767 = vst [vmem:[#allocation28_spill] sm:$0xff] %v4472_v56  ;;  %v4493_v17 = vld [vmem:[#allocation11 + $0xe4] ss:$16 sps:$4 sm:$0xff]  }
 0x3d9   :  { %5763 = vst [vmem:[#allocation24_spill] sm:$0xff] %v4460_v59  ;;  %5774 = vst [vmem:[#allocation35_spill] sm:$0xff] %v4493_v17 }
 0x3db   :  { %1206 = vmatpush1.bf16.msra.mxu0 %v4131_v63  ;;  %1247 = vmatpush1.bf16.msra.mxu1 %v4133_v62  ;;  %v4463_v62 = vld [vmem:[#allocation11 + $0x80] ss:$16 sps:$4 sm:$0xff]   ;;  %v4466_v63 = vld [vmem:[#allocation11 + $0x88] ss:$16 sps:$4 sm:$0xff]  }
 0x3dc   :  { %1315 = vmatprep.subr.bf16.mxu0 %v4407_v39  ;;  %1356 = vmatprep.subr.bf16.mxu1 %v4410_v40  ;;  %5764 = vst [vmem:[#allocation25_spill] sm:$0xff] %v4463_v62  ;;  %5765 = vst [vmem:[#allocation26_spill] sm:$0xff] %v4466_v63 }
 0x3de   :  { %1224 = vmatmul.mubr.bf16.vlgmr.msra.gmra.mrb[28].mxu0 %v1106_v38  ;;  %1265 = vmatmul.mubr.bf16.vlgmr.msra.gmra.mrb[28].mxu1 %v1106_v38 }
 0x3df   :  { %1316 = vmatpush1.bf16.msra.mxu0 %v4413_v41  ;;  %1357 = vmatpush1.bf16.msra.mxu1 %v4416_v42 }
 0x3e0   :  { %1317 = vmatprep.subr.bf16.mxu0 %v4419_v43  ;;  %1358 = vmatprep.subr.bf16.mxu1 %v4422_v44 }
 0x3e1   :  { %1347 = vmatprep.mubr.bf16.mxu0 %v5692_v21  ;;  %1388 = vmatprep.mubr.bf16.mxu1 %v5692_v21 }
 0x3e3   :  { %1318 = vmatpush1.bf16.msra.mxu0 %v4427_v45  ;;  %1359 = vmatpush1.bf16.msra.mxu1 %v4430_v46 }
 0x3e4   :  { %1319 = vmatprep.subr.bf16.mxu0 %v4433_v47  ;;  %1360 = vmatprep.subr.bf16.mxu1 %v4436_v48 }
 0x3e7   :  { %1320 = vmatpush1.bf16.msra.mxu0 %v4439_v49  ;;  %1361 = vmatpush1.bf16.msra.mxu1 %v4442_v51 }
 0x3e8   :  { %1321 = vmatprep.subr.bf16.mxu0 %v4445_v52  ;;  %1362 = vmatprep.subr.bf16.mxu1 %v4448_v53 }
 0x3eb   :  { %1322 = vmatpush1.bf16.msra.mxu0 %v4451_v54  ;;  %1363 = vmatpush1.bf16.msra.mxu1 %v4454_v57 }
 0x3ec   :  { %1323 = vmatprep.subr.bf16.mxu0 %v4457_v58  ;;  %1364 = vmatprep.subr.bf16.mxu1 %v4460_v59 }
 0x3ef   :  { %1324 = vmatpush1.bf16.msra.mxu0 %v4463_v62  ;;  %1365 = vmatpush1.bf16.msra.mxu1 %v4466_v63 }
 0x3f0   :  { %1325 = vmatprep.subr.bf16.mxu0 %v4469_v0  ;;  %1366 = vmatprep.subr.bf16.mxu1 %v4472_v56 }
 0x3f3   :  { %1326 = vmatpush1.bf16.msra.mxu0 %v4475_v34  ;;  %1367 = vmatpush1.bf16.msra.mxu1 %v4478_v60 }
 0x3f4   :  { %1327 = vmatprep.subr.bf16.mxu0 %v4481_v23  ;;  %1368 = vmatprep.subr.bf16.mxu1 %v4484_v35 }
 0x3f7   :  { %1328 = vmatpush1.bf16.msra.mxu0 %v4487_v37  ;;  %1369 = vmatpush1.bf16.msra.mxu1 %v4490_v30 }
 0x3f8   :  { %1329 = vmatprep.subr.bf16.mxu0 %v4493_v17  ;;  %1370 = vmatprep.subr.bf16.mxu1 %v4496_v15 }
 0x3fb   :  { %1330 = vmatpush1.bf16.msra.mxu0 %v4499_v25  ;;  %1371 = vmatpush1.bf16.msra.mxu1 %v4502_v29 }
 0x3fc   :  { %1397 = vmatprep.subr.bf16.mxu0 %v4505_v61  ;;  %1438 = vmatprep.subr.bf16.mxu1 %v4508_v33 }
 0x491   :  { %v1143_v16 = vpop.f32.mrb[24].mxu0  ;;  %v1184_v32 = vpop.f32.mrb[24].mxu1 }
 0x492   :  { %v1145_v26 = vpop.f32.mrb[25].mxu0  ;;  %v1186_v55 = vpop.f32.mrb[25].mxu1 }
 0x493   :  { %v1147_v20 = vpop.f32.mrb[26].mxu0  ;;  %v1188_v1 = vpop.f32.mrb[26].mxu1 }
 0x494   :  { %v1148_v2 = vpop.f32.mrb[27].mxu0  ;;  %v1189_v13 = vpop.f32.mrb[27].mxu1 }
 0x4b1   :  { %v1225_v4 = vpop.f32.mrb[28].mxu0  ;;  %v1266_v5 = vpop.f32.mrb[28].mxu1 }
 0x4b2   :  { %v1226_v6 = vadd.f32 %v1225_v4, %v1143_v16  ;;  %v1267_v12 = vadd.f32 %v1266_v5, %v1184_v32  ;;  %v1227_v50 = vpop.f32.mrb[29].mxu0  ;;  %v1268_v10 = vpop.f32.mrb[29].mxu1 }
 0x4b3   :  { %v1228_v14 = vadd.f32 %v1227_v50, %v1145_v26  ;;  %v1269_v7 = vadd.f32 %v1268_v10, %v1186_v55  ;;  %v1229_v18 = vpop.f32.mrb[30].mxu0  ;;  %v1270_v9 = vpop.f32.mrb[30].mxu1 }
 0x4b4   :  { %v1273_v11 = vadd.f32 %v1226_v6, %v4182_v31  ;;  %v1230_v22 = vpop.f32.mrb[31].mxu0  ;;  %v1271_v28 = vpop.f32.mrb[31].mxu1  ;;  %v1275_v1 = vadd.f32 %v1267_v12, %v4187_v19 }
 0x4b5   :  { %v1274_v27 = vadd.f32 %v1228_v14, %v4184_v24  ;;  %v1276_v16 = vadd.f32 %v1269_v7, %v4191_v36  ;;  %v1301_v14 = vpop.permute.xlu1 %1300 }
 0x4b6   :  { %v1277_v38 = vmul.f32 0.5, %v1273_v11  ;;  %vm1302_vm0 = vcmp.eq.s32.totalorder %v1301_v14, 1  ;;  %v4568_v14 = vld [vmem:[#allocation9 + $0x84] ss:$16 sps:$4 sm:$0xff]  }
 0x4b7   :  { %v1281_v20 = vmul.f32 0.5, %v1274_v27  ;;  %v1286_v32 = vmul.f32 0.5, %v1276_v16  ;;  %v4530_v16 = vld [vmem:[#allocation9 + $0x24] ss:$16 sps:$4 sm:$0xff]  }
 0x4b8   :  { %3451 = vtanh.f32 %v1277_v38 }
 0x4b9   :  { %3453 = vtanh.f32 %v1281_v20 }
 0x4ba   :  { %3455 = vtanh.f32 %v1275_v1  ;;  %v4524_v1 = vld [vmem:[#allocation9] ss:$16 sps:$4 sm:$0xff]  }
 0x4bb   :  { %3457 = vtanh.f32 %v1286_v32  ;;  %v4538_v32 = vld [vmem:[#allocation9 + $0x20] ss:$16 sps:$4 sm:$0xff]  }
 0x4c2   :  { %v3452_v26 = vpop.eup %3451 }
 0x4c3   :  { %v3454_v55 = vpop.eup %3453  ;;  %v1279_v2 = vmul.f32 0.5, %v3452_v26  ;;  %v4541_v26 = vld [vmem:[#allocation9 + $0x28] ss:$16 sps:$4 sm:$0xff]  }
 0x4c4   :  { %v1283_v13 = vmul.f32 0.5, %v3454_v55  ;;  %v3456_v5 = vpop.eup %3455  ;;  %v4544_v55 = vld [vmem:[#allocation9 + $0x44] ss:$16 sps:$4 sm:$0xff]  }
 0x4c5   :  { %v1280_v4 = vadd.f32 0.5, %v1279_v2  ;;  %v3458_v7 = vpop.eup %3457  ;;  %v4547_v2 = vld [vmem:[#allocation9 + $0x4c] ss:$16 sps:$4 sm:$0xff]  }
 0x4c6   :  { %v1284_v6 = vadd.f32 0.5, %v1283_v13  ;;  %v1288_v9 = vmul.f32 0.5, %v3458_v7  ;;  %v4550_v13 = vld [vmem:[#allocation9 + $0x40] ss:$16 sps:$4 sm:$0xff]  }
 0x4c7   :  { %v1292_v50 = vmul.f32 %v3456_v5, %v1280_v4  ;;  %v4553_v4 = vld [vmem:[#allocation9 + $0x48] ss:$16 sps:$4 sm:$0xff]   ;;  %v4556_v5 = vld [vmem:[#allocation9 + $0x64] ss:$16 sps:$4 sm:$0xff]   ;;  %v4574_v7 = vld [vmem:[#allocation9 + $0x80] ss:$16 sps:$4 sm:$0xff]  }
 0x4c8   :  { %v1291_v10 = vmul.f32 %v1284_v6, %v4368_v8  ;;  %v1289_v11 = vadd.f32 0.5, %v1288_v9  ;;  %v4559_v6 = vld [vmem:[#allocation9 + $0x6c] ss:$16 sps:$4 sm:$0xff]   ;;  %v4577_v9 = vld [vmem:[#allocation9 + $0x88] ss:$16 sps:$4 sm:$0xff]  }
 0x4c9   :  { %5780 = vst [vmem:[#allocation41_spill] sm:$0xff] %v4577_v9 }
 0x4ca   :  { %v1293_v18 = vadd.f32 %v1292_v50, %v1291_v10  ;;  %v4562_v50 = vld [vmem:[#allocation9 + $0x60] ss:$16 sps:$4 sm:$0xff]   ;;  %v4565_v10 = vld [vmem:[#allocation9 + $0x68] ss:$16 sps:$4 sm:$0xff]  }
 0x4cc   :  { %3459 = vtanh.f32 %v1293_v18  ;;  %v4517_v12 = vsel %vm1302_vm0, %v1293_v18, %v4368_v8  ;;  %v4527_v8 = vld [vmem:[#allocation9 + $0x8] ss:$16 sps:$4 sm:$0xff]   ;;  %v4571_v18 = vld [vmem:[#allocation9 + $0x8c] ss:$16 sps:$4 sm:$0xff]  }
 0x4d6   :  { %v3460_v22 = vpop.eup %3459 }
 0x4d7   :  { %v1295_v28 = vmul.f32 %v3460_v22, %v1289_v11  ;;  %v4580_v11 = vld [vmem:[#allocation9 + $0xa4] ss:$16 sps:$4 sm:$0xff]   ;;  %v4583_v22 = vld [vmem:[#allocation9 + $0xac] ss:$16 sps:$4 sm:$0xff]  }
 0x4d8   :  { %5781 = vst [vmem:[#allocation42_spill] sm:$0xff] %v4580_v11  ;;  %5782 = vst [vmem:[#allocation43_spill] sm:$0xff] %v4583_v22 }
 0x4d9   :  { %v4520_v27 = vsel %vm1302_vm0, %v1295_v28, %v4371_v3  ;;  %v1308_v38 = vsel %vm1302_vm0, %v1295_v28, 0.0  ;;  %v4533_v3 = vld [vmem:[#allocation9 + $0x2c] ss:$16 sps:$4 sm:$0xff]   ;;  %v4586_v28 = vld [vmem:[#allocation9 + $0xa0] ss:$16 sps:$4 sm:$0xff]  }
 0x4da   :  { %1309 = vst [vmem:[#allocation12 + $0x18] sm:$0xff] %v1308_v38  ;;  %v1314_v20 = vpack.c.bf16 %v4520_v27, %v4520_v27  ;;  %5783 = vst [vmem:[#allocation44_spill] sm:$0xff] %v4586_v28  ;;  %v4589_v38 = vld [vmem:[#allocation9 + $0xa8] ss:$16 sps:$4 sm:$0xff]  }
 0x4db   :  { %5784 = vst [vmem:[#allocation45_spill] sm:$0xff] %v4589_v38 }
 0x4dc   :  { %1348 = vmatmul.mubr.bf16.vlgmr.msra.gmra.mrb[32].mxu0 %v1314_v20  ;;  %1389 = vmatmul.mubr.bf16.vlgmr.msra.gmra.mrb[32].mxu1 %v1314_v20  ;;  %v4592_v20 = vld [vmem:[#allocation9 + $0xc4] ss:$16 sps:$4 sm:$0xff]  }
 0x4dd   :  { %1398 = vmatpush1.bf16.msra.mxu0 %v4524_v1  ;;  %1439 = vmatpush1.bf16.msra.mxu1 %v4527_v8  ;;  %5785 = vst [vmem:[#allocation46_spill] sm:$0xff] %v4592_v20 }
 0x4de   :  { %1399 = vmatprep.subr.bf16.mxu0 %v4530_v16  ;;  %1440 = vmatprep.subr.bf16.mxu1 %v4533_v3 }
 0x4df   :  { %1429 = vmatprep.mubr.bf16.mxu0 %v5692_v21  ;;  %1470 = vmatprep.mubr.bf16.mxu1 %v5692_v21 }
 0x4e1   :  { %1400 = vmatpush1.bf16.msra.mxu0 %v4538_v32  ;;  %1441 = vmatpush1.bf16.msra.mxu1 %v4541_v26 }
 0x4e2   :  { %1401 = vmatprep.subr.bf16.mxu0 %v4544_v55  ;;  %1442 = vmatprep.subr.bf16.mxu1 %v4547_v2 }
 0x4e5   :  { %1402 = vmatpush1.bf16.msra.mxu0 %v4550_v13  ;;  %1443 = vmatpush1.bf16.msra.mxu1 %v4553_v4 }
 0x4e6   :  { %1403 = vmatprep.subr.bf16.mxu0 %v4556_v5  ;;  %1444 = vmatprep.subr.bf16.mxu1 %v4559_v6 }
 0x4e9   :  { %1404 = vmatpush1.bf16.msra.mxu0 %v4562_v50  ;;  %1445 = vmatpush1.bf16.msra.mxu1 %v4565_v10 }
 0x4ea   :  { %1405 = vmatprep.subr.bf16.mxu0 %v4568_v14  ;;  %1446 = vmatprep.subr.bf16.mxu1 %v4571_v18 }
 0x4ed   :  { %1406 = vmatpush1.bf16.msra.mxu0 %v4574_v7  ;;  %1447 = vmatpush1.bf16.msra.mxu1 %v4577_v9  ;;  %v4595_v9 = vld [vmem:[#allocation9 + $0xcc] ss:$16 sps:$4 sm:$0xff]  }
 0x4ee   :  { %1407 = vmatprep.subr.bf16.mxu0 %v4580_v11  ;;  %1448 = vmatprep.subr.bf16.mxu1 %v4583_v22  ;;  %5786 = vst [vmem:[#allocation47_spill] sm:$0xff] %v4595_v9  ;;  %v4598_v11 = vld [vmem:[#allocation9 + $0xc0] ss:$16 sps:$4 sm:$0xff]   ;;  %v4601_v22 = vld [vmem:[#allocation9 + $0xc8] ss:$16 sps:$4 sm:$0xff]  }
 0x4ef   :  { %5787 = vst [vmem:[#allocation48_spill] sm:$0xff] %v4598_v11 }
 0x4f1   :  { %1408 = vmatpush1.bf16.msra.mxu0 %v4586_v28  ;;  %1449 = vmatpush1.bf16.msra.mxu1 %v4589_v38  ;;  %v4604_v28 = vld [vmem:[#allocation9 + $0xe4] ss:$16 sps:$4 sm:$0xff]   ;;  %v4607_v38 = vld [vmem:[#allocation9 + $0xec] ss:$16 sps:$4 sm:$0xff]  }
 0x4f2   :  { %1409 = vmatprep.subr.bf16.mxu0 %v4592_v20  ;;  %1450 = vmatprep.subr.bf16.mxu1 %v4595_v9  ;;  %v4610_v20 = vld [vmem:[#allocation9 + $0xe0] ss:$16 sps:$4 sm:$0xff]   ;;  %v4613_v9 = vld [vmem:[#allocation9 + $0xe8] ss:$16 sps:$4 sm:$0xff]  }
 0x4f5   :  { %1410 = vmatpush1.bf16.msra.mxu0 %v4598_v11  ;;  %1451 = vmatpush1.bf16.msra.mxu1 %v4601_v22  ;;  %v1312_v11 = vld [vmem:[#allocation6 + $0x10] sm:$0xf] }
 0x4f6   :  { %1411 = vmatprep.subr.bf16.mxu0 %v4604_v28  ;;  %1452 = vmatprep.subr.bf16.mxu1 %v4607_v38 }
 0x4f9   :  { %1412 = vmatpush1.bf16.msra.mxu0 %v4610_v20  ;;  %1453 = vmatpush1.bf16.msra.mxu1 %v4613_v9 }
 0x4fa   :  { %1521 = vmatprep.subr.bf16.mxu0 %v4407_v39  ;;  %1562 = vmatprep.subr.bf16.mxu1 %v4410_v40 }
 0x4fc   :  { %1430 = vmatmul.mubr.bf16.vlgmr.msra.gmra.mrb[36].mxu0 %v1312_v11  ;;  %1471 = vmatmul.mubr.bf16.vlgmr.msra.gmra.mrb[36].mxu1 %v1312_v11 }
 0x4fd   :  { %1522 = vmatpush1.bf16.msra.mxu0 %v4413_v41  ;;  %1563 = vmatpush1.bf16.msra.mxu1 %v4416_v42 }
 0x4fe   :  { %1523 = vmatprep.subr.bf16.mxu0 %v4419_v43  ;;  %1564 = vmatprep.subr.bf16.mxu1 %v4422_v44 }
 0x4ff   :  { %1553 = vmatprep.mubr.bf16.mxu0 %v5692_v21  ;;  %1594 = vmatprep.mubr.bf16.mxu1 %v5692_v21 }
 0x501   :  { %1524 = vmatpush1.bf16.msra.mxu0 %v4427_v45  ;;  %1565 = vmatpush1.bf16.msra.mxu1 %v4430_v46 }
 0x502   :  { %1525 = vmatprep.subr.bf16.mxu0 %v4433_v47  ;;  %1566 = vmatprep.subr.bf16.mxu1 %v4436_v48 }
 0x505   :  { %1526 = vmatpush1.bf16.msra.mxu0 %v4439_v49  ;;  %1567 = vmatpush1.bf16.msra.mxu1 %v4442_v51 }
 0x506   :  { %1527 = vmatprep.subr.bf16.mxu0 %v4445_v52  ;;  %1568 = vmatprep.subr.bf16.mxu1 %v4448_v53 }
 0x509   :  { %1528 = vmatpush1.bf16.msra.mxu0 %v4451_v54  ;;  %1569 = vmatpush1.bf16.msra.mxu1 %v4454_v57 }
 0x50a   :  { %1529 = vmatprep.subr.bf16.mxu0 %v4457_v58  ;;  %1570 = vmatprep.subr.bf16.mxu1 %v4460_v59 }
 0x50d   :  { %1530 = vmatpush1.bf16.msra.mxu0 %v4463_v62  ;;  %1571 = vmatpush1.bf16.msra.mxu1 %v4466_v63 }
 0x50e   :  { %1531 = vmatprep.subr.bf16.mxu0 %v4469_v0  ;;  %1572 = vmatprep.subr.bf16.mxu1 %v4472_v56 }
 0x511   :  { %1532 = vmatpush1.bf16.msra.mxu0 %v4475_v34  ;;  %1573 = vmatpush1.bf16.msra.mxu1 %v4478_v60 }
 0x512   :  { %1533 = vmatprep.subr.bf16.mxu0 %v4481_v23  ;;  %1574 = vmatprep.subr.bf16.mxu1 %v4484_v35 }
 0x515   :  { %1534 = vmatpush1.bf16.msra.mxu0 %v4487_v37  ;;  %1575 = vmatpush1.bf16.msra.mxu1 %v4490_v30 }
 0x516   :  { %1535 = vmatprep.subr.bf16.mxu0 %v4493_v17  ;;  %1576 = vmatprep.subr.bf16.mxu1 %v4496_v15 }
 0x519   :  { %1536 = vmatpush1.bf16.msra.mxu0 %v4499_v25  ;;  %1577 = vmatpush1.bf16.msra.mxu1 %v4502_v29 }
 0x51a   :  { %1603 = vmatprep.subr.bf16.mxu0 %v4505_v61  ;;  %1644 = vmatprep.subr.bf16.mxu1 %v4508_v33 }
 0x5af   :  { %v1349_v11 = vpop.f32.mrb[32].mxu0  ;;  %v1390_v23 = vpop.f32.mrb[32].mxu1 }
 0x5b0   :  { %v1351_v60 = vpop.f32.mrb[33].mxu0  ;;  %v1392_v35 = vpop.f32.mrb[33].mxu1 }
 0x5b1   :  { %v1353_v34 = vpop.f32.mrb[34].mxu0  ;;  %v1394_v37 = vpop.f32.mrb[34].mxu1 }
 0x5b2   :  { %v1354_v56 = vpop.f32.mrb[35].mxu0  ;;  %v1395_v30 = vpop.f32.mrb[35].mxu1 }
 0x5cf   :  { %v1431_v0 = vpop.f32.mrb[36].mxu0  ;;  %v1472_v17 = vpop.f32.mrb[36].mxu1 }
 0x5d0   :  { %v1432_v63 = vadd.f32 %v1431_v0, %v1349_v11  ;;  %v1473_v15 = vadd.f32 %v1472_v17, %v1390_v23  ;;  %v1433_v62 = vpop.f32.mrb[37].mxu0  ;;  %v1474_v25 = vpop.f32.mrb[37].mxu1 }
 0x5d1   :  { %v1434_v59 = vadd.f32 %v1433_v62, %v1351_v60  ;;  %v1475_v29 = vadd.f32 %v1474_v25, %v1392_v35  ;;  %v1435_v58 = vpop.f32.mrb[38].mxu0  ;;  %v1476_v61 = vpop.f32.mrb[38].mxu1 }
 0x5d2   :  { %v1479_v33 = vadd.f32 %v1432_v63, %v4182_v31  ;;  %v1436_v57 = vpop.f32.mrb[39].mxu0  ;;  %v1477_v54 = vpop.f32.mrb[39].mxu1  ;;  %v1481_v56 = vadd.f32 %v1473_v15, %v4187_v19 }
 0x5d3   :  { %v1480_v53 = vadd.f32 %v1434_v59, %v4184_v24  ;;  %v1482_v0 = vadd.f32 %v1475_v29, %v4191_v36 }
 0x5d4   :  { %v1483_v34 = vmul.f32 0.5, %v1479_v33 }
 0x5d5   :  { %v1487_v37 = vmul.f32 0.5, %v1480_v53  ;;  %v1492_v23 = vmul.f32 0.5, %v1482_v0  ;;  %v1507_v53 = vpop.permute.xlu0 %1506  ;;  %v5790_v0 = vld [vmem:[#allocation43_spill] sm:$0xff] }
 0x5d6   :  { %3461 = vtanh.f32 %v1483_v34  ;;  %vm1508_vm1 = vcmp.eq.s32.totalorder %v1507_v53, 1  ;;  %v5800_v53 = vld [vmem:[#allocation24_spill] sm:$0xff] }
 0x5d7   :  { %3463 = vtanh.f32 %v1487_v37 }
 0x5d8   :  { %3465 = vtanh.f32 %v1481_v56 }
 0x5d9   :  { %3467 = vtanh.f32 %v1492_v23  ;;  %v5791_v23 = vld [vmem:[#allocation44_spill] sm:$0xff] }
 0x5e0   :  { %v3462_v62 = vpop.eup %3461 }
 0x5e1   :  { %v3464_v60 = vpop.eup %3463  ;;  %v1485_v58 = vmul.f32 0.5, %v3462_v62  ;;  %v5792_v62 = vld [vmem:[#allocation45_spill] sm:$0xff] }
 0x5e2   :  { %v1489_v35 = vmul.f32 0.5, %v3464_v60  ;;  %v3466_v57 = vpop.eup %3465  ;;  %v5793_v60 = vld [vmem:[#allocation46_spill] sm:$0xff] }
 0x5e3   :  { %v1486_v63 = vadd.f32 0.5, %v1485_v58  ;;  %v3468_v25 = vpop.eup %3467  ;;  %v5794_v58 = vld [vmem:[#allocation47_spill] sm:$0xff] }
 0x5e4   :  { %v1490_v54 = vadd.f32 0.5, %v1489_v35  ;;  %v1494_v29 = vmul.f32 0.5, %v3468_v25  ;;  %v5795_v35 = vld [vmem:[#allocation48_spill] sm:$0xff]  ;;  %v5802_v25 = vld [vmem:[#allocation26_spill] sm:$0xff] }
 0x5e5   :  { %v1498_v30 = vmul.f32 %v3466_v57, %v1486_v63  ;;  %v1518_v63 = vld [vmem:[#allocation6 + $0x14] sm:$0xf]  ;;  %v5796_v57 = vld [vmem:[#allocation20_spill] sm:$0xff] }
 0x5e6   :  { %v1497_v59 = vmul.f32 %v1490_v54, %v4517_v12  ;;  %v1495_v61 = vadd.f32 0.5, %v1494_v29  ;;  %v5797_v54 = vld [vmem:[#allocation21_spill] sm:$0xff]  ;;  %v5803_v29 = vld [vmem:[#allocation27_spill] sm:$0xff] }
 0x5e8   :  { %v1499_v17 = vadd.f32 %v1498_v30, %v1497_v59  ;;  %v5798_v30 = vld [vmem:[#allocation22_spill] sm:$0xff]  ;;  %v5799_v59 = vld [vmem:[#allocation23_spill] sm:$0xff] }
 0x5ea   :  { %3469 = vtanh.f32 %v1499_v17  ;;  %v4658_v15 = vsel %vm1508_vm1, %v1499_v17, %v4517_v12  ;;  %v5788_v12 = vld [vmem:[#allocation41_spill] sm:$0xff] }
 0x5eb   :  { %v5801_v17 = vld [vmem:[#allocation25_spill] sm:$0xff] }
 0x5f4   :  { %v3470_v33 = vpop.eup %3469 }
 0x5f5   :  { %v1501_v11 = vmul.f32 %v3470_v33, %v1495_v61  ;;  %v5804_v61 = vld [vmem:[#allocation28_spill] sm:$0xff]  ;;  %v5805_v33 = vld [vmem:[#allocation29_spill] sm:$0xff] }
 0x5f7   :  { %v4661_v34 = vsel %vm1508_vm1, %v1501_v11, %v4520_v27  ;;  %v1514_v37 = vsel %vm1508_vm1, %v1501_v11, 0.0  ;;  %v5789_v27 = vld [vmem:[#allocation42_spill] sm:$0xff] }
 0x5f8   :  { %1515 = vst [vmem:[#allocation12 + $0x20] sm:$0xff] %v1514_v37  ;;  %v1520_v56 = vpack.c.bf16 %v4661_v34, %v4661_v34  ;;  %v5806_v11 = vld [vmem:[#allocation30_spill] sm:$0xff]  ;;  %v5807_v37 = vld [vmem:[#allocation31_spill] sm:$0xff] }
 0x5fa   :  { %1554 = vmatmul.mubr.bf16.vlgmr.msra.gmra.mrb[40].mxu0 %v1520_v56  ;;  %1595 = vmatmul.mubr.bf16.vlgmr.msra.gmra.mrb[40].mxu1 %v1520_v56  ;;  %v5808_v56 = vld [vmem:[#allocation32_spill] sm:$0xff] }
 0x5fb   :  { %1604 = vmatpush1.bf16.msra.mxu0 %v4524_v1  ;;  %1645 = vmatpush1.bf16.msra.mxu1 %v4527_v8 }
 0x5fc   :  { %1605 = vmatprep.subr.bf16.mxu0 %v4530_v16  ;;  %1646 = vmatprep.subr.bf16.mxu1 %v4533_v3 }
 0x5fd   :  { %1635 = vmatprep.mubr.bf16.mxu0 %v5692_v21  ;;  %1676 = vmatprep.mubr.bf16.mxu1 %v5692_v21 }
 0x5ff   :  { %1606 = vmatpush1.bf16.msra.mxu0 %v4538_v32  ;;  %1647 = vmatpush1.bf16.msra.mxu1 %v4541_v26 }
 0x600   :  { %1607 = vmatprep.subr.bf16.mxu0 %v4544_v55  ;;  %1648 = vmatprep.subr.bf16.mxu1 %v4547_v2 }
 0x603   :  { %1608 = vmatpush1.bf16.msra.mxu0 %v4550_v13  ;;  %1649 = vmatpush1.bf16.msra.mxu1 %v4553_v4 }
 0x604   :  { %1609 = vmatprep.subr.bf16.mxu0 %v4556_v5  ;;  %1650 = vmatprep.subr.bf16.mxu1 %v4559_v6 }
 0x607   :  { %1610 = vmatpush1.bf16.msra.mxu0 %v4562_v50  ;;  %1651 = vmatpush1.bf16.msra.mxu1 %v4565_v10 }
 0x608   :  { %1611 = vmatprep.subr.bf16.mxu0 %v4568_v14  ;;  %1652 = vmatprep.subr.bf16.mxu1 %v4571_v18 }
 0x60b   :  { %1612 = vmatpush1.bf16.msra.mxu0 %v4574_v7  ;;  %1653 = vmatpush1.bf16.msra.mxu1 %v5788_v12 }
 0x60c   :  { %1613 = vmatprep.subr.bf16.mxu0 %v5789_v27  ;;  %1654 = vmatprep.subr.bf16.mxu1 %v5790_v0 }
 0x60f   :  { %1614 = vmatpush1.bf16.msra.mxu0 %v5791_v23  ;;  %1655 = vmatpush1.bf16.msra.mxu1 %v5792_v62 }
 0x610   :  { %1615 = vmatprep.subr.bf16.mxu0 %v5793_v60  ;;  %1656 = vmatprep.subr.bf16.mxu1 %v5794_v58 }
 0x613   :  { %1616 = vmatpush1.bf16.msra.mxu0 %v5795_v35  ;;  %1657 = vmatpush1.bf16.msra.mxu1 %v4601_v22 }
 0x614   :  { %1617 = vmatprep.subr.bf16.mxu0 %v4604_v28  ;;  %1658 = vmatprep.subr.bf16.mxu1 %v4607_v38 }
 0x617   :  { %1618 = vmatpush1.bf16.msra.mxu0 %v4610_v20  ;;  %1659 = vmatpush1.bf16.msra.mxu1 %v4613_v9 }
 0x618   :  { %1727 = vmatprep.subr.bf16.mxu0 %v4407_v39  ;;  %1768 = vmatprep.subr.bf16.mxu1 %v4410_v40 }
 0x61a   :  { %1636 = vmatmul.mubr.bf16.vlgmr.msra.gmra.mrb[44].mxu0 %v1518_v63  ;;  %1677 = vmatmul.mubr.bf16.vlgmr.msra.gmra.mrb[44].mxu1 %v1518_v63  ;;  %v5809_v63 = vld [vmem:[#allocation33_spill] sm:$0xff] }
 0x61b   :  { %1728 = vmatpush1.bf16.msra.mxu0 %v4413_v41  ;;  %1769 = vmatpush1.bf16.msra.mxu1 %v4416_v42 }
 0x61c   :  { %1729 = vmatprep.subr.bf16.mxu0 %v4419_v43  ;;  %1770 = vmatprep.subr.bf16.mxu1 %v4422_v44 }
 0x61d   :  { %1759 = vmatprep.mubr.bf16.mxu0 %v5692_v21  ;;  %1800 = vmatprep.mubr.bf16.mxu1 %v5692_v21 }
 0x61f   :  { %1730 = vmatpush1.bf16.msra.mxu0 %v4427_v45  ;;  %1771 = vmatpush1.bf16.msra.mxu1 %v4430_v46 }
 0x620   :  { %1731 = vmatprep.subr.bf16.mxu0 %v4433_v47  ;;  %1772 = vmatprep.subr.bf16.mxu1 %v4436_v48 }
 0x623   :  { %1732 = vmatpush1.bf16.msra.mxu0 %v4439_v49  ;;  %1773 = vmatpush1.bf16.msra.mxu1 %v4442_v51 }
 0x624   :  { %1733 = vmatprep.subr.bf16.mxu0 %v4445_v52  ;;  %1774 = vmatprep.subr.bf16.mxu1 %v5796_v57 }
 0x627   :  { %1734 = vmatpush1.bf16.msra.mxu0 %v5797_v54  ;;  %1775 = vmatpush1.bf16.msra.mxu1 %v5798_v30 }
 0x628   :  { %1735 = vmatprep.subr.bf16.mxu0 %v5799_v59  ;;  %1776 = vmatprep.subr.bf16.mxu1 %v5800_v53  ;;  %v5810_v59 = vld [vmem:[#allocation34_spill] sm:$0xff]  ;;  %v5811_v53 = vld [vmem:[#allocation35_spill] sm:$0xff] }
 0x62b   :  { %1736 = vmatpush1.bf16.msra.mxu0 %v5801_v17  ;;  %1777 = vmatpush1.bf16.msra.mxu1 %v5802_v25  ;;  %v5812_v17 = vld [vmem:[#allocation36_spill] sm:$0xff]  ;;  %v5813_v25 = vld [vmem:[#allocation37_spill] sm:$0xff] }
 0x62c   :  { %1737 = vmatprep.subr.bf16.mxu0 %v5803_v29  ;;  %1778 = vmatprep.subr.bf16.mxu1 %v5804_v61  ;;  %v5814_v29 = vld [vmem:[#allocation38_spill] sm:$0xff]  ;;  %v5815_v61 = vld [vmem:[#allocation39_spill] sm:$0xff] }
 0x62f   :  { %1738 = vmatpush1.bf16.msra.mxu0 %v5805_v33  ;;  %1779 = vmatpush1.bf16.msra.mxu1 %v5806_v11  ;;  %v5816_v33 = vld [vmem:[#allocation40_spill] sm:$0xff] }
 0x630   :  { %1739 = vmatprep.subr.bf16.mxu0 %v5807_v37  ;;  %1780 = vmatprep.subr.bf16.mxu1 %v5808_v56 }
 0x633   :  { %1740 = vmatpush1.bf16.msra.mxu0 %v5809_v63  ;;  %1781 = vmatpush1.bf16.msra.mxu1 %v5810_v59 }
 0x634   :  { %1741 = vmatprep.subr.bf16.mxu0 %v5811_v53  ;;  %1782 = vmatprep.subr.bf16.mxu1 %v5812_v17 }
 0x637   :  { %1742 = vmatpush1.bf16.msra.mxu0 %v5813_v25  ;;  %1783 = vmatpush1.bf16.msra.mxu1 %v5814_v29 }
 0x638   :  { %1809 = vmatprep.subr.bf16.mxu0 %v5815_v61  ;;  %1850 = vmatprep.subr.bf16.mxu1 %v5816_v33 }
 0x6cd   :  { %v1555_v11 = vpop.f32.mrb[40].mxu0  ;;  %v1596_v37 = vpop.f32.mrb[40].mxu1 }
 0x6ce   :  { %v1557_v30 = vpop.f32.mrb[41].mxu0  ;;  %v1598_v56 = vpop.f32.mrb[41].mxu1 }
 0x6cf   :  { %v1559_v54 = vpop.f32.mrb[42].mxu0  ;;  %v1600_v63 = vpop.f32.mrb[42].mxu1 }
 0x6d0   :  { %v1560_v57 = vpop.f32.mrb[43].mxu0  ;;  %v1601_v59 = vpop.f32.mrb[43].mxu1 }
 0x6ed   :  { %v1637_v52 = vpop.f32.mrb[44].mxu0  ;;  %v1678_v53 = vpop.f32.mrb[44].mxu1 }
 0x6ee   :  { %v1638_v51 = vadd.f32 %v1637_v52, %v1555_v11  ;;  %v1679_v17 = vadd.f32 %v1678_v53, %v1596_v37  ;;  %v1639_v49 = vpop.f32.mrb[45].mxu0  ;;  %v1680_v25 = vpop.f32.mrb[45].mxu1 }
 0x6ef   :  { %v1640_v48 = vadd.f32 %v1639_v49, %v1557_v30  ;;  %v1681_v29 = vadd.f32 %v1680_v25, %v1598_v56  ;;  %v1641_v47 = vpop.f32.mrb[46].mxu0  ;;  %v1682_v61 = vpop.f32.mrb[46].mxu1 }
 0x6f0   :  { %v1685_v33 = vadd.f32 %v1638_v51, %v4182_v31  ;;  %v1642_v46 = vpop.f32.mrb[47].mxu0  ;;  %v1683_v45 = vpop.f32.mrb[47].mxu1  ;;  %v1687_v57 = vadd.f32 %v1679_v17, %v4187_v19 }
 0x6f1   :  { %v1686_v44 = vadd.f32 %v1640_v48, %v4184_v24  ;;  %v1688_v52 = vadd.f32 %v1681_v29, %v4191_v36 }
 0x6f2   :  { %v1689_v54 = vmul.f32 0.5, %v1685_v33 }
 0x6f3   :  { %v1693_v63 = vmul.f32 0.5, %v1686_v44  ;;  %v1698_v59 = vmul.f32 0.5, %v1688_v52  ;;  %v1713_v44 = vpop.permute.xlu1 %1712  ;;  %v5818_v52 = vld [vmem:[#allocation51_spill] sm:$0xff] }
 0x6f4   :  { %3471 = vtanh.f32 %v1689_v54  ;;  %vm1714_vm2 = vcmp.eq.s32.totalorder %v1713_v44, 1  ;;  %v5829_v44 = vld [vmem:[#allocation24_spill] sm:$0xff] }
 0x6f5   :  { %3473 = vtanh.f32 %v1693_v63 }
 0x6f6   :  { %3475 = vtanh.f32 %v1687_v57 }
 0x6f7   :  { %3477 = vtanh.f32 %v1698_v59  ;;  %v5819_v59 = vld [vmem:[#allocation52_spill] sm:$0xff] }
 0x6fe   :  { %v3472_v49 = vpop.eup %3471 }
 0x6ff   :  { %v3474_v30 = vpop.eup %3473  ;;  %v1691_v47 = vmul.f32 0.5, %v3472_v49  ;;  %v5820_v49 = vld [vmem:[#allocation53_spill] sm:$0xff] }
 0x700   :  { %v1695_v53 = vmul.f32 0.5, %v3474_v30  ;;  %v3476_v46 = vpop.eup %3475  ;;  %v5821_v30 = vld [vmem:[#allocation54_spill] sm:$0xff] }
 0x701   :  { %v1692_v51 = vadd.f32 0.5, %v1691_v47  ;;  %v3478_v29 = vpop.eup %3477  ;;  %v5822_v47 = vld [vmem:[#allocation55_spill] sm:$0xff] }
 0x702   :  { %v1696_v45 = vadd.f32 0.5, %v1695_v53  ;;  %v1700_v33 = vmul.f32 0.5, %v3478_v29  ;;  %v5823_v53 = vld [vmem:[#allocation56_spill] sm:$0xff]  ;;  %v5831_v29 = vld [vmem:[#allocation26_spill] sm:$0xff] }
 0x703   :  { %v1704_v25 = vmul.f32 %v3476_v46, %v1692_v51  ;;  %v5824_v51 = vld [vmem:[#allocation49_spill] sm:$0xff]  ;;  %v5825_v46 = vld [vmem:[#allocation20_spill] sm:$0xff] }
 0x704   :  { %v1703_v48 = vmul.f32 %v1696_v45, %v4658_v15  ;;  %v1701_v11 = vadd.f32 0.5, %v1700_v33  ;;  %v5826_v45 = vld [vmem:[#allocation21_spill] sm:$0xff]  ;;  %v5832_v33 = vld [vmem:[#allocation27_spill] sm:$0xff] }
 0x706   :  { %v1705_v61 = vadd.f32 %v1704_v25, %v1703_v48  ;;  %v5827_v25 = vld [vmem:[#allocation22_spill] sm:$0xff]  ;;  %v5828_v48 = vld [vmem:[#allocation23_spill] sm:$0xff] }
 0x708   :  { %3479 = vtanh.f32 %v1705_v61  ;;  %v4739_v17 = vsel %vm1714_vm2, %v1705_v61, %v4658_v15  ;;  %v1724_v15 = vld [vmem:[#allocation6 + $0x18] sm:$0xf] }
 0x709   :  { %v5830_v61 = vld [vmem:[#allocation25_spill] sm:$0xff] }
 0x712   :  { %v3480_v37 = vpop.eup %3479 }
 0x713   :  { %v1707_v56 = vmul.f32 %v3480_v37, %v1701_v11  ;;  %v5833_v11 = vld [vmem:[#allocation28_spill] sm:$0xff]  ;;  %v5834_v37 = vld [vmem:[#allocation29_spill] sm:$0xff] }
 0x715   :  { %v4742_v54 = vsel %vm1714_vm2, %v1707_v56, %v4661_v34  ;;  %v1720_v63 = vsel %vm1714_vm2, %v1707_v56, 0.0  ;;  %v5817_v34 = vld [vmem:[#allocation50_spill] sm:$0xff] }
 0x716   :  { %1721 = vst [vmem:[#allocation12 + $0x28] sm:$0xff] %v1720_v63  ;;  %v1726_v57 = vpack.c.bf16 %v4742_v54, %v4742_v54  ;;  %v5835_v56 = vld [vmem:[#allocation30_spill] sm:$0xff]  ;;  %v5836_v63 = vld [vmem:[#allocation31_spill] sm:$0xff] }
 0x718   :  { %1760 = vmatmul.mubr.bf16.vlgmr.msra.gmra.mrb[48].mxu0 %v1726_v57  ;;  %1801 = vmatmul.mubr.bf16.vlgmr.msra.gmra.mrb[48].mxu1 %v1726_v57  ;;  %v5837_v57 = vld [vmem:[#allocation32_spill] sm:$0xff] }
 0x719   :  { %1810 = vmatpush1.bf16.msra.mxu0 %v4524_v1  ;;  %1851 = vmatpush1.bf16.msra.mxu1 %v4527_v8 }
 0x71a   :  { %1811 = vmatprep.subr.bf16.mxu0 %v4530_v16  ;;  %1852 = vmatprep.subr.bf16.mxu1 %v4533_v3 }
 0x71b   :  { %1841 = vmatprep.mubr.bf16.mxu0 %v5692_v21  ;;  %1882 = vmatprep.mubr.bf16.mxu1 %v5692_v21 }
 0x71d   :  { %1812 = vmatpush1.bf16.msra.mxu0 %v4538_v32  ;;  %1853 = vmatpush1.bf16.msra.mxu1 %v4541_v26 }
 0x71e   :  { %1813 = vmatprep.subr.bf16.mxu0 %v4544_v55  ;;  %1854 = vmatprep.subr.bf16.mxu1 %v4547_v2 }
 0x721   :  { %1814 = vmatpush1.bf16.msra.mxu0 %v4550_v13  ;;  %1855 = vmatpush1.bf16.msra.mxu1 %v4553_v4 }
 0x722   :  { %1815 = vmatprep.subr.bf16.mxu0 %v4556_v5  ;;  %1856 = vmatprep.subr.bf16.mxu1 %v4559_v6 }
 0x725   :  { %1816 = vmatpush1.bf16.msra.mxu0 %v4562_v50  ;;  %1857 = vmatpush1.bf16.msra.mxu1 %v4565_v10 }
 0x726   :  { %1817 = vmatprep.subr.bf16.mxu0 %v4568_v14  ;;  %1858 = vmatprep.subr.bf16.mxu1 %v4571_v18 }
 0x729   :  { %1818 = vmatpush1.bf16.msra.mxu0 %v4574_v7  ;;  %1859 = vmatpush1.bf16.msra.mxu1 %v5788_v12 }
 0x72a   :  { %1819 = vmatprep.subr.bf16.mxu0 %v5789_v27  ;;  %1860 = vmatprep.subr.bf16.mxu1 %v5790_v0 }
 0x72d   :  { %1820 = vmatpush1.bf16.msra.mxu0 %v5791_v23  ;;  %1861 = vmatpush1.bf16.msra.mxu1 %v5792_v62 }
 0x72e   :  { %1821 = vmatprep.subr.bf16.mxu0 %v5793_v60  ;;  %1862 = vmatprep.subr.bf16.mxu1 %v5794_v58 }
 0x731   :  { %1822 = vmatpush1.bf16.msra.mxu0 %v5795_v35  ;;  %1863 = vmatpush1.bf16.msra.mxu1 %v4601_v22 }
 0x732   :  { %1823 = vmatprep.subr.bf16.mxu0 %v4604_v28  ;;  %1864 = vmatprep.subr.bf16.mxu1 %v4607_v38 }
 0x735   :  { %1824 = vmatpush1.bf16.msra.mxu0 %v4610_v20  ;;  %1865 = vmatpush1.bf16.msra.mxu1 %v4613_v9 }
 0x736   :  { %1933 = vmatprep.subr.bf16.mxu0 %v4407_v39  ;;  %1974 = vmatprep.subr.bf16.mxu1 %v4410_v40 }
 0x738   :  { %1842 = vmatmul.mubr.bf16.vlgmr.msra.gmra.mrb[52].mxu0 %v1724_v15  ;;  %1883 = vmatmul.mubr.bf16.vlgmr.msra.gmra.mrb[52].mxu1 %v1724_v15  ;;  %v5838_v15 = vld [vmem:[#allocation33_spill] sm:$0xff] }
 0x739   :  { %1934 = vmatpush1.bf16.msra.mxu0 %v4413_v41  ;;  %1975 = vmatpush1.bf16.msra.mxu1 %v4416_v42 }
 0x73a   :  { %1935 = vmatprep.subr.bf16.mxu0 %v4419_v43  ;;  %1976 = vmatprep.subr.bf16.mxu1 %v5817_v34 }
 0x73b   :  { %1965 = vmatprep.mubr.bf16.mxu0 %v5692_v21  ;;  %2006 = vmatprep.mubr.bf16.mxu1 %v5692_v21 }
 0x73d   :  { %1936 = vmatpush1.bf16.msra.mxu0 %v5818_v52  ;;  %1977 = vmatpush1.bf16.msra.mxu1 %v5819_v59 }
 0x73e   :  { %1937 = vmatprep.subr.bf16.mxu0 %v5820_v49  ;;  %1978 = vmatprep.subr.bf16.mxu1 %v5821_v30 }
 0x741   :  { %1938 = vmatpush1.bf16.msra.mxu0 %v5822_v47  ;;  %1979 = vmatpush1.bf16.msra.mxu1 %v5823_v53 }
 0x742   :  { %1939 = vmatprep.subr.bf16.mxu0 %v5824_v51  ;;  %1980 = vmatprep.subr.bf16.mxu1 %v5825_v46 }
 0x745   :  { %1940 = vmatpush1.bf16.msra.mxu0 %v5826_v45  ;;  %1981 = vmatpush1.bf16.msra.mxu1 %v5827_v25 }
 0x746   :  { %1941 = vmatprep.subr.bf16.mxu0 %v5828_v48  ;;  %1982 = vmatprep.subr.bf16.mxu1 %v5829_v44  ;;  %v5839_v48 = vld [vmem:[#allocation34_spill] sm:$0xff]  ;;  %v5840_v44 = vld [vmem:[#allocation35_spill] sm:$0xff] }
 0x749   :  { %1942 = vmatpush1.bf16.msra.mxu0 %v5830_v61  ;;  %1983 = vmatpush1.bf16.msra.mxu1 %v5831_v29  ;;  %v5841_v61 = vld [vmem:[#allocation36_spill] sm:$0xff]  ;;  %v5842_v29 = vld [vmem:[#allocation37_spill] sm:$0xff] }
 0x74a   :  { %1943 = vmatprep.subr.bf16.mxu0 %v5832_v33  ;;  %1984 = vmatprep.subr.bf16.mxu1 %v5833_v11  ;;  %v5843_v33 = vld [vmem:[#allocation38_spill] sm:$0xff]  ;;  %v5844_v11 = vld [vmem:[#allocation39_spill] sm:$0xff] }
 0x74d   :  { %1944 = vmatpush1.bf16.msra.mxu0 %v5834_v37  ;;  %1985 = vmatpush1.bf16.msra.mxu1 %v5835_v56  ;;  %v5845_v37 = vld [vmem:[#allocation40_spill] sm:$0xff] }
 0x74e   :  { %1945 = vmatprep.subr.bf16.mxu0 %v5836_v63  ;;  %1986 = vmatprep.subr.bf16.mxu1 %v5837_v57 }
 0x751   :  { %1946 = vmatpush1.bf16.msra.mxu0 %v5838_v15  ;;  %1987 = vmatpush1.bf16.msra.mxu1 %v5839_v48 }
 0x752   :  { %1947 = vmatprep.subr.bf16.mxu0 %v5840_v44  ;;  %1988 = vmatprep.subr.bf16.mxu1 %v5841_v61 }
 0x755   :  { %1948 = vmatpush1.bf16.msra.mxu0 %v5842_v29  ;;  %1989 = vmatpush1.bf16.msra.mxu1 %v5843_v33 }
 0x756   :  { %2015 = vmatprep.subr.bf16.mxu0 %v5844_v11  ;;  %2056 = vmatprep.subr.bf16.mxu1 %v5845_v37 }
 0x7eb   :  { %v1761_v56 = vpop.f32.mrb[48].mxu0  ;;  %v1802_v63 = vpop.f32.mrb[48].mxu1 }
 0x7ec   :  { %v1763_v25 = vpop.f32.mrb[49].mxu0  ;;  %v1804_v57 = vpop.f32.mrb[49].mxu1 }
 0x7ed   :  { %v1765_v45 = vpop.f32.mrb[50].mxu0  ;;  %v1806_v15 = vpop.f32.mrb[50].mxu1 }
 0x7ee   :  { %v1766_v46 = vpop.f32.mrb[51].mxu0  ;;  %v1807_v48 = vpop.f32.mrb[51].mxu1 }
 0x80b   :  { %v1843_v51 = vpop.f32.mrb[52].mxu0  ;;  %v1884_v44 = vpop.f32.mrb[52].mxu1 }
 0x80c   :  { %v1844_v53 = vadd.f32 %v1843_v51, %v1761_v56  ;;  %v1885_v61 = vadd.f32 %v1884_v44, %v1802_v63  ;;  %v1845_v47 = vpop.f32.mrb[53].mxu0  ;;  %v1886_v29 = vpop.f32.mrb[53].mxu1 }
 0x80d   :  { %v1846_v30 = vadd.f32 %v1845_v47, %v1763_v25  ;;  %v1887_v33 = vadd.f32 %v1886_v29, %v1804_v57  ;;  %v1847_v49 = vpop.f32.mrb[54].mxu0  ;;  %v1888_v11 = vpop.f32.mrb[54].mxu1 }
 0x80e   :  { %v1891_v37 = vadd.f32 %v1844_v53, %v4182_v31  ;;  %v1848_v59 = vpop.f32.mrb[55].mxu0  ;;  %v1889_v52 = vpop.f32.mrb[55].mxu1  ;;  %v1893_v46 = vadd.f32 %v1885_v61, %v4187_v19 }
 0x80f   :  { %v1892_v34 = vadd.f32 %v1846_v30, %v4184_v24  ;;  %v1894_v51 = vadd.f32 %v1887_v33, %v4191_v36 }
 0x810   :  { %v1895_v45 = vmul.f32 0.5, %v1891_v37 }
 0x811   :  { %v1899_v15 = vmul.f32 0.5, %v1892_v34  ;;  %v1904_v48 = vmul.f32 0.5, %v1894_v51  ;;  %v1919_v34 = vpop.permute.xlu0 %1918  ;;  %v5847_v51 = vld [vmem:[#allocation51_spill] sm:$0xff] }
 0x812   :  { %3481 = vtanh.f32 %v1895_v45  ;;  %vm1920_vm3 = vcmp.eq.s32.totalorder %v1919_v34, 1  ;;  %v5863_v34 = vld [vmem:[#allocation29_spill] sm:$0xff] }
 0x813   :  { %3483 = vtanh.f32 %v1899_v15 }
 0x814   :  { %3485 = vtanh.f32 %v1893_v46 }
 0x815   :  { %3487 = vtanh.f32 %v1904_v48  ;;  %v5848_v48 = vld [vmem:[#allocation52_spill] sm:$0xff] }
 0x81c   :  { %v3482_v47 = vpop.eup %3481 }
 0x81d   :  { %v3484_v25 = vpop.eup %3483  ;;  %v1897_v49 = vmul.f32 0.5, %v3482_v47  ;;  %v5851_v47 = vld [vmem:[#allocation55_spill] sm:$0xff] }
 0x81e   :  { %v1901_v44 = vmul.f32 0.5, %v3484_v25  ;;  %v3486_v59 = vpop.eup %3485  ;;  %v5855_v25 = vld [vmem:[#allocation21_spill] sm:$0xff] }
 0x81f   :  { %v1898_v53 = vadd.f32 0.5, %v1897_v49  ;;  %v3488_v33 = vpop.eup %3487  ;;  %v5856_v49 = vld [vmem:[#allocation22_spill] sm:$0xff] }
 0x820   :  { %v1902_v52 = vadd.f32 0.5, %v1901_v44  ;;  %v1906_v37 = vmul.f32 0.5, %v3488_v33  ;;  %v5857_v44 = vld [vmem:[#allocation23_spill] sm:$0xff] }
 0x821   :  { %v1910_v29 = vmul.f32 %v3486_v59, %v1898_v53  ;;  %v5858_v53 = vld [vmem:[#allocation24_spill] sm:$0xff]  ;;  %v5859_v59 = vld [vmem:[#allocation25_spill] sm:$0xff]  ;;  %v5865_v33 = vld [vmem:[#allocation31_spill] sm:$0xff] }
 0x822   :  { %v1909_v30 = vmul.f32 %v1902_v52, %v4739_v17  ;;  %v1907_v56 = vadd.f32 0.5, %v1906_v37  ;;  %v5860_v52 = vld [vmem:[#allocation26_spill] sm:$0xff]  ;;  %v5866_v37 = vld [vmem:[#allocation32_spill] sm:$0xff] }
 0x824   :  { %v1911_v11 = vadd.f32 %v1910_v29, %v1909_v30  ;;  %v5861_v29 = vld [vmem:[#allocation27_spill] sm:$0xff]  ;;  %v5862_v30 = vld [vmem:[#allocation28_spill] sm:$0xff] }
 0x826   :  { %3489 = vtanh.f32 %v1911_v11  ;;  %v4820_v61 = vsel %vm1920_vm3, %v1911_v11, %v4739_v17  ;;  %v1930_v17 = vld [vmem:[#allocation6 + $0x1c] sm:$0xf] }
 0x827   :  { %v5864_v11 = vld [vmem:[#allocation30_spill] sm:$0xff] }
 0x830   :  { %v3490_v63 = vpop.eup %3489 }
 0x831   :  { %v1913_v57 = vmul.f32 %v3490_v63, %v1907_v56  ;;  %v5867_v56 = vld [vmem:[#allocation33_spill] sm:$0xff]  ;;  %v5868_v63 = vld [vmem:[#allocation34_spill] sm:$0xff] }
 0x833   :  { %v4823_v45 = vsel %vm1920_vm3, %v1913_v57, %v4742_v54  ;;  %v1926_v15 = vsel %vm1920_vm3, %v1913_v57, 0.0  ;;  %v5846_v54 = vld [vmem:[#allocation50_spill] sm:$0xff]  ;;  %v5869_v57 = vld [vmem:[#allocation35_spill] sm:$0xff] }
 0x834   :  { %1927 = vst [vmem:[#allocation12 + $0x30] sm:$0xff] %v1926_v15  ;;  %v1932_v46 = vpack.c.bf16 %v4823_v45, %v4823_v45  ;;  %v5870_v15 = vld [vmem:[#allocation36_spill] sm:$0xff] }
 0x836   :  { %1966 = vmatmul.mubr.bf16.vlgmr.msra.gmra.mrb[56].mxu0 %v1932_v46  ;;  %2007 = vmatmul.mubr.bf16.vlgmr.msra.gmra.mrb[56].mxu1 %v1932_v46  ;;  %v5871_v46 = vld [vmem:[#allocation37_spill] sm:$0xff] }
 0x837   :  { %2016 = vmatpush1.bf16.msra.mxu0 %v4524_v1  ;;  %2057 = vmatpush1.bf16.msra.mxu1 %v4527_v8 }
 0x838   :  { %2017 = vmatprep.subr.bf16.mxu0 %v4530_v16  ;;  %2058 = vmatprep.subr.bf16.mxu1 %v4533_v3 }
 0x839   :  { %2047 = vmatprep.mubr.bf16.mxu0 %v5692_v21  ;;  %2088 = vmatprep.mubr.bf16.mxu1 %v5692_v21 }
 0x83b   :  { %2018 = vmatpush1.bf16.msra.mxu0 %v4538_v32  ;;  %2059 = vmatpush1.bf16.msra.mxu1 %v4541_v26 }
 0x83c   :  { %2019 = vmatprep.subr.bf16.mxu0 %v4544_v55  ;;  %2060 = vmatprep.subr.bf16.mxu1 %v4547_v2 }
 0x83f   :  { %2020 = vmatpush1.bf16.msra.mxu0 %v4550_v13  ;;  %2061 = vmatpush1.bf16.msra.mxu1 %v4553_v4 }
 0x840   :  { %2021 = vmatprep.subr.bf16.mxu0 %v4556_v5  ;;  %2062 = vmatprep.subr.bf16.mxu1 %v4559_v6 }
 0x843   :  { %2022 = vmatpush1.bf16.msra.mxu0 %v4562_v50  ;;  %2063 = vmatpush1.bf16.msra.mxu1 %v4565_v10 }
 0x844   :  { %2023 = vmatprep.subr.bf16.mxu0 %v4568_v14  ;;  %2064 = vmatprep.subr.bf16.mxu1 %v4571_v18 }
 0x847   :  { %2024 = vmatpush1.bf16.msra.mxu0 %v4574_v7  ;;  %2065 = vmatpush1.bf16.msra.mxu1 %v5788_v12 }
 0x848   :  { %2025 = vmatprep.subr.bf16.mxu0 %v5789_v27  ;;  %2066 = vmatprep.subr.bf16.mxu1 %v5790_v0 }
 0x84b   :  { %2026 = vmatpush1.bf16.msra.mxu0 %v5791_v23  ;;  %2067 = vmatpush1.bf16.msra.mxu1 %v5792_v62 }
 0x84c   :  { %2027 = vmatprep.subr.bf16.mxu0 %v5793_v60  ;;  %2068 = vmatprep.subr.bf16.mxu1 %v5794_v58 }
 0x84f   :  { %2028 = vmatpush1.bf16.msra.mxu0 %v5795_v35  ;;  %2069 = vmatpush1.bf16.msra.mxu1 %v4601_v22 }
 0x850   :  { %2029 = vmatprep.subr.bf16.mxu0 %v4604_v28  ;;  %2070 = vmatprep.subr.bf16.mxu1 %v4607_v38 }
 0x853   :  { %2030 = vmatpush1.bf16.msra.mxu0 %v4610_v20  ;;  %2071 = vmatpush1.bf16.msra.mxu1 %v4613_v9 }
 0x854   :  { %2139 = vmatprep.subr.bf16.mxu0 %v4407_v39  ;;  %2180 = vmatprep.subr.bf16.mxu1 %v4410_v40  ;;  %v5849_v39 = vld [vmem:[#allocation53_spill] sm:$0xff]  ;;  %v5850_v40 = vld [vmem:[#allocation54_spill] sm:$0xff] }
 0x856   :  { %2048 = vmatmul.mubr.bf16.vlgmr.msra.gmra.mrb[60].mxu0 %v1930_v17  ;;  %2089 = vmatmul.mubr.bf16.vlgmr.msra.gmra.mrb[60].mxu1 %v1930_v17  ;;  %v5872_v17 = vld [vmem:[#allocation38_spill] sm:$0xff] }
 0x857   :  { %2140 = vmatpush1.bf16.msra.mxu0 %v4413_v41  ;;  %2181 = vmatpush1.bf16.msra.mxu1 %v4416_v42  ;;  %v5852_v41 = vld [vmem:[#allocation56_spill] sm:$0xff]  ;;  %v5853_v42 = vld [vmem:[#allocation49_spill] sm:$0xff] }
 0x858   :  { %2141 = vmatprep.subr.bf16.mxu0 %v4419_v43  ;;  %2182 = vmatprep.subr.bf16.mxu1 %v5846_v54  ;;  %v5854_v43 = vld [vmem:[#allocation20_spill] sm:$0xff]  ;;  %v5873_v54 = vld [vmem:[#allocation39_spill] sm:$0xff] }
 0x859   :  { %2171 = vmatprep.mubr.bf16.mxu0 %v5692_v21  ;;  %2212 = vmatprep.mubr.bf16.mxu1 %v5692_v21 }
 0x85b   :  { %2142 = vmatpush1.bf16.msra.mxu0 %v5847_v51  ;;  %2183 = vmatpush1.bf16.msra.mxu1 %v5848_v48  ;;  %v5874_v51 = vld [vmem:[#allocation40_spill] sm:$0xff] }
 0x85c   :  { %2143 = vmatprep.subr.bf16.mxu0 %v5849_v39  ;;  %2184 = vmatprep.subr.bf16.mxu1 %v5850_v40 }
 0x85f   :  { %2144 = vmatpush1.bf16.msra.mxu0 %v5851_v47  ;;  %2185 = vmatpush1.bf16.msra.mxu1 %v5852_v41 }
 0x860   :  { %2145 = vmatprep.subr.bf16.mxu0 %v5853_v42  ;;  %2186 = vmatprep.subr.bf16.mxu1 %v5854_v43 }
 0x863   :  { %2146 = vmatpush1.bf16.msra.mxu0 %v5855_v25  ;;  %2187 = vmatpush1.bf16.msra.mxu1 %v5856_v49 }
 0x864   :  { %2147 = vmatprep.subr.bf16.mxu0 %v5857_v44  ;;  %2188 = vmatprep.subr.bf16.mxu1 %v5858_v53 }
 0x867   :  { %2148 = vmatpush1.bf16.msra.mxu0 %v5859_v59  ;;  %2189 = vmatpush1.bf16.msra.mxu1 %v5860_v52 }
 0x868   :  { %2149 = vmatprep.subr.bf16.mxu0 %v5861_v29  ;;  %2190 = vmatprep.subr.bf16.mxu1 %v5862_v30 }
 0x86b   :  { %2150 = vmatpush1.bf16.msra.mxu0 %v5863_v34  ;;  %2191 = vmatpush1.bf16.msra.mxu1 %v5864_v11 }
 0x86c   :  { %2151 = vmatprep.subr.bf16.mxu0 %v5865_v33  ;;  %2192 = vmatprep.subr.bf16.mxu1 %v5866_v37 }
 0x86f   :  { %2152 = vmatpush1.bf16.msra.mxu0 %v5867_v56  ;;  %2193 = vmatpush1.bf16.msra.mxu1 %v5868_v63 }
 0x870   :  { %2153 = vmatprep.subr.bf16.mxu0 %v5869_v57  ;;  %2194 = vmatprep.subr.bf16.mxu1 %v5870_v15 }
 0x873   :  { %2154 = vmatpush1.bf16.msra.mxu0 %v5871_v46  ;;  %2195 = vmatpush1.bf16.msra.mxu1 %v5872_v17 }
 0x874   :  { %2221 = vmatprep.subr.bf16.mxu0 %v5873_v54  ;;  %2262 = vmatprep.subr.bf16.mxu1 %v5874_v51 }
 0x909   :  { %v1967_v48 = vpop.f32.mrb[56].mxu0  ;;  %v2008_v39 = vpop.f32.mrb[56].mxu1 }
 0x90a   :  { %v1969_v40 = vpop.f32.mrb[57].mxu0  ;;  %v2010_v47 = vpop.f32.mrb[57].mxu1 }
 0x90b   :  { %v1971_v41 = vpop.f32.mrb[58].mxu0  ;;  %v2012_v42 = vpop.f32.mrb[58].mxu1 }
 0x90c   :  { %v1972_v43 = vpop.f32.mrb[59].mxu0  ;;  %v2013_v25 = vpop.f32.mrb[59].mxu1 }
 0x929   :  { %v2049_v49 = vpop.f32.mrb[60].mxu0  ;;  %v2090_v44 = vpop.f32.mrb[60].mxu1 }
 0x92a   :  { %v2050_v53 = vadd.f32 %v2049_v49, %v1967_v48  ;;  %v2091_v59 = vadd.f32 %v2090_v44, %v2008_v39  ;;  %v2051_v52 = vpop.f32.mrb[61].mxu0  ;;  %v2092_v29 = vpop.f32.mrb[61].mxu1 }
 0x92b   :  { %v2052_v30 = vadd.f32 %v2051_v52, %v1969_v40  ;;  %v2093_v34 = vadd.f32 %v2092_v29, %v2010_v47  ;;  %v2053_v11 = vpop.f32.mrb[62].mxu0  ;;  %v2094_v33 = vpop.f32.mrb[62].mxu1 }
 0x92c   :  { %v2097_v37 = vadd.f32 %v2050_v53, %v4182_v31  ;;  %v2054_v56 = vpop.f32.mrb[63].mxu0  ;;  %v2095_v63 = vpop.f32.mrb[63].mxu1  ;;  %v2099_v17 = vadd.f32 %v2091_v59, %v4187_v19 }
 0x92d   :  { %v2098_v57 = vadd.f32 %v2052_v30, %v4184_v24  ;;  %v2100_v54 = vadd.f32 %v2093_v34, %v4191_v36  ;;  %v2125_v44 = vpop.permute.xlu1 %2124  ;;  %v5035_v63 = vld [vmem:[#allocation11 + $0xe8] ss:$16 sps:$4 sm:$0xff]  }
 0x92e   :  { %v2101_v15 = vmul.f32 0.5, %v2097_v37  ;;  %vm2126_vm4 = vcmp.eq.s32.totalorder %v2125_v44, 1  ;;  %5901 = vst [vmem:[#allocation30_spill] sm:$0xff] %v5035_v63 }
 0x92f   :  { %v2105_v46 = vmul.f32 0.5, %v2098_v57  ;;  %v2110_v51 = vmul.f32 0.5, %v2100_v54  ;;  %v5038_v57 = vld [vmem:[#allocation9 + $0x4] ss:$16 sps:$4 sm:$0xff]  }
 0x930   :  { %3491 = vtanh.f32 %v2101_v15  ;;  %5902 = vst [vmem:[#allocation31_spill] sm:$0xff] %v5038_v57  ;;  %v5041_v15 = vld [vmem:[#allocation9 + $0xc] ss:$16 sps:$4 sm:$0xff]  }
 0x931   :  { %3493 = vtanh.f32 %v2105_v46  ;;  %5903 = vst [vmem:[#allocation32_spill] sm:$0xff] %v5041_v15 }
 0x932   :  { %3495 = vtanh.f32 %v2099_v17 }
 0x933   :  { %3497 = vtanh.f32 %v2110_v51 }
 0x93a   :  { %v3492_v48 = vpop.eup %3491 }
 0x93b   :  { %v3494_v39 = vpop.eup %3493  ;;  %v2103_v40 = vmul.f32 0.5, %v3492_v48 }
 0x93c   :  { %v2107_v47 = vmul.f32 0.5, %v3494_v39  ;;  %v3496_v42 = vpop.eup %3495 }
 0x93d   :  { %v2104_v41 = vadd.f32 0.5, %v2103_v40  ;;  %v3498_v52 = vpop.eup %3497 }
 0x93e   :  { %v2108_v43 = vadd.f32 0.5, %v2107_v47  ;;  %v2112_v29 = vmul.f32 0.5, %v3498_v52 }
 0x93f   :  { %v2116_v25 = vmul.f32 %v3496_v42, %v2104_v41 }
 0x940   :  { %v2115_v49 = vmul.f32 %v2108_v43, %v4820_v61  ;;  %v2113_v30 = vadd.f32 0.5, %v2112_v29 }
 0x942   :  { %v2117_v53 = vadd.f32 %v2116_v25, %v2115_v49 }
 0x944   :  { %3499 = vtanh.f32 %v2117_v53  ;;  %v4901_v59 = vsel %vm2126_vm4, %v2117_v53, %v4820_v61  ;;  %v5029_v61 = vld [vmem:[#allocation11 + $0xec] ss:$16 sps:$4 sm:$0xff]  }
 0x945   :  { %5899 = vst [vmem:[#allocation28_spill] sm:$0xff] %v5029_v61 }
 0x94e   :  { %v3500_v34 = vpop.eup %3499 }
 0x94f   :  { %v2119_v11 = vmul.f32 %v3500_v34, %v2113_v30 }
 0x951   :  { %v4904_v33 = vsel %vm2126_vm4, %v2119_v11, %v4823_v45  ;;  %v2132_v37 = vsel %vm2126_vm4, %v2119_v11, 0.0  ;;  %v5032_v45 = vld [vmem:[#allocation11 + $0xe0] ss:$16 sps:$4 sm:$0xff]  }
 0x952   :  { %2133 = vst [vmem:[#allocation12 + $0x38] sm:$0xff] %v2132_v37  ;;  %v2138_v56 = vpack.c.bf16 %v4904_v33, %v4904_v33  ;;  %5900 = vst [vmem:[#allocation29_spill] sm:$0xff] %v5032_v45 }
 0x954   :  { %2172 = vmatmul.mubr.bf16.vlgmr.msra.gmra.mrb[64].mxu0 %v2138_v56  ;;  %2213 = vmatmul.mubr.bf16.vlgmr.msra.gmra.mrb[64].mxu1 %v2138_v56 }
 0x955   :  { %2222 = vmatpush1.bf16.msra.mxu0 %v4524_v1  ;;  %2263 = vmatpush1.bf16.msra.mxu1 %v4527_v8  ;;  %v2136_v1 = vld [vmem:[#allocation6 + $0x20] sm:$0xf]  ;;  %v4940_v8 = vld [vmem:[#allocation11 + $0x4] ss:$16 sps:$4 sm:$0xff]  }
 0x956   :  { %2223 = vmatprep.subr.bf16.mxu0 %v4530_v16  ;;  %2264 = vmatprep.subr.bf16.mxu1 %v4533_v3  ;;  %v4943_v16 = vld [vmem:[#allocation11 + $0xc] ss:$16 sps:$4 sm:$0xff]   ;;  %v4946_v3 = vld [vmem:[#allocation11] ss:$16 sps:$4 sm:$0xff]  }
 0x957   :  { %2253 = vmatprep.mubr.bf16.mxu0 %v5692_v21  ;;  %2294 = vmatprep.mubr.bf16.mxu1 %v5692_v21 }
 0x959   :  { %2224 = vmatpush1.bf16.msra.mxu0 %v4538_v32  ;;  %2265 = vmatpush1.bf16.msra.mxu1 %v4541_v26  ;;  %v4949_v32 = vld [vmem:[#allocation11 + $0x8] ss:$16 sps:$4 sm:$0xff]   ;;  %v4952_v26 = vld [vmem:[#allocation11 + $0x24] ss:$16 sps:$4 sm:$0xff]  }
 0x95a   :  { %2225 = vmatprep.subr.bf16.mxu0 %v4544_v55  ;;  %2266 = vmatprep.subr.bf16.mxu1 %v4547_v2  ;;  %v4955_v55 = vld [vmem:[#allocation11 + $0x2c] ss:$16 sps:$4 sm:$0xff]   ;;  %v4960_v2 = vld [vmem:[#allocation11 + $0x20] ss:$16 sps:$4 sm:$0xff]  }
 0x95b   :  { %5875 = vst [vmem:[#allocation41_spill] sm:$0xff] %v4955_v55  ;;  %5876 = vst [vmem:[#allocation42_spill] sm:$0xff] %v4960_v2 }
 0x95d   :  { %2226 = vmatpush1.bf16.msra.mxu0 %v4550_v13  ;;  %2267 = vmatpush1.bf16.msra.mxu1 %v4553_v4  ;;  %v4963_v13 = vld [vmem:[#allocation11 + $0x28] ss:$16 sps:$4 sm:$0xff]   ;;  %v4966_v4 = vld [vmem:[#allocation11 + $0x44] ss:$16 sps:$4 sm:$0xff]  }
 0x95e   :  { %2227 = vmatprep.subr.bf16.mxu0 %v4556_v5  ;;  %2268 = vmatprep.subr.bf16.mxu1 %v4559_v6  ;;  %5877 = vst [vmem:[#allocation43_spill] sm:$0xff] %v4963_v13  ;;  %5878 = vst [vmem:[#allocation44_spill] sm:$0xff] %v4966_v4  ;;  %v4969_v5 = vld [vmem:[#allocation11 + $0x4c] ss:$16 sps:$4 sm:$0xff]   ;;  %v4972_v6 = vld [vmem:[#allocation11 + $0x40] ss:$16 sps:$4 sm:$0xff]  }
 0x95f   :  { %5879 = vst [vmem:[#allocation45_spill] sm:$0xff] %v4969_v5  ;;  %5880 = vst [vmem:[#allocation46_spill] sm:$0xff] %v4972_v6 }
 0x961   :  { %2228 = vmatpush1.bf16.msra.mxu0 %v4562_v50  ;;  %2269 = vmatpush1.bf16.msra.mxu1 %v4565_v10  ;;  %v4975_v50 = vld [vmem:[#allocation11 + $0x48] ss:$16 sps:$4 sm:$0xff]   ;;  %v4978_v10 = vld [vmem:[#allocation11 + $0x64] ss:$16 sps:$4 sm:$0xff]  }
 0x962   :  { %2229 = vmatprep.subr.bf16.mxu0 %v4568_v14  ;;  %2270 = vmatprep.subr.bf16.mxu1 %v4571_v18  ;;  %5881 = vst [vmem:[#allocation47_spill] sm:$0xff] %v4975_v50  ;;  %5882 = vst [vmem:[#allocation48_spill] sm:$0xff] %v4978_v10  ;;  %v4981_v14 = vld [vmem:[#allocation11 + $0x6c] ss:$16 sps:$4 sm:$0xff]   ;;  %v4984_v18 = vld [vmem:[#allocation11 + $0x60] ss:$16 sps:$4 sm:$0xff]  }
 0x963   :  { %5883 = vst [vmem:[#allocation50_spill] sm:$0xff] %v4981_v14  ;;  %5884 = vst [vmem:[#allocation51_spill] sm:$0xff] %v4984_v18 }
 0x965   :  { %2230 = vmatpush1.bf16.msra.mxu0 %v4574_v7  ;;  %2271 = vmatpush1.bf16.msra.mxu1 %v5788_v12  ;;  %v4987_v7 = vld [vmem:[#allocation11 + $0x68] ss:$16 sps:$4 sm:$0xff]   ;;  %v5005_v12 = vld [vmem:[#allocation11 + $0xac] ss:$16 sps:$4 sm:$0xff]  }
 0x966   :  { %2231 = vmatprep.subr.bf16.mxu0 %v5789_v27  ;;  %2272 = vmatprep.subr.bf16.mxu1 %v5790_v0  ;;  %5885 = vst [vmem:[#allocation52_spill] sm:$0xff] %v4987_v7  ;;  %5891 = vst [vmem:[#allocation20_spill] sm:$0xff] %v5005_v12  ;;  %v5008_v27 = vld [vmem:[#allocation11 + $0xa0] ss:$16 sps:$4 sm:$0xff]   ;;  %v5011_v0 = vld [vmem:[#allocation11 + $0xa8] ss:$16 sps:$4 sm:$0xff]  }
 0x967   :  { %5892 = vst [vmem:[#allocation21_spill] sm:$0xff] %v5008_v27  ;;  %5893 = vst [vmem:[#allocation22_spill] sm:$0xff] %v5011_v0 }
 0x969   :  { %2232 = vmatpush1.bf16.msra.mxu0 %v5791_v23  ;;  %2273 = vmatpush1.bf16.msra.mxu1 %v5792_v62  ;;  %v5014_v23 = vld [vmem:[#allocation11 + $0xc4] ss:$16 sps:$4 sm:$0xff]   ;;  %v5017_v62 = vld [vmem:[#allocation11 + $0xcc] ss:$16 sps:$4 sm:$0xff]  }
 0x96a   :  { %2233 = vmatprep.subr.bf16.mxu0 %v5793_v60  ;;  %2274 = vmatprep.subr.bf16.mxu1 %v5794_v58  ;;  %5894 = vst [vmem:[#allocation23_spill] sm:$0xff] %v5014_v23  ;;  %5895 = vst [vmem:[#allocation24_spill] sm:$0xff] %v5017_v62  ;;  %v5020_v60 = vld [vmem:[#allocation11 + $0xc0] ss:$16 sps:$4 sm:$0xff]   ;;  %v5023_v58 = vld [vmem:[#allocation11 + $0xc8] ss:$16 sps:$4 sm:$0xff]  }
 0x96b   :  { %5896 = vst [vmem:[#allocation25_spill] sm:$0xff] %v5020_v60  ;;  %5897 = vst [vmem:[#allocation26_spill] sm:$0xff] %v5023_v58 }
 0x96d   :  { %2234 = vmatpush1.bf16.msra.mxu0 %v5795_v35  ;;  %2275 = vmatpush1.bf16.msra.mxu1 %v4601_v22  ;;  %v4993_v22 = vld [vmem:[#allocation11 + $0x8c] ss:$16 sps:$4 sm:$0xff]   ;;  %v5026_v35 = vld [vmem:[#allocation11 + $0xe4] ss:$16 sps:$4 sm:$0xff]  }
 0x96e   :  { %2235 = vmatprep.subr.bf16.mxu0 %v4604_v28  ;;  %2276 = vmatprep.subr.bf16.mxu1 %v4607_v38  ;;  %5887 = vst [vmem:[#allocation54_spill] sm:$0xff] %v4993_v22  ;;  %v4996_v28 = vld [vmem:[#allocation11 + $0x80] ss:$16 sps:$4 sm:$0xff]   ;;  %v4999_v38 = vld [vmem:[#allocation11 + $0x88] ss:$16 sps:$4 sm:$0xff]   ;;  %5898 = vst [vmem:[#allocation27_spill] sm:$0xff] %v5026_v35 }
 0x96f   :  { %5888 = vst [vmem:[#allocation55_spill] sm:$0xff] %v4996_v28  ;;  %5889 = vst [vmem:[#allocation56_spill] sm:$0xff] %v4999_v38 }
 0x971   :  { %2236 = vmatpush1.bf16.msra.mxu0 %v4610_v20  ;;  %2277 = vmatpush1.bf16.msra.mxu1 %v4613_v9  ;;  %v4990_v9 = vld [vmem:[#allocation11 + $0x84] ss:$16 sps:$4 sm:$0xff]  }
 0x972   :  { %2345 = vmatprep.subr.bf16.mxu0 %v4940_v8  ;;  %2386 = vmatprep.subr.bf16.mxu1 %v4943_v16  ;;  %5886 = vst [vmem:[#allocation53_spill] sm:$0xff] %v4990_v9  ;;  %v5002_v20 = vld [vmem:[#allocation11 + $0xa4] ss:$16 sps:$4 sm:$0xff]  }
 0x973   :  { %5890 = vst [vmem:[#allocation49_spill] sm:$0xff] %v5002_v20 }
 0x974   :  { %2254 = vmatmul.mubr.bf16.vlgmr.msra.gmra.mrb[68].mxu0 %v2136_v1  ;;  %2295 = vmatmul.mubr.bf16.vlgmr.msra.gmra.mrb[68].mxu1 %v2136_v1 }
 0x975   :  { %2346 = vmatpush1.bf16.msra.mxu0 %v4946_v3  ;;  %2387 = vmatpush1.bf16.msra.mxu1 %v4949_v32 }
 0x976   :  { %2347 = vmatprep.subr.bf16.mxu0 %v4952_v26  ;;  %2388 = vmatprep.subr.bf16.mxu1 %v4955_v55 }
 0x977   :  { %2377 = vmatprep.mubr.bf16.mxu0 %v5692_v21  ;;  %2418 = vmatprep.mubr.bf16.mxu1 %v5692_v21 }
 0x979   :  { %2348 = vmatpush1.bf16.msra.mxu0 %v4960_v2  ;;  %2389 = vmatpush1.bf16.msra.mxu1 %v4963_v13 }
 0x97a   :  { %2349 = vmatprep.subr.bf16.mxu0 %v4966_v4  ;;  %2390 = vmatprep.subr.bf16.mxu1 %v4969_v5 }
 0x97d   :  { %2350 = vmatpush1.bf16.msra.mxu0 %v4972_v6  ;;  %2391 = vmatpush1.bf16.msra.mxu1 %v4975_v50 }
 0x97e   :  { %2351 = vmatprep.subr.bf16.mxu0 %v4978_v10  ;;  %2392 = vmatprep.subr.bf16.mxu1 %v4981_v14 }
 0x981   :  { %2352 = vmatpush1.bf16.msra.mxu0 %v4984_v18  ;;  %2393 = vmatpush1.bf16.msra.mxu1 %v4987_v7 }
 0x982   :  { %2353 = vmatprep.subr.bf16.mxu0 %v4990_v9  ;;  %2394 = vmatprep.subr.bf16.mxu1 %v4993_v22 }
 0x985   :  { %2354 = vmatpush1.bf16.msra.mxu0 %v4996_v28  ;;  %2395 = vmatpush1.bf16.msra.mxu1 %v4999_v38 }
 0x986   :  { %2355 = vmatprep.subr.bf16.mxu0 %v5002_v20  ;;  %2396 = vmatprep.subr.bf16.mxu1 %v5005_v12 }
 0x989   :  { %2356 = vmatpush1.bf16.msra.mxu0 %v5008_v27  ;;  %2397 = vmatpush1.bf16.msra.mxu1 %v5011_v0 }
 0x98a   :  { %2357 = vmatprep.subr.bf16.mxu0 %v5014_v23  ;;  %2398 = vmatprep.subr.bf16.mxu1 %v5017_v62 }
 0x98d   :  { %2358 = vmatpush1.bf16.msra.mxu0 %v5020_v60  ;;  %2399 = vmatpush1.bf16.msra.mxu1 %v5023_v58 }
 0x98e   :  { %2359 = vmatprep.subr.bf16.mxu0 %v5026_v35  ;;  %2400 = vmatprep.subr.bf16.mxu1 %v5029_v61 }
 0x991   :  { %2360 = vmatpush1.bf16.msra.mxu0 %v5032_v45  ;;  %2401 = vmatpush1.bf16.msra.mxu1 %v5035_v63 }
 0x992   :  { %2427 = vmatprep.subr.bf16.mxu0 %v5038_v57  ;;  %2468 = vmatprep.subr.bf16.mxu1 %v5041_v15 }
 0xa27   :  { %v2173_v46 = vpop.f32.mrb[64].mxu0  ;;  %v2214_v17 = vpop.f32.mrb[64].mxu1 }
 0xa28   :  { %v2175_v54 = vpop.f32.mrb[65].mxu0  ;;  %v2216_v51 = vpop.f32.mrb[65].mxu1 }
 0xa29   :  { %v2177_v48 = vpop.f32.mrb[66].mxu0  ;;  %v2218_v39 = vpop.f32.mrb[66].mxu1 }
 0xa2a   :  { %v2178_v40 = vpop.f32.mrb[67].mxu0  ;;  %v2219_v47 = vpop.f32.mrb[67].mxu1 }
 0xa47   :  { %v2255_v41 = vpop.f32.mrb[68].mxu0  ;;  %v2296_v42 = vpop.f32.mrb[68].mxu1 }
 0xa48   :  { %v2256_v43 = vadd.f32 %v2255_v41, %v2173_v46  ;;  %v2297_v25 = vadd.f32 %v2296_v42, %v2214_v17  ;;  %v2257_v49 = vpop.f32.mrb[69].mxu0  ;;  %v2298_v44 = vpop.f32.mrb[69].mxu1 }
 0xa49   :  { %v2258_v53 = vadd.f32 %v2257_v49, %v2175_v54  ;;  %v2299_v52 = vadd.f32 %v2298_v44, %v2216_v51  ;;  %v2259_v29 = vpop.f32.mrb[70].mxu0  ;;  %v2300_v30 = vpop.f32.mrb[70].mxu1 }
 0xa4a   :  { %v2303_v34 = vadd.f32 %v2256_v43, %v4182_v31  ;;  %v2260_v11 = vpop.f32.mrb[71].mxu0  ;;  %v2301_v37 = vpop.f32.mrb[71].mxu1  ;;  %v2305_v39 = vadd.f32 %v2297_v25, %v4187_v19 }
 0xa4b   :  { %v2304_v56 = vadd.f32 %v2258_v53, %v4184_v24  ;;  %v2306_v46 = vadd.f32 %v2299_v52, %v4191_v36  ;;  %v2331_v53 = vpop.permute.xlu0 %2330 }
 0xa4c   :  { %v2307_v1 = vmul.f32 0.5, %v2303_v34  ;;  %vm2332_vm5 = vcmp.eq.s32.totalorder %v2331_v53, 1  ;;  %v5101_v53 = vld [vmem:[#allocation9 + $0x84] ss:$16 sps:$4 sm:$0xff]  }
 0xa4d   :  { %v2311_v48 = vmul.f32 0.5, %v2304_v56  ;;  %v2316_v17 = vmul.f32 0.5, %v2306_v46  ;;  %v5063_v46 = vld [vmem:[#allocation9 + $0x24] ss:$16 sps:$4 sm:$0xff]  }
 0xa4e   :  { %3501 = vtanh.f32 %v2307_v1 }
 0xa4f   :  { %3503 = vtanh.f32 %v2311_v48 }
 0xa50   :  { %3505 = vtanh.f32 %v2305_v39  ;;  %v5057_v39 = vld [vmem:[#allocation9] ss:$16 sps:$4 sm:$0xff]  }
 0xa51   :  { %3507 = vtanh.f32 %v2316_v17  ;;  %v5071_v17 = vld [vmem:[#allocation9 + $0x20] ss:$16 sps:$4 sm:$0xff]  }
 0xa58   :  { %v3502_v54 = vpop.eup %3501 }
 0xa59   :  { %v3504_v51 = vpop.eup %3503  ;;  %v2309_v40 = vmul.f32 0.5, %v3502_v54  ;;  %v5074_v54 = vld [vmem:[#allocation9 + $0x28] ss:$16 sps:$4 sm:$0xff]  }
 0xa5a   :  { %v2313_v47 = vmul.f32 0.5, %v3504_v51  ;;  %v3506_v42 = vpop.eup %3505  ;;  %v5077_v51 = vld [vmem:[#allocation9 + $0x44] ss:$16 sps:$4 sm:$0xff]  }
 0xa5b   :  { %v2310_v41 = vadd.f32 0.5, %v2309_v40  ;;  %v3508_v52 = vpop.eup %3507  ;;  %v5080_v40 = vld [vmem:[#allocation9 + $0x4c] ss:$16 sps:$4 sm:$0xff]  }
 0xa5c   :  { %v2314_v43 = vadd.f32 0.5, %v2313_v47  ;;  %v2318_v30 = vmul.f32 0.5, %v3508_v52  ;;  %v5083_v47 = vld [vmem:[#allocation9 + $0x40] ss:$16 sps:$4 sm:$0xff]  }
 0xa5d   :  { %v2322_v49 = vmul.f32 %v3506_v42, %v2310_v41  ;;  %v5086_v41 = vld [vmem:[#allocation9 + $0x48] ss:$16 sps:$4 sm:$0xff]   ;;  %v5089_v42 = vld [vmem:[#allocation9 + $0x64] ss:$16 sps:$4 sm:$0xff]   ;;  %v5107_v52 = vld [vmem:[#allocation9 + $0x80] ss:$16 sps:$4 sm:$0xff]  }
 0xa5e   :  { %v2321_v44 = vmul.f32 %v2314_v43, %v4901_v59  ;;  %v2319_v34 = vadd.f32 0.5, %v2318_v30  ;;  %v5092_v43 = vld [vmem:[#allocation9 + $0x6c] ss:$16 sps:$4 sm:$0xff]   ;;  %v5110_v30 = vld [vmem:[#allocation9 + $0x88] ss:$16 sps:$4 sm:$0xff]  }
 0xa5f   :  { %5904 = vst [vmem:[#allocation33_spill] sm:$0xff] %v5110_v30 }
 0xa60   :  { %v2323_v29 = vadd.f32 %v2322_v49, %v2321_v44  ;;  %v5095_v49 = vld [vmem:[#allocation9 + $0x60] ss:$16 sps:$4 sm:$0xff]   ;;  %v5098_v44 = vld [vmem:[#allocation9 + $0x68] ss:$16 sps:$4 sm:$0xff]  }
 0xa62   :  { %3509 = vtanh.f32 %v2323_v29  ;;  %v5050_v25 = vsel %vm2332_vm5, %v2323_v29, %v4901_v59  ;;  %v5060_v59 = vld [vmem:[#allocation9 + $0x8] ss:$16 sps:$4 sm:$0xff]   ;;  %v5104_v29 = vld [vmem:[#allocation9 + $0x8c] ss:$16 sps:$4 sm:$0xff]  }
 0xa6c   :  { %v3510_v11 = vpop.eup %3509 }
 0xa6d   :  { %v2325_v37 = vmul.f32 %v3510_v11, %v2319_v34  ;;  %v5113_v34 = vld [vmem:[#allocation9 + $0xa4] ss:$16 sps:$4 sm:$0xff]   ;;  %v5116_v11 = vld [vmem:[#allocation9 + $0xac] ss:$16 sps:$4 sm:$0xff]  }
 0xa6e   :  { %5905 = vst [vmem:[#allocation34_spill] sm:$0xff] %v5113_v34  ;;  %5906 = vst [vmem:[#allocation35_spill] sm:$0xff] %v5116_v11 }
 0xa6f   :  { %v5053_v56 = vsel %vm2332_vm5, %v2325_v37, %v4904_v33  ;;  %v2338_v1 = vsel %vm2332_vm5, %v2325_v37, 0.0  ;;  %v5066_v33 = vld [vmem:[#allocation9 + $0x2c] ss:$16 sps:$4 sm:$0xff]   ;;  %v5119_v37 = vld [vmem:[#allocation9 + $0xa0] ss:$16 sps:$4 sm:$0xff]  }
 0xa70   :  { %2339 = vst [vmem:[#allocation12 + $0x40] sm:$0xff] %v2338_v1  ;;  %v2344_v48 = vpack.c.bf16 %v5053_v56, %v5053_v56  ;;  %5907 = vst [vmem:[#allocation36_spill] sm:$0xff] %v5119_v37  ;;  %v5122_v1 = vld [vmem:[#allocation9 + $0xa8] ss:$16 sps:$4 sm:$0xff]  }
 0xa71   :  { %5908 = vst [vmem:[#allocation37_spill] sm:$0xff] %v5122_v1 }
 0xa72   :  { %2378 = vmatmul.mubr.bf16.vlgmr.msra.gmra.mrb[72].mxu0 %v2344_v48  ;;  %2419 = vmatmul.mubr.bf16.vlgmr.msra.gmra.mrb[72].mxu1 %v2344_v48  ;;  %v5125_v48 = vld [vmem:[#allocation9 + $0xc4] ss:$16 sps:$4 sm:$0xff]  }
 0xa73   :  { %2428 = vmatpush1.bf16.msra.mxu0 %v5057_v39  ;;  %2469 = vmatpush1.bf16.msra.mxu1 %v5060_v59  ;;  %5909 = vst [vmem:[#allocation38_spill] sm:$0xff] %v5125_v48 }
 0xa74   :  { %2429 = vmatprep.subr.bf16.mxu0 %v5063_v46  ;;  %2470 = vmatprep.subr.bf16.mxu1 %v5066_v33 }
 0xa75   :  { %2459 = vmatprep.mubr.bf16.mxu0 %v5692_v21  ;;  %2500 = vmatprep.mubr.bf16.mxu1 %v5692_v21 }
 0xa77   :  { %2430 = vmatpush1.bf16.msra.mxu0 %v5071_v17  ;;  %2471 = vmatpush1.bf16.msra.mxu1 %v5074_v54 }
 0xa78   :  { %2431 = vmatprep.subr.bf16.mxu0 %v5077_v51  ;;  %2472 = vmatprep.subr.bf16.mxu1 %v5080_v40 }
 0xa7b   :  { %2432 = vmatpush1.bf16.msra.mxu0 %v5083_v47  ;;  %2473 = vmatpush1.bf16.msra.mxu1 %v5086_v41 }
 0xa7c   :  { %2433 = vmatprep.subr.bf16.mxu0 %v5089_v42  ;;  %2474 = vmatprep.subr.bf16.mxu1 %v5092_v43 }
 0xa7f   :  { %2434 = vmatpush1.bf16.msra.mxu0 %v5095_v49  ;;  %2475 = vmatpush1.bf16.msra.mxu1 %v5098_v44 }
 0xa80   :  { %2435 = vmatprep.subr.bf16.mxu0 %v5101_v53  ;;  %2476 = vmatprep.subr.bf16.mxu1 %v5104_v29 }
 0xa83   :  { %2436 = vmatpush1.bf16.msra.mxu0 %v5107_v52  ;;  %2477 = vmatpush1.bf16.msra.mxu1 %v5110_v30  ;;  %v5128_v30 = vld [vmem:[#allocation9 + $0xcc] ss:$16 sps:$4 sm:$0xff]  }
 0xa84   :  { %2437 = vmatprep.subr.bf16.mxu0 %v5113_v34  ;;  %2478 = vmatprep.subr.bf16.mxu1 %v5116_v11  ;;  %5910 = vst [vmem:[#allocation39_spill] sm:$0xff] %v5128_v30  ;;  %v5131_v34 = vld [vmem:[#allocation9 + $0xc0] ss:$16 sps:$4 sm:$0xff]   ;;  %v5134_v11 = vld [vmem:[#allocation9 + $0xc8] ss:$16 sps:$4 sm:$0xff]  }
 0xa85   :  { %5911 = vst [vmem:[#allocation40_spill] sm:$0xff] %v5131_v34 }
 0xa87   :  { %2438 = vmatpush1.bf16.msra.mxu0 %v5119_v37  ;;  %2479 = vmatpush1.bf16.msra.mxu1 %v5122_v1  ;;  %v5137_v37 = vld [vmem:[#allocation9 + $0xe4] ss:$16 sps:$4 sm:$0xff]   ;;  %v5140_v1 = vld [vmem:[#allocation9 + $0xec] ss:$16 sps:$4 sm:$0xff]  }
 0xa88   :  { %2439 = vmatprep.subr.bf16.mxu0 %v5125_v48  ;;  %2480 = vmatprep.subr.bf16.mxu1 %v5128_v30  ;;  %v5143_v48 = vld [vmem:[#allocation9 + $0xe0] ss:$16 sps:$4 sm:$0xff]   ;;  %v5146_v30 = vld [vmem:[#allocation9 + $0xe8] ss:$16 sps:$4 sm:$0xff]  }
 0xa8b   :  { %2440 = vmatpush1.bf16.msra.mxu0 %v5131_v34  ;;  %2481 = vmatpush1.bf16.msra.mxu1 %v5134_v11  ;;  %v2342_v34 = vld [vmem:[#allocation6 + $0x24] sm:$0xf] }
 0xa8c   :  { %2441 = vmatprep.subr.bf16.mxu0 %v5137_v37  ;;  %2482 = vmatprep.subr.bf16.mxu1 %v5140_v1 }
 0xa8f   :  { %2442 = vmatpush1.bf16.msra.mxu0 %v5143_v48  ;;  %2483 = vmatpush1.bf16.msra.mxu1 %v5146_v30 }
 0xa90   :  { %2551 = vmatprep.subr.bf16.mxu0 %v4940_v8  ;;  %2592 = vmatprep.subr.bf16.mxu1 %v4943_v16 }
 0xa92   :  { %2460 = vmatmul.mubr.bf16.vlgmr.msra.gmra.mrb[76].mxu0 %v2342_v34  ;;  %2501 = vmatmul.mubr.bf16.vlgmr.msra.gmra.mrb[76].mxu1 %v2342_v34 }
 0xa93   :  { %2552 = vmatpush1.bf16.msra.mxu0 %v4946_v3  ;;  %2593 = vmatpush1.bf16.msra.mxu1 %v4949_v32 }
 0xa94   :  { %2553 = vmatprep.subr.bf16.mxu0 %v4952_v26  ;;  %2594 = vmatprep.subr.bf16.mxu1 %v4955_v55 }
 0xa95   :  { %2583 = vmatprep.mubr.bf16.mxu0 %v5692_v21  ;;  %2624 = vmatprep.mubr.bf16.mxu1 %v5692_v21 }
 0xa97   :  { %2554 = vmatpush1.bf16.msra.mxu0 %v4960_v2  ;;  %2595 = vmatpush1.bf16.msra.mxu1 %v4963_v13 }
 0xa98   :  { %2555 = vmatprep.subr.bf16.mxu0 %v4966_v4  ;;  %2596 = vmatprep.subr.bf16.mxu1 %v4969_v5 }
 0xa9b   :  { %2556 = vmatpush1.bf16.msra.mxu0 %v4972_v6  ;;  %2597 = vmatpush1.bf16.msra.mxu1 %v4975_v50 }
 0xa9c   :  { %2557 = vmatprep.subr.bf16.mxu0 %v4978_v10  ;;  %2598 = vmatprep.subr.bf16.mxu1 %v4981_v14 }
 0xa9f   :  { %2558 = vmatpush1.bf16.msra.mxu0 %v4984_v18  ;;  %2599 = vmatpush1.bf16.msra.mxu1 %v4987_v7 }
 0xaa0   :  { %2559 = vmatprep.subr.bf16.mxu0 %v4990_v9  ;;  %2600 = vmatprep.subr.bf16.mxu1 %v4993_v22 }
 0xaa3   :  { %2560 = vmatpush1.bf16.msra.mxu0 %v4996_v28  ;;  %2601 = vmatpush1.bf16.msra.mxu1 %v4999_v38 }
 0xaa4   :  { %2561 = vmatprep.subr.bf16.mxu0 %v5002_v20  ;;  %2602 = vmatprep.subr.bf16.mxu1 %v5005_v12 }
 0xaa7   :  { %2562 = vmatpush1.bf16.msra.mxu0 %v5008_v27  ;;  %2603 = vmatpush1.bf16.msra.mxu1 %v5011_v0 }
 0xaa8   :  { %2563 = vmatprep.subr.bf16.mxu0 %v5014_v23  ;;  %2604 = vmatprep.subr.bf16.mxu1 %v5017_v62 }
 0xaab   :  { %2564 = vmatpush1.bf16.msra.mxu0 %v5020_v60  ;;  %2605 = vmatpush1.bf16.msra.mxu1 %v5023_v58 }
 0xaac   :  { %2565 = vmatprep.subr.bf16.mxu0 %v5026_v35  ;;  %2606 = vmatprep.subr.bf16.mxu1 %v5029_v61 }
 0xaaf   :  { %2566 = vmatpush1.bf16.msra.mxu0 %v5032_v45  ;;  %2607 = vmatpush1.bf16.msra.mxu1 %v5035_v63 }
 0xab0   :  { %2633 = vmatprep.subr.bf16.mxu0 %v5038_v57  ;;  %2674 = vmatprep.subr.bf16.mxu1 %v5041_v15 }
 0xb45   :  { %v2379_v34 = vpop.f32.mrb[72].mxu0  ;;  %v2420_v23 = vpop.f32.mrb[72].mxu1 }
 0xb46   :  { %v2381_v0 = vpop.f32.mrb[73].mxu0  ;;  %v2422_v62 = vpop.f32.mrb[73].mxu1 }
 0xb47   :  { %v2383_v27 = vpop.f32.mrb[74].mxu0  ;;  %v2424_v60 = vpop.f32.mrb[74].mxu1 }
 0xb48   :  { %v2384_v12 = vpop.f32.mrb[75].mxu0  ;;  %v2425_v58 = vpop.f32.mrb[75].mxu1 }
 0xb65   :  { %v2461_v20 = vpop.f32.mrb[76].mxu0  ;;  %v2502_v35 = vpop.f32.mrb[76].mxu1 }
 0xb66   :  { %v2462_v38 = vadd.f32 %v2461_v20, %v2379_v34  ;;  %v2503_v61 = vadd.f32 %v2502_v35, %v2420_v23  ;;  %v2463_v28 = vpop.f32.mrb[77].mxu0  ;;  %v2504_v45 = vpop.f32.mrb[77].mxu1 }
 0xb67   :  { %v2464_v22 = vadd.f32 %v2463_v28, %v2381_v0  ;;  %v2505_v63 = vadd.f32 %v2504_v45, %v2422_v62  ;;  %v2465_v9 = vpop.f32.mrb[78].mxu0  ;;  %v2506_v57 = vpop.f32.mrb[78].mxu1 }
 0xb68   :  { %v2509_v15 = vadd.f32 %v2462_v38, %v4182_v31  ;;  %v2466_v7 = vpop.f32.mrb[79].mxu0  ;;  %v2507_v18 = vpop.f32.mrb[79].mxu1  ;;  %v2511_v12 = vadd.f32 %v2503_v61, %v4187_v19 }
 0xb69   :  { %v2510_v14 = vadd.f32 %v2464_v22, %v4184_v24  ;;  %v2512_v20 = vadd.f32 %v2505_v63, %v4191_v36 }
 0xb6a   :  { %v2513_v27 = vmul.f32 0.5, %v2509_v15 }
 0xb6b   :  { %v2517_v60 = vmul.f32 0.5, %v2510_v14  ;;  %v2522_v23 = vmul.f32 0.5, %v2512_v20  ;;  %v2537_v14 = vpop.permute.xlu1 %2536  ;;  %v5914_v20 = vld [vmem:[#allocation35_spill] sm:$0xff] }
 0xb6c   :  { %3511 = vtanh.f32 %v2513_v27  ;;  %vm2538_vm6 = vcmp.eq.s32.totalorder %v2537_v14, 1  ;;  %v5924_v14 = vld [vmem:[#allocation54_spill] sm:$0xff] }
 0xb6d   :  { %3513 = vtanh.f32 %v2517_v60 }
 0xb6e   :  { %3515 = vtanh.f32 %v2511_v12 }
 0xb6f   :  { %3517 = vtanh.f32 %v2522_v23  ;;  %v5915_v23 = vld [vmem:[#allocation36_spill] sm:$0xff] }
 0xb76   :  { %v3512_v28 = vpop.eup %3511 }
 0xb77   :  { %v3514_v0 = vpop.eup %3513  ;;  %v2515_v9 = vmul.f32 0.5, %v3512_v28  ;;  %v5916_v28 = vld [vmem:[#allocation37_spill] sm:$0xff] }
 0xb78   :  { %v2519_v62 = vmul.f32 0.5, %v3514_v0  ;;  %v3516_v7 = vpop.eup %3515  ;;  %v5917_v0 = vld [vmem:[#allocation38_spill] sm:$0xff] }
 0xb79   :  { %v2516_v38 = vadd.f32 0.5, %v2515_v9  ;;  %v3518_v45 = vpop.eup %3517  ;;  %v5918_v9 = vld [vmem:[#allocation39_spill] sm:$0xff] }
 0xb7a   :  { %v2520_v18 = vadd.f32 0.5, %v2519_v62  ;;  %v2524_v63 = vmul.f32 0.5, %v3518_v45  ;;  %v5919_v62 = vld [vmem:[#allocation40_spill] sm:$0xff] }
 0xb7b   :  { %v2528_v58 = vmul.f32 %v3516_v7, %v2516_v38  ;;  %v2548_v38 = vld [vmem:[#allocation6 + $0x28] sm:$0xf]  ;;  %v5920_v7 = vld [vmem:[#allocation50_spill] sm:$0xff]  ;;  %v5926_v45 = vld [vmem:[#allocation56_spill] sm:$0xff] }
 0xb7c   :  { %v2527_v22 = vmul.f32 %v2520_v18, %v5050_v25  ;;  %v2525_v57 = vadd.f32 0.5, %v2524_v63  ;;  %v5921_v18 = vld [vmem:[#allocation51_spill] sm:$0xff]  ;;  %v5927_v63 = vld [vmem:[#allocation49_spill] sm:$0xff] }
 0xb7e   :  { %v2529_v35 = vadd.f32 %v2528_v58, %v2527_v22  ;;  %v5922_v58 = vld [vmem:[#allocation52_spill] sm:$0xff]  ;;  %v5923_v22 = vld [vmem:[#allocation53_spill] sm:$0xff] }
 0xb80   :  { %3519 = vtanh.f32 %v2529_v35  ;;  %v5191_v61 = vsel %vm2538_vm6, %v2529_v35, %v5050_v25  ;;  %v5912_v25 = vld [vmem:[#allocation33_spill] sm:$0xff]  ;;  %v5925_v35 = vld [vmem:[#allocation55_spill] sm:$0xff] }
 0xb8a   :  { %v3520_v15 = vpop.eup %3519 }
 0xb8b   :  { %v2531_v34 = vmul.f32 %v3520_v15, %v2525_v57  ;;  %v5928_v57 = vld [vmem:[#allocation20_spill] sm:$0xff]  ;;  %v5929_v15 = vld [vmem:[#allocation21_spill] sm:$0xff] }
 0xb8d   :  { %v5194_v27 = vsel %vm2538_vm6, %v2531_v34, %v5053_v56  ;;  %v2544_v60 = vsel %vm2538_vm6, %v2531_v34, 0.0  ;;  %v5913_v56 = vld [vmem:[#allocation34_spill] sm:$0xff] }
 0xb8e   :  { %2545 = vst [vmem:[#allocation12 + $0x48] sm:$0xff] %v2544_v60  ;;  %v2550_v12 = vpack.c.bf16 %v5194_v27, %v5194_v27  ;;  %v5930_v34 = vld [vmem:[#allocation22_spill] sm:$0xff]  ;;  %v5931_v60 = vld [vmem:[#allocation23_spill] sm:$0xff] }
 0xb90   :  { %2584 = vmatmul.mubr.bf16.vlgmr.msra.gmra.mrb[80].mxu0 %v2550_v12  ;;  %2625 = vmatmul.mubr.bf16.vlgmr.msra.gmra.mrb[80].mxu1 %v2550_v12  ;;  %v5932_v12 = vld [vmem:[#allocation24_spill] sm:$0xff] }
 0xb91   :  { %2634 = vmatpush1.bf16.msra.mxu0 %v5057_v39  ;;  %2675 = vmatpush1.bf16.msra.mxu1 %v5060_v59 }
 0xb92   :  { %2635 = vmatprep.subr.bf16.mxu0 %v5063_v46  ;;  %2676 = vmatprep.subr.bf16.mxu1 %v5066_v33 }
 0xb93   :  { %2665 = vmatprep.mubr.bf16.mxu0 %v5692_v21  ;;  %2706 = vmatprep.mubr.bf16.mxu1 %v5692_v21 }
 0xb95   :  { %2636 = vmatpush1.bf16.msra.mxu0 %v5071_v17  ;;  %2677 = vmatpush1.bf16.msra.mxu1 %v5074_v54 }
 0xb96   :  { %2637 = vmatprep.subr.bf16.mxu0 %v5077_v51  ;;  %2678 = vmatprep.subr.bf16.mxu1 %v5080_v40 }
 0xb99   :  { %2638 = vmatpush1.bf16.msra.mxu0 %v5083_v47  ;;  %2679 = vmatpush1.bf16.msra.mxu1 %v5086_v41 }
 0xb9a   :  { %2639 = vmatprep.subr.bf16.mxu0 %v5089_v42  ;;  %2680 = vmatprep.subr.bf16.mxu1 %v5092_v43 }
 0xb9d   :  { %2640 = vmatpush1.bf16.msra.mxu0 %v5095_v49  ;;  %2681 = vmatpush1.bf16.msra.mxu1 %v5098_v44 }
 0xb9e   :  { %2641 = vmatprep.subr.bf16.mxu0 %v5101_v53  ;;  %2682 = vmatprep.subr.bf16.mxu1 %v5104_v29 }
 0xba1   :  { %2642 = vmatpush1.bf16.msra.mxu0 %v5107_v52  ;;  %2683 = vmatpush1.bf16.msra.mxu1 %v5912_v25 }
 0xba2   :  { %2643 = vmatprep.subr.bf16.mxu0 %v5913_v56  ;;  %2684 = vmatprep.subr.bf16.mxu1 %v5914_v20 }
 0xba5   :  { %2644 = vmatpush1.bf16.msra.mxu0 %v5915_v23  ;;  %2685 = vmatpush1.bf16.msra.mxu1 %v5916_v28 }
 0xba6   :  { %2645 = vmatprep.subr.bf16.mxu0 %v5917_v0  ;;  %2686 = vmatprep.subr.bf16.mxu1 %v5918_v9 }
 0xba9   :  { %2646 = vmatpush1.bf16.msra.mxu0 %v5919_v62  ;;  %2687 = vmatpush1.bf16.msra.mxu1 %v5134_v11 }
 0xbaa   :  { %2647 = vmatprep.subr.bf16.mxu0 %v5137_v37  ;;  %2688 = vmatprep.subr.bf16.mxu1 %v5140_v1 }
 0xbad   :  { %2648 = vmatpush1.bf16.msra.mxu0 %v5143_v48  ;;  %2689 = vmatpush1.bf16.msra.mxu1 %v5146_v30 }
 0xbae   :  { %2757 = vmatprep.subr.bf16.mxu0 %v4940_v8  ;;  %2798 = vmatprep.subr.bf16.mxu1 %v4943_v16 }
 0xbb0   :  { %2666 = vmatmul.mubr.bf16.vlgmr.msra.gmra.mrb[84].mxu0 %v2548_v38  ;;  %2707 = vmatmul.mubr.bf16.vlgmr.msra.gmra.mrb[84].mxu1 %v2548_v38  ;;  %v5933_v38 = vld [vmem:[#allocation25_spill] sm:$0xff] }
 0xbb1   :  { %2758 = vmatpush1.bf16.msra.mxu0 %v4946_v3  ;;  %2799 = vmatpush1.bf16.msra.mxu1 %v4949_v32 }
 0xbb2   :  { %2759 = vmatprep.subr.bf16.mxu0 %v4952_v26  ;;  %2800 = vmatprep.subr.bf16.mxu1 %v4955_v55 }
 0xbb3   :  { %2789 = vmatprep.mubr.bf16.mxu0 %v5692_v21  ;;  %2830 = vmatprep.mubr.bf16.mxu1 %v5692_v21 }
 0xbb5   :  { %2760 = vmatpush1.bf16.msra.mxu0 %v4960_v2  ;;  %2801 = vmatpush1.bf16.msra.mxu1 %v4963_v13 }
 0xbb6   :  { %2761 = vmatprep.subr.bf16.mxu0 %v4966_v4  ;;  %2802 = vmatprep.subr.bf16.mxu1 %v4969_v5 }
 0xbb9   :  { %2762 = vmatpush1.bf16.msra.mxu0 %v4972_v6  ;;  %2803 = vmatpush1.bf16.msra.mxu1 %v4975_v50 }
 0xbba   :  { %2763 = vmatprep.subr.bf16.mxu0 %v4978_v10  ;;  %2804 = vmatprep.subr.bf16.mxu1 %v5920_v7 }
 0xbbd   :  { %2764 = vmatpush1.bf16.msra.mxu0 %v5921_v18  ;;  %2805 = vmatpush1.bf16.msra.mxu1 %v5922_v58 }
 0xbbe   :  { %2765 = vmatprep.subr.bf16.mxu0 %v5923_v22  ;;  %2806 = vmatprep.subr.bf16.mxu1 %v5924_v14  ;;  %v5934_v22 = vld [vmem:[#allocation26_spill] sm:$0xff]  ;;  %v5935_v14 = vld [vmem:[#allocation27_spill] sm:$0xff] }
 0xbc1   :  { %2766 = vmatpush1.bf16.msra.mxu0 %v5925_v35  ;;  %2807 = vmatpush1.bf16.msra.mxu1 %v5926_v45  ;;  %v5936_v35 = vld [vmem:[#allocation28_spill] sm:$0xff]  ;;  %v5937_v45 = vld [vmem:[#allocation29_spill] sm:$0xff] }
 0xbc2   :  { %2767 = vmatprep.subr.bf16.mxu0 %v5927_v63  ;;  %2808 = vmatprep.subr.bf16.mxu1 %v5928_v57  ;;  %v5938_v63 = vld [vmem:[#allocation30_spill] sm:$0xff]  ;;  %v5939_v57 = vld [vmem:[#allocation31_spill] sm:$0xff] }
 0xbc5   :  { %2768 = vmatpush1.bf16.msra.mxu0 %v5929_v15  ;;  %2809 = vmatpush1.bf16.msra.mxu1 %v5930_v34  ;;  %v5940_v15 = vld [vmem:[#allocation32_spill] sm:$0xff] }
 0xbc6   :  { %2769 = vmatprep.subr.bf16.mxu0 %v5931_v60  ;;  %2810 = vmatprep.subr.bf16.mxu1 %v5932_v12 }
 0xbc9   :  { %2770 = vmatpush1.bf16.msra.mxu0 %v5933_v38  ;;  %2811 = vmatpush1.bf16.msra.mxu1 %v5934_v22 }
 0xbca   :  { %2771 = vmatprep.subr.bf16.mxu0 %v5935_v14  ;;  %2812 = vmatprep.subr.bf16.mxu1 %v5936_v35 }
 0xbcd   :  { %2772 = vmatpush1.bf16.msra.mxu0 %v5937_v45  ;;  %2813 = vmatpush1.bf16.msra.mxu1 %v5938_v63 }
 0xbce   :  { %2839 = vmatprep.subr.bf16.mxu0 %v5939_v57  ;;  %2880 = vmatprep.subr.bf16.mxu1 %v5940_v15 }
 0xc63   :  { %v2585_v34 = vpop.f32.mrb[80].mxu0  ;;  %v2626_v60 = vpop.f32.mrb[80].mxu1 }
 0xc64   :  { %v2587_v58 = vpop.f32.mrb[81].mxu0  ;;  %v2628_v12 = vpop.f32.mrb[81].mxu1 }
 0xc65   :  { %v2589_v18 = vpop.f32.mrb[82].mxu0  ;;  %v2630_v38 = vpop.f32.mrb[82].mxu1 }
 0xc66   :  { %v2590_v7 = vpop.f32.mrb[83].mxu0  ;;  %v2631_v22 = vpop.f32.mrb[83].mxu1 }
 0xc83   :  { %v2667_v10 = vpop.f32.mrb[84].mxu0  ;;  %v2708_v14 = vpop.f32.mrb[84].mxu1 }
 0xc84   :  { %v2668_v50 = vadd.f32 %v2667_v10, %v2585_v34  ;;  %v2709_v35 = vadd.f32 %v2708_v14, %v2626_v60  ;;  %v2669_v6 = vpop.f32.mrb[85].mxu0  ;;  %v2710_v45 = vpop.f32.mrb[85].mxu1 }
 0xc85   :  { %v2670_v5 = vadd.f32 %v2669_v6, %v2587_v58  ;;  %v2711_v63 = vadd.f32 %v2710_v45, %v2628_v12  ;;  %v2671_v4 = vpop.f32.mrb[86].mxu0  ;;  %v2712_v57 = vpop.f32.mrb[86].mxu1 }
 0xc86   :  { %v2715_v15 = vadd.f32 %v2668_v50, %v4182_v31  ;;  %v2672_v13 = vpop.f32.mrb[87].mxu0  ;;  %v2713_v2 = vpop.f32.mrb[87].mxu1  ;;  %v2717_v7 = vadd.f32 %v2709_v35, %v4187_v19 }
 0xc87   :  { %v2716_v55 = vadd.f32 %v2670_v5, %v4184_v24  ;;  %v2718_v10 = vadd.f32 %v2711_v63, %v4191_v36 }
 0xc88   :  { %v2719_v18 = vmul.f32 0.5, %v2715_v15 }
 0xc89   :  { %v2723_v38 = vmul.f32 0.5, %v2716_v55  ;;  %v2728_v22 = vmul.f32 0.5, %v2718_v10  ;;  %v2743_v55 = vpop.permute.xlu0 %2742  ;;  %v5942_v10 = vld [vmem:[#allocation42_spill] sm:$0xff] }
 0xc8a   :  { %3521 = vtanh.f32 %v2719_v18  ;;  %vm2744_vm7 = vcmp.eq.s32.totalorder %v2743_v55, 1  ;;  %v5958_v55 = vld [vmem:[#allocation21_spill] sm:$0xff] }
 0xc8b   :  { %3523 = vtanh.f32 %v2723_v38 }
 0xc8c   :  { %3525 = vtanh.f32 %v2717_v7 }
 0xc8d   :  { %3527 = vtanh.f32 %v2728_v22  ;;  %v5943_v22 = vld [vmem:[#allocation43_spill] sm:$0xff] }
 0xc94   :  { %v3522_v6 = vpop.eup %3521 }
 0xc95   :  { %v3524_v58 = vpop.eup %3523  ;;  %v2721_v4 = vmul.f32 0.5, %v3522_v6  ;;  %v5946_v6 = vld [vmem:[#allocation46_spill] sm:$0xff] }
 0xc96   :  { %v2725_v14 = vmul.f32 0.5, %v3524_v58  ;;  %v3526_v13 = vpop.eup %3525  ;;  %v5950_v58 = vld [vmem:[#allocation51_spill] sm:$0xff] }
 0xc97   :  { %v2722_v50 = vadd.f32 0.5, %v2721_v4  ;;  %v3528_v63 = vpop.eup %3527  ;;  %v5951_v4 = vld [vmem:[#allocation52_spill] sm:$0xff] }
 0xc98   :  { %v2726_v2 = vadd.f32 0.5, %v2725_v14  ;;  %v2730_v15 = vmul.f32 0.5, %v3528_v63  ;;  %v5952_v14 = vld [vmem:[#allocation53_spill] sm:$0xff]  ;;  %v5960_v63 = vld [vmem:[#allocation23_spill] sm:$0xff] }
 0xc99   :  { %v2734_v45 = vmul.f32 %v3526_v13, %v2722_v50  ;;  %v5953_v50 = vld [vmem:[#allocation54_spill] sm:$0xff]  ;;  %v5954_v13 = vld [vmem:[#allocation55_spill] sm:$0xff] }
 0xc9a   :  { %v2733_v5 = vmul.f32 %v2726_v2, %v5191_v61  ;;  %v2731_v34 = vadd.f32 0.5, %v2730_v15  ;;  %v5955_v2 = vld [vmem:[#allocation56_spill] sm:$0xff] }
 0xc9b   :  { %v5961_v15 = vld [vmem:[#allocation24_spill] sm:$0xff] }
 0xc9c   :  { %v2735_v57 = vadd.f32 %v2734_v45, %v2733_v5  ;;  %v5956_v45 = vld [vmem:[#allocation49_spill] sm:$0xff]  ;;  %v5957_v5 = vld [vmem:[#allocation20_spill] sm:$0xff] }
 0xc9e   :  { %3529 = vtanh.f32 %v2735_v57  ;;  %v5272_v35 = vsel %vm2744_vm7, %v2735_v57, %v5191_v61  ;;  %v2754_v61 = vld [vmem:[#allocation6 + $0x2c] sm:$0xf]  ;;  %v5959_v57 = vld [vmem:[#allocation22_spill] sm:$0xff] }
 0xca8   :  { %v3530_v60 = vpop.eup %3529 }
 0xca9   :  { %v2737_v12 = vmul.f32 %v3530_v60, %v2731_v34  ;;  %v5962_v34 = vld [vmem:[#allocation25_spill] sm:$0xff]  ;;  %v5963_v60 = vld [vmem:[#allocation26_spill] sm:$0xff] }
 0xcab   :  { %v5275_v18 = vsel %vm2744_vm7, %v2737_v12, %v5194_v27  ;;  %v2750_v38 = vsel %vm2744_vm7, %v2737_v12, 0.0  ;;  %v5941_v27 = vld [vmem:[#allocation41_spill] sm:$0xff]  ;;  %v5964_v12 = vld [vmem:[#allocation27_spill] sm:$0xff] }
 0xcac   :  { %2751 = vst [vmem:[#allocation12 + $0x50] sm:$0xff] %v2750_v38  ;;  %v2756_v7 = vpack.c.bf16 %v5275_v18, %v5275_v18  ;;  %v5965_v38 = vld [vmem:[#allocation28_spill] sm:$0xff] }
 0xcae   :  { %2790 = vmatmul.mubr.bf16.vlgmr.msra.gmra.mrb[88].mxu0 %v2756_v7  ;;  %2831 = vmatmul.mubr.bf16.vlgmr.msra.gmra.mrb[88].mxu1 %v2756_v7  ;;  %v5966_v7 = vld [vmem:[#allocation29_spill] sm:$0xff] }
 0xcaf   :  { %2840 = vmatpush1.bf16.msra.mxu0 %v5057_v39  ;;  %2881 = vmatpush1.bf16.msra.mxu1 %v5060_v59 }
 0xcb0   :  { %2841 = vmatprep.subr.bf16.mxu0 %v5063_v46  ;;  %2882 = vmatprep.subr.bf16.mxu1 %v5066_v33 }
 0xcb1   :  { %2871 = vmatprep.mubr.bf16.mxu0 %v5692_v21  ;;  %2912 = vmatprep.mubr.bf16.mxu1 %v5692_v21 }
 0xcb3   :  { %2842 = vmatpush1.bf16.msra.mxu0 %v5071_v17  ;;  %2883 = vmatpush1.bf16.msra.mxu1 %v5074_v54 }
 0xcb4   :  { %2843 = vmatprep.subr.bf16.mxu0 %v5077_v51  ;;  %2884 = vmatprep.subr.bf16.mxu1 %v5080_v40 }
 0xcb7   :  { %2844 = vmatpush1.bf16.msra.mxu0 %v5083_v47  ;;  %2885 = vmatpush1.bf16.msra.mxu1 %v5086_v41 }
 0xcb8   :  { %2845 = vmatprep.subr.bf16.mxu0 %v5089_v42  ;;  %2886 = vmatprep.subr.bf16.mxu1 %v5092_v43 }
 0xcbb   :  { %2846 = vmatpush1.bf16.msra.mxu0 %v5095_v49  ;;  %2887 = vmatpush1.bf16.msra.mxu1 %v5098_v44 }
 0xcbc   :  { %2847 = vmatprep.subr.bf16.mxu0 %v5101_v53  ;;  %2888 = vmatprep.subr.bf16.mxu1 %v5104_v29 }
 0xcbf   :  { %2848 = vmatpush1.bf16.msra.mxu0 %v5107_v52  ;;  %2889 = vmatpush1.bf16.msra.mxu1 %v5912_v25 }
 0xcc0   :  { %2849 = vmatprep.subr.bf16.mxu0 %v5913_v56  ;;  %2890 = vmatprep.subr.bf16.mxu1 %v5914_v20 }
 0xcc3   :  { %2850 = vmatpush1.bf16.msra.mxu0 %v5915_v23  ;;  %2891 = vmatpush1.bf16.msra.mxu1 %v5916_v28 }
 0xcc4   :  { %2851 = vmatprep.subr.bf16.mxu0 %v5917_v0  ;;  %2892 = vmatprep.subr.bf16.mxu1 %v5918_v9 }
 0xcc7   :  { %2852 = vmatpush1.bf16.msra.mxu0 %v5919_v62  ;;  %2893 = vmatpush1.bf16.msra.mxu1 %v5134_v11 }
 0xcc8   :  { %2853 = vmatprep.subr.bf16.mxu0 %v5137_v37  ;;  %2894 = vmatprep.subr.bf16.mxu1 %v5140_v1 }
 0xccb   :  { %2854 = vmatpush1.bf16.msra.mxu0 %v5143_v48  ;;  %2895 = vmatpush1.bf16.msra.mxu1 %v5146_v30 }
 0xccc   :  { %2963 = vmatprep.subr.bf16.mxu0 %v4940_v8  ;;  %3004 = vmatprep.subr.bf16.mxu1 %v4943_v16  ;;  %v5944_v8 = vld [vmem:[#allocation44_spill] sm:$0xff]  ;;  %v5945_v16 = vld [vmem:[#allocation45_spill] sm:$0xff] }
 0xcce   :  { %2872 = vmatmul.mubr.bf16.vlgmr.msra.gmra.mrb[92].mxu0 %v2754_v61  ;;  %2913 = vmatmul.mubr.bf16.vlgmr.msra.gmra.mrb[92].mxu1 %v2754_v61  ;;  %v5967_v61 = vld [vmem:[#allocation30_spill] sm:$0xff] }
 0xccf   :  { %2964 = vmatpush1.bf16.msra.mxu0 %v4946_v3  ;;  %3005 = vmatpush1.bf16.msra.mxu1 %v4949_v32  ;;  %v5947_v3 = vld [vmem:[#allocation47_spill] sm:$0xff]  ;;  %v5948_v32 = vld [vmem:[#allocation48_spill] sm:$0xff] }
 0xcd0   :  { %2965 = vmatprep.subr.bf16.mxu0 %v4952_v26  ;;  %3006 = vmatprep.subr.bf16.mxu1 %v5941_v27  ;;  %v5949_v26 = vld [vmem:[#allocation50_spill] sm:$0xff]  ;;  %v5968_v27 = vld [vmem:[#allocation31_spill] sm:$0xff] }
 0xcd1   :  { %2995 = vmatprep.mubr.bf16.mxu0 %v5692_v21  ;;  %3036 = vmatprep.mubr.bf16.mxu1 %v5692_v21 }
 0xcd3   :  { %2966 = vmatpush1.bf16.msra.mxu0 %v5942_v10  ;;  %3007 = vmatpush1.bf16.msra.mxu1 %v5943_v22  ;;  %v5969_v10 = vld [vmem:[#allocation32_spill] sm:$0xff] }
 0xcd4   :  { %2967 = vmatprep.subr.bf16.mxu0 %v5944_v8  ;;  %3008 = vmatprep.subr.bf16.mxu1 %v5945_v16 }
 0xcd7   :  { %2968 = vmatpush1.bf16.msra.mxu0 %v5946_v6  ;;  %3009 = vmatpush1.bf16.msra.mxu1 %v5947_v3 }
 0xcd8   :  { %2969 = vmatprep.subr.bf16.mxu0 %v5948_v32  ;;  %3010 = vmatprep.subr.bf16.mxu1 %v5949_v26 }
 0xcdb   :  { %2970 = vmatpush1.bf16.msra.mxu0 %v5950_v58  ;;  %3011 = vmatpush1.bf16.msra.mxu1 %v5951_v4 }
 0xcdc   :  { %2971 = vmatprep.subr.bf16.mxu0 %v5952_v14  ;;  %3012 = vmatprep.subr.bf16.mxu1 %v5953_v50 }
 0xcdf   :  { %2972 = vmatpush1.bf16.msra.mxu0 %v5954_v13  ;;  %3013 = vmatpush1.bf16.msra.mxu1 %v5955_v2 }
 0xce0   :  { %2973 = vmatprep.subr.bf16.mxu0 %v5956_v45  ;;  %3014 = vmatprep.subr.bf16.mxu1 %v5957_v5 }
 0xce3   :  { %2974 = vmatpush1.bf16.msra.mxu0 %v5958_v55  ;;  %3015 = vmatpush1.bf16.msra.mxu1 %v5959_v57 }
 0xce4   :  { %2975 = vmatprep.subr.bf16.mxu0 %v5960_v63  ;;  %3016 = vmatprep.subr.bf16.mxu1 %v5961_v15 }
 0xce7   :  { %2976 = vmatpush1.bf16.msra.mxu0 %v5962_v34  ;;  %3017 = vmatpush1.bf16.msra.mxu1 %v5963_v60 }
 0xce8   :  { %2977 = vmatprep.subr.bf16.mxu0 %v5964_v12  ;;  %3018 = vmatprep.subr.bf16.mxu1 %v5965_v38 }
 0xceb   :  { %2978 = vmatpush1.bf16.msra.mxu0 %v5966_v7  ;;  %3019 = vmatpush1.bf16.msra.mxu1 %v5967_v61 }
 0xcec   :  { %3045 = vmatprep.subr.bf16.mxu0 %v5968_v27  ;;  %3086 = vmatprep.subr.bf16.mxu1 %v5969_v10 }
 0xd81   :  { %v2791_v22 = vpop.f32.mrb[88].mxu0  ;;  %v2832_v8 = vpop.f32.mrb[88].mxu1 }
 0xd82   :  { %v2793_v16 = vpop.f32.mrb[89].mxu0  ;;  %v2834_v6 = vpop.f32.mrb[89].mxu1 }
 0xd83   :  { %v2795_v3 = vpop.f32.mrb[90].mxu0  ;;  %v2836_v32 = vpop.f32.mrb[90].mxu1 }
 0xd84   :  { %v2796_v26 = vpop.f32.mrb[91].mxu0  ;;  %v2837_v58 = vpop.f32.mrb[91].mxu1 }
 0xda1   :  { %v2873_v4 = vpop.f32.mrb[92].mxu0  ;;  %v2914_v14 = vpop.f32.mrb[92].mxu1 }
 0xda2   :  { %v2874_v50 = vadd.f32 %v2873_v4, %v2791_v22  ;;  %v2915_v13 = vadd.f32 %v2914_v14, %v2832_v8  ;;  %v2875_v2 = vpop.f32.mrb[93].mxu0  ;;  %v2916_v45 = vpop.f32.mrb[93].mxu1 }
 0xda3   :  { %v2876_v5 = vadd.f32 %v2875_v2, %v2793_v16  ;;  %v2917_v55 = vadd.f32 %v2916_v45, %v2834_v6  ;;  %v2877_v57 = vpop.f32.mrb[94].mxu0  ;;  %v2918_v63 = vpop.f32.mrb[94].mxu1 }
 0xda4   :  { %v2921_v15 = vadd.f32 %v2874_v50, %v4182_v31  ;;  %v2878_v34 = vpop.f32.mrb[95].mxu0  ;;  %v2919_v60 = vpop.f32.mrb[95].mxu1  ;;  %v2923_v61 = vadd.f32 %v2915_v13, %v4187_v19 }
 0xda5   :  { %v2922_v12 = vadd.f32 %v2876_v5, %v4184_v24  ;;  %v2924_v27 = vadd.f32 %v2917_v55, %v4191_v36  ;;  %v2949_v4 = vpop.permute.xlu1 %2948 }
 0xda6   :  { %v2925_v38 = vmul.f32 0.5, %v2921_v15  ;;  %vm2950_vm8 = vcmp.eq.s32.totalorder %v2949_v4, 1 }
 0xda7   :  { %v2929_v7 = vmul.f32 0.5, %v2922_v12  ;;  %v2934_v10 = vmul.f32 0.5, %v2924_v27 }
 0xda8   :  { %3531 = vtanh.f32 %v2925_v38 }
 0xda9   :  { %3533 = vtanh.f32 %v2929_v7 }
 0xdaa   :  { %3535 = vtanh.f32 %v2923_v61 }
 0xdab   :  { %3537 = vtanh.f32 %v2934_v10 }
 0xdb2   :  { %v3532_v22 = vpop.eup %3531 }
 0xdb3   :  { %v3534_v8 = vpop.eup %3533  ;;  %v2927_v16 = vmul.f32 0.5, %v3532_v22 }
 0xdb4   :  { %v2931_v6 = vmul.f32 0.5, %v3534_v8  ;;  %v3536_v32 = vpop.eup %3535 }
 0xdb5   :  { %v2928_v3 = vadd.f32 0.5, %v2927_v16  ;;  %v3538_v2 = vpop.eup %3537 }
 0xdb6   :  { %v2932_v26 = vadd.f32 0.5, %v2931_v6  ;;  %v2936_v45 = vmul.f32 0.5, %v3538_v2 }
 0xdb7   :  { %v2940_v58 = vmul.f32 %v3536_v32, %v2928_v3 }
 0xdb8   :  { %v2939_v14 = vmul.f32 %v2932_v26, %v5272_v35  ;;  %v2937_v5 = vadd.f32 0.5, %v2936_v45 }
 0xdba   :  { %v2941_v50 = vadd.f32 %v2940_v58, %v2939_v14 }
 0xdbc   :  { %3539 = vtanh.f32 %v2941_v50  ;;  %v5353_v13 = vsel %vm2950_vm8, %v2941_v50, %v5272_v35 }
 0xdc6   :  { %v3540_v55 = vpop.eup %3539 }
 0xdc7   :  { %v2943_v57 = vmul.f32 %v3540_v55, %v2937_v5 }
 0xdc9   :  { %v5356_v63 = vsel %vm2950_vm8, %v2943_v57, %v5275_v18  ;;  %v2956_v15 = vsel %vm2950_vm8, %v2943_v57, 0.0 }
 0xdca   :  { %2957 = vst [vmem:[#allocation12 + $0x58] sm:$0xff] %v2956_v15  ;;  %v2962_v34 = vpack.c.bf16 %v5356_v63, %v5356_v63 }
 0xdcc   :  { %2996 = vmatmul.mubr.bf16.vlgmr.msra.gmra.mrb[96].mxu0 %v2962_v34  ;;  %3037 = vmatmul.mubr.bf16.vlgmr.msra.gmra.mrb[96].mxu1 %v2962_v34 }
 0xdcd   :  { %3046 = vmatpush1.bf16.msra.mxu0 %v5057_v39  ;;  %3087 = vmatpush1.bf16.msra.mxu1 %v5060_v59 }
 0xdce   :  { %3047 = vmatprep.subr.bf16.mxu0 %v5063_v46  ;;  %3088 = vmatprep.subr.bf16.mxu1 %v5066_v33 }
 0xdcf   :  { %3077 = vmatprep.mubr.bf16.mxu0 %v5692_v21  ;;  %3118 = vmatprep.mubr.bf16.mxu1 %v5692_v21  ;;  %v2960_v21 = vld [vmem:[#allocation6 + $0x30] sm:$0xf] }
 0xdd1   :  { %3048 = vmatpush1.bf16.msra.mxu0 %v5071_v17  ;;  %3089 = vmatpush1.bf16.msra.mxu1 %v5074_v54 }
 0xdd2   :  { %3049 = vmatprep.subr.bf16.mxu0 %v5077_v51  ;;  %3090 = vmatprep.subr.bf16.mxu1 %v5080_v40 }
 0xdd5   :  { %3050 = vmatpush1.bf16.msra.mxu0 %v5083_v47  ;;  %3091 = vmatpush1.bf16.msra.mxu1 %v5086_v41 }
 0xdd6   :  { %3051 = vmatprep.subr.bf16.mxu0 %v5089_v42  ;;  %3092 = vmatprep.subr.bf16.mxu1 %v5092_v43 }
 0xdd9   :  { %3052 = vmatpush1.bf16.msra.mxu0 %v5095_v49  ;;  %3093 = vmatpush1.bf16.msra.mxu1 %v5098_v44 }
 0xdda   :  { %3053 = vmatprep.subr.bf16.mxu0 %v5101_v53  ;;  %3094 = vmatprep.subr.bf16.mxu1 %v5104_v29 }
 0xddd   :  { %3054 = vmatpush1.bf16.msra.mxu0 %v5107_v52  ;;  %3095 = vmatpush1.bf16.msra.mxu1 %v5912_v25 }
 0xdde   :  { %3055 = vmatprep.subr.bf16.mxu0 %v5913_v56  ;;  %3096 = vmatprep.subr.bf16.mxu1 %v5914_v20 }
 0xde1   :  { %3056 = vmatpush1.bf16.msra.mxu0 %v5915_v23  ;;  %3097 = vmatpush1.bf16.msra.mxu1 %v5916_v28 }
 0xde2   :  { %3057 = vmatprep.subr.bf16.mxu0 %v5917_v0  ;;  %3098 = vmatprep.subr.bf16.mxu1 %v5918_v9 }
 0xde5   :  { %3058 = vmatpush1.bf16.msra.mxu0 %v5919_v62  ;;  %3099 = vmatpush1.bf16.msra.mxu1 %v5134_v11 }
 0xde6   :  { %3059 = vmatprep.subr.bf16.mxu0 %v5137_v37  ;;  %3100 = vmatprep.subr.bf16.mxu1 %v5140_v1 }
 0xde9   :  { %3060 = vmatpush1.bf16.msra.mxu0 %v5143_v48  ;;  %3101 = vmatpush1.bf16.msra.mxu1 %v5146_v30 }
 0xdec   :  { %3078 = vmatmul.mubr.bf16.vlgmr.msra.gmra.mrb[100].mxu0 %v2960_v21  ;;  %3119 = vmatmul.mubr.bf16.vlgmr.msra.gmra.mrb[100].mxu1 %v2960_v21 }
 0xe9f   :  { %v2997_v39 = vpop.f32.mrb[96].mxu0  ;;  %v3038_v59 = vpop.f32.mrb[96].mxu1 }
 0xea0   :  { %v2999_v46 = vpop.f32.mrb[97].mxu0  ;;  %v3040_v33 = vpop.f32.mrb[97].mxu1 }
 0xea1   :  { %v3001_v17 = vpop.f32.mrb[98].mxu0  ;;  %v3042_v54 = vpop.f32.mrb[98].mxu1 }
 0xea2   :  { %v3002_v51 = vpop.f32.mrb[99].mxu0  ;;  %v3043_v40 = vpop.f32.mrb[99].mxu1 }
 0xebf   :  { %v3079_v47 = vpop.f32.mrb[100].mxu0  ;;  %v3120_v41 = vpop.f32.mrb[100].mxu1 }
 0xec0   :  { %v3080_v42 = vadd.f32 %v3079_v47, %v2997_v39  ;;  %v3121_v43 = vadd.f32 %v3120_v41, %v3038_v59  ;;  %v3081_v49 = vpop.f32.mrb[101].mxu0  ;;  %v3122_v44 = vpop.f32.mrb[101].mxu1 }
 0xec1   :  { %v3082_v53 = vadd.f32 %v3081_v49, %v2999_v46  ;;  %v3123_v29 = vadd.f32 %v3122_v44, %v3040_v33  ;;  %v3083_v52 = vpop.f32.mrb[102].mxu0  ;;  %v3124_v30 = vpop.f32.mrb[102].mxu1 }
 0xec2   :  { %v3127_v11 = vadd.f32 %v3080_v42, %v4182_v31  ;;  %v3084_v37 = vpop.f32.mrb[103].mxu0  ;;  %v3125_v1 = vpop.f32.mrb[103].mxu1  ;;  %v3129_v20 = vadd.f32 %v3121_v43, %v4187_v19 }
 0xec3   :  { %v3128_v48 = vadd.f32 %v3082_v53, %v4184_v24  ;;  %v3130_v23 = vadd.f32 %v3123_v29, %v4191_v36  ;;  %v3155_v24 = vpop.permute.xlu0 %3154 }
 0xec4   :  { %v3131_v25 = vmul.f32 0.5, %v3127_v11  ;;  %vm3156_vm9 = vcmp.eq.s32.totalorder %v3155_v24, 1 }
 0xec5   :  { %v3135_v56 = vmul.f32 0.5, %v3128_v48  ;;  %v3140_v28 = vmul.f32 0.5, %v3130_v23 }
 0xec6   :  { %3541 = vtanh.f32 %v3131_v25 }
 0xec7   :  { %3543 = vtanh.f32 %v3135_v56 }
 0xec8   :  { %3545 = vtanh.f32 %v3129_v20 }
 0xec9   :  { %3547 = vtanh.f32 %v3140_v28 }
 0xed0   :  { %v3542_v0 = vpop.eup %3541 }
 0xed1   :  { %v3544_v9 = vpop.eup %3543  ;;  %v3133_v62 = vmul.f32 0.5, %v3542_v0 }
 0xed2   :  { %v3137_v35 = vmul.f32 0.5, %v3544_v9  ;;  %v3546_v18 = vpop.eup %3545 }
 0xed3   :  { %v3134_v31 = vadd.f32 0.5, %v3133_v62  ;;  %v3548_v36 = vpop.eup %3547 }
 0xed4   :  { %v3138_v60 = vadd.f32 0.5, %v3137_v35  ;;  %v3142_v61 = vmul.f32 0.5, %v3548_v36 }
 0xed5   :  { %v3146_v12 = vmul.f32 %v3546_v18, %v3134_v31 }
 0xed6   :  { %v3145_v38 = vmul.f32 %v3138_v60, %v5353_v13  ;;  %v3143_v27 = vadd.f32 0.5, %v3142_v61 }
 0xed8   :  { %v3147_v7 = vadd.f32 %v3146_v12, %v3145_v38 }
 0xeda   :  { %3549 = vtanh.f32 %v3147_v7  ;;  %v3160_v19 = vsel %vm3156_vm9, %v3147_v7, %v5353_v13 }
 0xedb   :  { %3161 = vst [vmem:[#allocation3] sm:$0xff] %v3160_v19 }
 0xee4   :  { %v3550_v10 = vpop.eup %3549 }
 0xee5   :  { %v3149_v22 = vmul.f32 %v3550_v10, %v3143_v27 }
 0xee7   :  { %v3157_v8 = vsel %vm3156_vm9, %v3149_v22, %v5356_v63  ;;  %v3162_v16 = vsel %vm3156_vm9, %v3149_v22, 0.0 }
 0xee8   :  { %3158 = vst [vmem:[#allocation2] sm:$0xff] %v3157_v8  ;;  %3163 = vst [vmem:[#allocation12 + $0x60] sm:$0xff] %v3162_v16 }
 0xee9 PF:  { %p3309_p11 = scmp.gt.s32.totalorder %s5438_s0, 0 }
 0xeea   :  { %v3828_v6 = vmov (!%p3309_p11), 0.0  }
 0xeeb   :  { %3167 = sbr.rel (%p3309_p11) target bundleno = 3826 (0xef2), region = 45  ;;  %3168 = vst [vmem:[#allocation12] sm:$0xff] (!%p3309_p11), %v3828_v6  ;;  %3169 = vst [vmem:[#allocation12 + $0x8] sm:$0xff] (!%p3309_p11), %v3828_v6 }
 0xeec   :  { %3170 = vst [vmem:[#allocation12 + $0x10] sm:$0xff] (!%p3309_p11), %v3828_v6  ;;  %3171 = vst [vmem:[#allocation12 + $0x18] sm:$0xff] (!%p3309_p11), %v3828_v6 }
 0xeed   :  { %3172 = vst [vmem:[#allocation12 + $0x20] sm:$0xff] (!%p3309_p11), %v3828_v6  ;;  %3173 = vst [vmem:[#allocation12 + $0x28] sm:$0xff] (!%p3309_p11), %v3828_v6 }
 0xeee   :  { %3174 = vst [vmem:[#allocation12 + $0x30] sm:$0xff] (!%p3309_p11), %v3828_v6  ;;  %3175 = vst [vmem:[#allocation12 + $0x38] sm:$0xff] (!%p3309_p11), %v3828_v6 }
 0xeef   :  { %3176 = vst [vmem:[#allocation12 + $0x40] sm:$0xff] (!%p3309_p11), %v3828_v6  ;;  %3177 = vst [vmem:[#allocation12 + $0x48] sm:$0xff] (!%p3309_p11), %v3828_v6 }
 0xef0   :  { %3178 = vst [vmem:[#allocation12 + $0x50] sm:$0xff] (!%p3309_p11), %v3828_v6  ;;  %3179 = vst [vmem:[#allocation12 + $0x58] sm:$0xff] (!%p3309_p11), %v3828_v6 }
 0xef1   :  { %3180 = vst [vmem:[#allocation12 + $0x60] sm:$0xff] (!%p3309_p11), %v3828_v6 }
 0xef2 PF:  { %v3184_v3 = vld [vmem:[#allocation2] sm:$0xff]  ;;  %v3186_v32 = vld [vmem:[#allocation3] sm:$0xff]  ;;  %s3829_s0 = smov [#allocation13]   ;;  %s3830_s27 = smov [#allocation12]  }
 0xef3   :  { %3185 = vst [vmem:[#allocation13] sm:$0xff] %v3184_v3  ;;  %3187 = vst [vmem:[#allocation15] sm:$0xff] %v3186_v32  ;;  %s3204_s26 = sshll.u32 %s3829_s0, 4  ;;  %s3194_s29 = sshll.u32 %s3830_s27, 4  ;;  %s3205_s26 = int_to_ptr.vmem [resolvable:$true] %s3204_s26  ;;  %s3195_s29 = int_to_ptr.vmem [resolvable:$true] %s3194_s29 }
 0xef4   :  { %s3745_s2 = scalar_lea.vmem %s3205_s26, 128  ;;  %p3750_p13 = scmp.lt.s32.totalorder %s3205_s26, %s3205_s26 }
 0xef5   :  { %p3746_p12 = scmp.ne.s32.totalorder %s3205_s26, %s3745_s2  ;;  %p3751_p0 = scmp.lt.s32.totalorder %s3745_s2, %s3745_s2 }
 0xef7   :  { %p3752_p1 = por %p3751_p0, %p3750_p13 }
 0xef9   :  { %p3753_p2 = pnand %p3752_p1, %p3746_p12 }
 0xefb   :  { %3756 = shalt.err (!%p3753_p2)
}
 0xefc   :  { %s3757_s9 = scalar_lea.hbm %s5445_s7, 128 }
 0xefd   :  { %p3758_p3 = scmp.ne.s32.totalorder %s5445_s7, %s3757_s9  ;;  %p3761_p4 = scmp.lt.u32.totalorder %s3757_s9, %s5445_s7 }
 0xeff   :  { %p3763_p5 = pnand %p3761_p4, %p3758_p3 }
 0xf01   :  { %3766 = shalt.err (!%p3763_p5)
}
 0xf02   :  { %3207 = dma.vmem_to_hbm [thread:$0]  %s3205_s26, 128, %s5445_s7, [#allocation14]  }
 0xf03   :  { %s3767_s18 = scalar_lea.vmem %s3195_s29, 1664  ;;  %p3772_p7 = scmp.lt.s32.totalorder %s3195_s29, %s3195_s29 }
 0xf04   :  { %p3768_p6 = scmp.ne.s32.totalorder %s3195_s29, %s3767_s18  ;;  %p3773_p8 = scmp.lt.s32.totalorder %s3767_s18, %s3767_s18 }
 0xf06   :  { %p3774_p9 = por %p3773_p8, %p3772_p7 }
 0xf08   :  { %p3775_p10 = pnand %p3774_p9, %p3768_p6 }
 0xf0a   :  { %3778 = shalt.err (!%p3775_p10)
}
 0xf0b   :  { %s3779_s22 = scalar_lea.hbm %s5444_s6, 1664 }
 0xf0c   :  { %p3780_p11 = scmp.ne.s32.totalorder %s5444_s6, %s3779_s22  ;;  %p3783_p12 = scmp.lt.u32.totalorder %s3779_s22, %s5444_s6 }
 0xf0e   :  { %p3785_p13 = pnand %p3783_p12, %p3780_p11 }
 0xf10   :  { %3788 = shalt.err (!%p3785_p13)
}
 0xf11   :  { %3197 = dma.vmem_to_hbm [thread:$0]  %s3195_s29, 1664, %s5444_s6, [#allocation8]  }
 0xf12   :  { %s3831_s15 = smov [#allocation15]  }
 0xf13   :  { %s3214_s5 = sshll.u32 %s3831_s15, 4  ;;  %s3215_s5 = int_to_ptr.vmem [resolvable:$true] %s3214_s5 }
 0xf14   :  { %s3789_s16 = scalar_lea.vmem %s3215_s5, 128  ;;  %p3794_p1 = scmp.lt.s32.totalorder %s3215_s5, %s3215_s5 }
 0xf15   :  { %p3790_p0 = scmp.ne.s32.totalorder %s3215_s5, %s3789_s16  ;;  %p3795_p2 = scmp.lt.s32.totalorder %s3789_s16, %s3789_s16 }
 0xf17   :  { %p3796_p3 = por %p3795_p2, %p3794_p1 }
 0xf19   :  { %p3797_p4 = pnand %p3796_p3, %p3790_p0 }
 0xf1b   :  { %3800 = shalt.err (!%p3797_p4)
}
 0xf1c   :  { %s3801_s0 = scalar_lea.hbm %s5446_s8, 128 }
 0xf1d   :  { %p3802_p5 = scmp.ne.s32.totalorder %s5446_s8, %s3801_s0  ;;  %p3805_p6 = scmp.lt.u32.totalorder %s3801_s0, %s5446_s8 }
 0xf1f   :  { %p3807_p7 = pnand %p3805_p6, %p3802_p5 }
 0xf21   :  { %3810 = shalt.err (!%p3807_p7)
}
 0xf22   :  { %3217 = dma.vmem_to_hbm [thread:$0]  %s3215_s5, 128, %s5446_s8, [#allocation14]  }
 0xf23   :  { %3815 = dma.done.wait [#allocation8], 1664  }
 0xf24   :  { %3816 = vsyncadd [#allocation8], 4294965632 }
 0xf25   :  { %3817 = dma.done.wait [#allocation14], 256  }
 0xf26   :  { %3818 = vsyncadd [#allocation14], 4294967040 }
 0xf27   :  { %3227 = vsyncpa [#allocation7], 1 }
 0xf28   :  { %3228 = vsyncpa [#allocation10], 1 }
 0xf29   :  { %3229 = vsyncpa [#allocation8], 1 }
 0xf2a   :  { %3230 = vsyncpa [#allocation14], 1 }

</bundles_post_ra>
